<compile_context>
chip_gen: v6e
topology: v6e:2x2x1
jax: 0.10.0
libtpu: 0.0.40
codegen_flags: <defaults>
</compile_context>

<pallas_src>
import jax
import jax.numpy as jnp
from jax.experimental import pallas as pl
from jax.experimental.pallas import tpu as pltpu

OUT_PAD = 128   # fc3 output padded 10 -> 128 for lane-dense stores


def _pick_tile_b(batch):
    """Choose the batch tile.

    - batch <= 256: one exact-size tile (8-aligned) -> no padded-row waste.
    - batch  > 256: 256-aligned tile, capped at 512, sized so the grid has >= 2
      steps (v7x 2-TC sharding via dimension_semantics=("parallel",)).
    """
    if batch <= 256:
        return max(8, pl.cdiv(batch, 8) * 8)
    half = pl.cdiv(batch, 2)
    return min(512, pl.cdiv(half, 256) * 256)


def simplenet_kernel(x_ref, w1_ref, b1_ref, w2_ref, b2_ref, w3_ref, b3_ref, o_ref):
    # fc1 + relu: bf16 MXU operands, f32 accumulation, f32 bias/ReLU on the VPU.
    h1 = jnp.dot(x_ref[...], w1_ref[...], preferred_element_type=jnp.float32)
    h1 = jnp.maximum(h1 + b1_ref[...], 0.0)
    # fc2 + relu
    h2 = jnp.dot(h1.astype(jnp.bfloat16), w2_ref[...],
                 preferred_element_type=jnp.float32)
    h2 = jnp.maximum(h2 + b2_ref[...], 0.0)
    # fc3 (no activation), output lane-padded to 128 -> unmasked stores; bf16 out.
    out = jnp.dot(h2.astype(jnp.bfloat16), w3_ref[...],
                  preferred_element_type=jnp.float32)
    o_ref[...] = (out + b3_ref[...]).astype(o_ref.dtype)


def simplenet_forward(x, w1, b1, w2, b2, w3, b3):
    B, D = x.shape
    assert D == 784 and w3.shape[1] == OUT_PAD
    if x.dtype != jnp.bfloat16:
        # Prefer bf16 straight from the producer (dominant HBM traffic term);
        # cast here only as a fallback for f32 callers.
        x = x.astype(jnp.bfloat16)

    tile_b = _pick_tile_b(B)
    b_pad = pl.cdiv(B, tile_b) * tile_b
    if b_pad != B:
        x = jnp.pad(x, ((0, b_pad - B), (0, 0)))
    grid = (b_pad // tile_b,)

    def wspec(shape):
        # Weight-stationary: constant index_map -> one DMA, stays VMEM-resident
        # while activation tiles pipeline across the batch grid.
        return pl.BlockSpec(shape, lambda i: (0, 0))

    flops = 2 * b_pad * (784 * 512 + 512 * 256 + 256 * OUT_PAD)
    bytes_accessed = (
        x.size * x.dtype.itemsize
        + sum(a.size * a.dtype.itemsize for a in (w1, b1, w2, b2, w3, b3))
        + b_pad * OUT_PAD * 2   # bf16 logits writeback
    )

    out = pl.pallas_call(
        simplenet_kernel,
        out_shape=jax.ShapeDtypeStruct((b_pad, OUT_PAD), jnp.bfloat16),
        grid=grid,
        in_specs=[
            pl.BlockSpec((tile_b, 784), lambda i: (i, 0)),   # x: batch-tiled, bf16
            wspec((784, 512)),                               # w1 (bf16)
            wspec((1, 512)),                                 # b1 (f32)
            wspec((512, 256)),                               # w2 (bf16)
            wspec((1, 256)),                                 # b2 (f32)
            wspec((256, OUT_PAD)),                           # w3 (bf16, lane-padded)
            wspec((1, OUT_PAD)),                             # b3 (f32, lane-padded)
        ],
        out_specs=pl.BlockSpec((tile_b, OUT_PAD), lambda i: (i, 0)),
        compiler_params=pltpu.CompilerParams(
            dimension_semantics=("parallel",),
        ),
        cost_estimate=pl.CostEstimate(
            flops=flops, bytes_accessed=bytes_accessed, transcendentals=0),
    )(x, w1, b1, w2, b2, w3, b3)
    # Un-pad batch and slice the lane-padded logits back to the 10 real classes.
    return out[:B, :10]


def init_params(key):
    # Deterministic init mimicking PyTorch Linear default
    # (uniform(-1/sqrt(fan_in), 1/sqrt(fan_in))); weights stored (in, out) in bf16,
    # biases kept f32.
    def linear(key, fan_in, fan_out, pad_to=None):
        kw, kb = jax.random.split(key)
        bound = 1.0 / jnp.sqrt(fan_in)
        w = jax.random.uniform(kw, (fan_in, fan_out), jnp.float32, -bound, bound)
        b = jax.random.uniform(kb, (1, fan_out), jnp.float32, -bound, bound)
        if pad_to is not None and pad_to > fan_out:
            w = jnp.pad(w, ((0, 0), (0, pad_to - fan_out)))
            b = jnp.pad(b, ((0, 0), (0, pad_to - fan_out)))
        return w.astype(jnp.bfloat16), b

    k1, k2, k3 = jax.random.split(key, 3)
    w1, b1 = linear(k1, 784, 512)
    w2, b2 = linear(k2, 512, 256)
    w3, b3 = linear(k3, 256, 10, pad_to=OUT_PAD)   # zero-pad fc3 to 128 lanes
    return w1, b1, w2, b2, w3, b3


def ref_forward(x, w1, b1, w2, b2, w3, b3):
    # Plain-JAX reference with identical bf16-operand / f32-accumulation math and
    # a final bf16 round, so it matches the kernel's bf16 output path.
    xb = x.astype(jnp.bfloat16)
    h1 = jnp.maximum(jnp.dot(xb, w1, preferred_element_type=jnp.float32) + b1, 0.0)
    h2 = jnp.maximum(
        jnp.dot(h1.astype(jnp.bfloat16), w2, preferred_element_type=jnp.float32) + b2, 0.0)
    out = jnp.dot(h2.astype(jnp.bfloat16), w3, preferred_element_type=jnp.float32) + b3
    return out[:, :10].astype(jnp.bfloat16)


def _check(B, kx, params):
    x = jax.random.normal(kx, (B, 784), jnp.bfloat16)   # bf16 from the producer
    out = jax.block_until_ready(simplenet_forward(x, *params))
    ref = ref_forward(x, *params)
    assert out.shape == (B, 10) and out.dtype == jnp.bfloat16
    ok = jnp.allclose(out.astype(jnp.float32), ref.astype(jnp.float32),
                      atol=2e-2, rtol=2e-2)
    assert ok, float(jnp.max(jnp.abs(out.astype(jnp.float32) - ref.astype(jnp.float32))))


if __name__ == "__main__":
    key = jax.random.PRNGKey(0)
    kx1, kx2, kp = jax.random.split(key, 3)
    params = init_params(kp)

    # Small batch: single exact-size 160-row tile, grid of 1, no padded rows.
    _check(160, kx1, params)
    # Larger batch: exercises the 256-aligned multi-step path (tile 256, 2 grid
    # steps, batch padded 320 -> 512).
    _check(320, kx2, params)

    print("KERNEL_OK")
</pallas_src>

<mosaic_0001>
module attributes {stable_mosaic.version = 11 : i64} {
  func.func @simplenet_kernel(%arg0: i32, %arg1: memref<160x784xbf16, #tpu.memory_space<vmem>>, %arg2: memref<784x512xbf16, #tpu.memory_space<vmem>>, %arg3: memref<1x512xf32, #tpu.memory_space<vmem>>, %arg4: memref<512x256xbf16, #tpu.memory_space<vmem>>, %arg5: memref<1x256xf32, #tpu.memory_space<vmem>>, %arg6: memref<256x128xbf16, #tpu.memory_space<vmem>>, %arg7: memref<1x128xf32, #tpu.memory_space<vmem>>, %arg8: memref<160x128xbf16, #tpu.memory_space<vmem>>) attributes {dimension_semantics = [#tpu.dimension_semantics<parallel>], iteration_bounds = array<i64: 1>, scalar_prefetch = 0 : i64, scratch_operands = 0 : i64, tpu.core_type = #tpu.core_type<tc>, window_params = [{transform_indices = @transform_0, window_bounds = array<i64: 160, 784>}, {pipeline_mode = #tpu.pipeline_mode<synchronous>, transform_indices = @transform_1, window_bounds = array<i64: 784, 512>}, {pipeline_mode = #tpu.pipeline_mode<synchronous>, transform_indices = @transform_2, window_bounds = array<i64: 1, 512>}, {pipeline_mode = #tpu.pipeline_mode<synchronous>, transform_indices = @transform_3, window_bounds = array<i64: 512, 256>}, {pipeline_mode = #tpu.pipeline_mode<synchronous>, transform_indices = @transform_4, window_bounds = array<i64: 1, 256>}, {pipeline_mode = #tpu.pipeline_mode<synchronous>, transform_indices = @transform_5, window_bounds = array<i64: 256, 128>}, {pipeline_mode = #tpu.pipeline_mode<synchronous>, transform_indices = @transform_6, window_bounds = array<i64: 1, 128>}, {transform_indices = @transform_7, window_bounds = array<i64: 160, 128>}]} {
    %c0 = arith.constant 0 : index
    %c0_0 = arith.constant 0 : index
    %0 = vector.load %arg1[%c0, %c0_0] : memref<160x784xbf16, #tpu.memory_space<vmem>>, vector<160x784xbf16>
    %c0_1 = arith.constant 0 : index
    %c0_2 = arith.constant 0 : index
    %1 = vector.load %arg2[%c0_1, %c0_2] : memref<784x512xbf16, #tpu.memory_space<vmem>>, vector<784x512xbf16>
    %cst = arith.constant dense<0.000000e+00> : vector<160x512xf32>
    %2 = tpu.matmul %0, %1, %cst {dimension_numbers = #tpu.dot_dimension_numbers<[1], [0], [0], [1], [0, 0, 1, 1], [], []>} : vector<160x784xbf16>, vector<784x512xbf16>, vector<160x512xf32> -> vector<160x512xf32>
    %c0_3 = arith.constant 0 : index
    %c0_4 = arith.constant 0 : index
    %3 = vector.load %arg3[%c0_3, %c0_4] : memref<1x512xf32, #tpu.memory_space<vmem>>, vector<1x512xf32>
    %4 = vector.broadcast %3 : vector<1x512xf32> to vector<160x512xf32>
    %5 = arith.addf %2, %4 : vector<160x512xf32>
    %cst_5 = arith.constant 0.000000e+00 : f32
    %6 = vector.broadcast %cst_5 : f32 to vector<160x512xf32>
    %7 = arith.maximumf %5, %6 : vector<160x512xf32>
    %8 = arith.truncf %7 : vector<160x512xf32> to vector<160x512xbf16>
    %c0_6 = arith.constant 0 : index
    %c0_7 = arith.constant 0 : index
    %9 = vector.load %arg4[%c0_6, %c0_7] : memref<512x256xbf16, #tpu.memory_space<vmem>>, vector<512x256xbf16>
    %cst_8 = arith.constant dense<0.000000e+00> : vector<160x256xf32>
    %10 = tpu.matmul %8, %9, %cst_8 {dimension_numbers = #tpu.dot_dimension_numbers<[1], [0], [0], [1], [0, 0, 1, 1], [], []>} : vector<160x512xbf16>, vector<512x256xbf16>, vector<160x256xf32> -> vector<160x256xf32>
    %c0_9 = arith.constant 0 : index
    %c0_10 = arith.constant 0 : index
    %11 = vector.load %arg5[%c0_9, %c0_10] : memref<1x256xf32, #tpu.memory_space<vmem>>, vector<1x256xf32>
    %12 = vector.broadcast %11 : vector<1x256xf32> to vector<160x256xf32>
    %13 = arith.addf %10, %12 : vector<160x256xf32>
    %cst_11 = arith.constant 0.000000e+00 : f32
    %14 = vector.broadcast %cst_11 : f32 to vector<160x256xf32>
    %15 = arith.maximumf %13, %14 : vector<160x256xf32>
    %16 = arith.truncf %15 : vector<160x256xf32> to vector<160x256xbf16>
    %c0_12 = arith.constant 0 : index
    %c0_13 = arith.constant 0 : index
    %17 = vector.load %arg6[%c0_12, %c0_13] : memref<256x128xbf16, #tpu.memory_space<vmem>>, vector<256x128xbf16>
    %cst_14 = arith.constant dense<0.000000e+00> : vector<160x128xf32>
    %18 = tpu.matmul %16, %17, %cst_14 {dimension_numbers = #tpu.dot_dimension_numbers<[1], [0], [0], [1], [0, 0, 1, 1], [], []>} : vector<160x256xbf16>, vector<256x128xbf16>, vector<160x128xf32> -> vector<160x128xf32>
    %c0_15 = arith.constant 0 : index
    %c0_16 = arith.constant 0 : index
    %19 = vector.load %arg7[%c0_15, %c0_16] : memref<1x128xf32, #tpu.memory_space<vmem>>, vector<1x128xf32>
    %20 = vector.broadcast %19 : vector<1x128xf32> to vector<160x128xf32>
    %21 = arith.addf %18, %20 : vector<160x128xf32>
    %22 = arith.truncf %21 : vector<160x128xf32> to vector<160x128xbf16>
    %c0_17 = arith.constant 0 : index
    %c0_18 = arith.constant 0 : index
    %23 = vector.load %arg8[%c0_17, %c0_18] : memref<160x128xbf16, #tpu.memory_space<vmem>>, vector<160x128xbf16>
    tpu.vector_store %arg8[%c0_17, %c0_18], %22 {strides = array<i32>} : memref<160x128xbf16, #tpu.memory_space<vmem>>, vector<160x128xbf16>,
    return
  }
  func.func @transform_0(%arg0: i32) -> (i32, i32) {
    %c0_i32 = arith.constant 0 : i32
    %c0_i32_0 = arith.constant 0 : i32
    return %arg0, %c0_i32 : i32, i32
  }
  func.func @transform_1(%arg0: i32) -> (i32, i32) {
    %c0_i32 = arith.constant 0 : i32
    %c0_i32_0 = arith.constant 0 : i32
    %c0_i32_1 = arith.constant 0 : i32
    return %c0_i32, %c0_i32_0 : i32, i32
  }
  func.func @transform_2(%arg0: i32) -> (i32, i32) {
    %c0_i32 = arith.constant 0 : i32
    %c0_i32_0 = arith.constant 0 : i32
    %c0_i32_1 = arith.constant 0 : i32
    return %c0_i32, %c0_i32_0 : i32, i32
  }
  func.func @transform_3(%arg0: i32) -> (i32, i32) {
    %c0_i32 = arith.constant 0 : i32
    %c0_i32_0 = arith.constant 0 : i32
    %c0_i32_1 = arith.constant 0 : i32
    return %c0_i32, %c0_i32_0 : i32, i32
  }
  func.func @transform_4(%arg0: i32) -> (i32, i32) {
    %c0_i32 = arith.constant 0 : i32
    %c0_i32_0 = arith.constant 0 : i32
    %c0_i32_1 = arith.constant 0 : i32
    return %c0_i32, %c0_i32_0 : i32, i32
  }
  func.func @transform_5(%arg0: i32) -> (i32, i32) {
    %c0_i32 = arith.constant 0 : i32
    %c0_i32_0 = arith.constant 0 : i32
    %c0_i32_1 = arith.constant 0 : i32
    return %c0_i32, %c0_i32_0 : i32, i32
  }
  func.func @transform_6(%arg0: i32) -> (i32, i32) {
    %c0_i32 = arith.constant 0 : i32
    %c0_i32_0 = arith.constant 0 : i32
    %c0_i32_1 = arith.constant 0 : i32
    return %c0_i32, %c0_i32_0 : i32, i32
  }
  func.func @transform_7(%arg0: i32) -> (i32, i32) {
    %c0_i32 = arith.constant 0 : i32
    %c0_i32_0 = arith.constant 0 : i32
    return %arg0, %c0_i32 : i32, i32
  }
}

</mosaic_0001>

<bundles_post_ra>
// kernel: tpu_custom_call.1
= control target key start
LH: loop header
LB: loop body
LE: loop exit
PB: predicated region body
PF: predicated region fallthrough
CT: control target
= control target key end

     0   :  { %12 = vsyncpa [#allocation3], 0  ;;  %s5969_s0 = inlined_call_operand.hbm [shape: bf16[160,784], index: 0, kind: input, shape index: {}]   ;;  %s5970_s1 = inlined_call_operand.hbm [shape: bf16[784,512], index: 1, kind: input, shape index: {}]   ;;  %s5971_s2 = inlined_call_operand.hbm [shape: f32[1,512], index: 2, kind: input, shape index: {}]   ;;  %s5972_s3 = inlined_call_operand.hbm [shape: bf16[512,256], index: 3, kind: input, shape index: {}]   ;;  %s5973_s4 = inlined_call_operand.vmem [shape: f32[1,256], index: 4, kind: input, shape index: {}]   ;;  %s5974_s5 = inlined_call_operand.hbm [shape: bf16[256,128], index: 5, kind: input, shape index: {}]   ;;  %s5975_s6 = inlined_call_operand.vmem [shape: f32[1,128], index: 6, kind: input, shape index: {}]   ;;  %s5976_s7 = inlined_call_operand.hbm [shape: bf16[160,128], index: 7, kind: output, shape index: {}]  }
   0x1   :  { %13 = vsyncpa [#allocation6], 0 }
   0x2   :  { %14 = vsyncpa [#allocation9], 0 }
   0x3   :  { %15 = vsyncpa [#allocation4], 0  ;;  %s5304_s24 = smov [#allocation5]  }
   0x4   :  { %s33_s25 = sshll.u32 %s5304_s24, 4  ;;  %s34_s25 = int_to_ptr.vmem [resolvable:$true] %s33_s25 }
   0x5   :  { %s5184_s26 = scalar_lea.vmem %s34_s25, 25088  ;;  %p5189_p1 = scmp.lt.s32.totalorder %s34_s25, %s34_s25 }
   0x6   :  { %p5185_p0 = scmp.ne.s32.totalorder %s34_s25, %s5184_s26  ;;  %p5190_p2 = scmp.lt.s32.totalorder %s5184_s26, %s5184_s26 }
   0x8   :  { %p5191_p3 = por %p5190_p2, %p5189_p1 }
   0xa   :  { %p5192_p4 = pnand %p5191_p3, %p5185_p0 }
   0xc   :  { %5195 = shalt.err (!%p5192_p4)
}
   0xd   :  { %s5305_s27 = smov 256   ;;  %s5306_s28 = smov 16  }
   0xe   :  { %39 = dma.hbm_to_vmem [thread:$0]  %s5970_s1, 25088, %s34_s25, [#allocation6], %s5305_s27, %s5305_s27, %s5306_s28  }
   0xf   :  { %s5307_s8 = smov [#allocation8]  }
  0x10   :  { %s55_s9 = sshll.u32 %s5307_s8, 4  ;;  %s56_s9 = int_to_ptr.vmem [resolvable:$true] %s55_s9 }
  0x11   :  { %s5204_s10 = scalar_lea.vmem %s56_s9, 8192  ;;  %p5209_p6 = scmp.lt.s32.totalorder %s56_s9, %s56_s9 }
  0x12   :  { %p5205_p5 = scmp.ne.s32.totalorder %s56_s9, %s5204_s10  ;;  %p5210_p7 = scmp.lt.s32.totalorder %s5204_s10, %s5204_s10 }
  0x14   :  { %p5211_p8 = por %p5210_p7, %p5209_p6 }
  0x16   :  { %p5212_p9 = pnand %p5211_p8, %p5205_p5 }
  0x18   :  { %5215 = shalt.err (!%p5212_p9)
}
  0x19   :  { %s5308_s11 = smov 128   ;;  %s5309_s12 = smov 8  }
  0x1a   :  { %61 = dma.hbm_to_vmem [thread:$0]  %s5972_s3, 8192, %s56_s9, [#allocation9], %s5308_s11, %s5308_s11, %s5309_s12  }
  0x1b   :  { %s5310_s15 = smov [#allocation2]  }
  0x1c   :  { %s21_s16 = sshll.u32 %s5310_s15, 4  ;;  %s22_s16 = int_to_ptr.vmem [resolvable:$true] %s21_s16 }
  0x1d   :  { %s5224_s1 = scalar_lea.vmem %s22_s16, 8960  ;;  %p5229_p11 = scmp.lt.s32.totalorder %s22_s16, %s22_s16 }
  0x1e   :  { %p5225_p10 = scmp.ne.s32.totalorder %s22_s16, %s5224_s1  ;;  %p5230_p12 = scmp.lt.s32.totalorder %s5224_s1, %s5224_s1 }
  0x20   :  { %p5231_p13 = por %p5230_p12, %p5229_p11 }
  0x22   :  { %p5232_p0 = pnand %p5231_p13, %p5225_p10 }
  0x24   :  { %5235 = shalt.err (!%p5232_p0)
}
  0x25   :  { %s5311_s17 = smov 448   ;;  %s5312_s18 = smov 28  }
  0x26   :  { %27 = dma.hbm_to_vmem [thread:$0]  %s5969_s0, 8960, %s22_s16, [#allocation3], %s5311_s17, %s5311_s17, %s5312_s18  }
  0x27   :  { %s5313_s21 = smov [#allocation7]   ;;  %s5314_s3 = smov [#allocation10]  }
  0x28   :  { %s46_s22 = sshll.u32 %s5313_s21, 4  ;;  %s69_s23 = sshll.u32 %s5314_s3, 4  ;;  %s47_s22 = int_to_ptr.vmem [resolvable:$true] %s46_s22  ;;  %s70_s23 = int_to_ptr.vmem [resolvable:$true] %s69_s23 }
  0x29   :  { %s5244_s24 = scalar_lea.vmem %s47_s22, 64  ;;  %p5249_p2 = scmp.lt.s32.totalorder %s47_s22, %s47_s22 }
  0x2a   :  { %p5245_p1 = scmp.ne.s32.totalorder %s47_s22, %s5244_s24  ;;  %p5250_p3 = scmp.lt.s32.totalorder %s5244_s24, %s5244_s24 }
  0x2c   :  { %p5251_p4 = por %p5250_p3, %p5249_p2 }
  0x2e   :  { %p5252_p5 = pnand %p5251_p4, %p5245_p1 }
  0x30   :  { %5255 = shalt.err (!%p5252_p5)
}
  0x31   :  { %49 = dma.hbm_to_vmem [thread:$0]  %s5971_s2, 64, %s47_s22, [#allocation6]  }
  0x32   :  { %s5264_s27 = scalar_lea.vmem %s70_s23, 2048  ;;  %p5269_p7 = scmp.lt.s32.totalorder %s70_s23, %s70_s23 }
  0x33   :  { %p5265_p6 = scmp.ne.s32.totalorder %s70_s23, %s5264_s27  ;;  %p5270_p8 = scmp.lt.s32.totalorder %s5264_s27, %s5264_s27 }
  0x35   :  { %p5271_p9 = por %p5270_p8, %p5269_p7 }
  0x37   :  { %p5272_p10 = pnand %p5271_p9, %p5265_p6 }
  0x39   :  { %5275 = shalt.err (!%p5272_p10)
}
  0x3a   :  { %s5315_s0 = smov 64   ;;  %s5316_s28 = smov 4  }
  0x3b   :  { %75 = dma.hbm_to_vmem [thread:$0]  %s5974_s5, 2048, %s70_s23, [#allocation9], %s5315_s0, %s5315_s0, %s5316_s28  }
  0x3c   :  { %5296 = dma.done.wait [#allocation3], 8960  }
  0x3d   :  { %5297 = vsyncadd [#allocation3], 4294958336 }
  0x3e   :  { %5298 = dma.done.wait [#allocation6], 25152  }
  0x3f   :  { %5299 = vsyncadd [#allocation6], 4294942144 }
  0x40   :  { %5300 = dma.done.wait [#allocation9], 10240  }
  0x41   :  { %5301 = vsyncadd [#allocation9], 4294957056  ;;  %v4599_v0 = vld [vmem:[#allocation5 + $0xe4] ss:$16 sps:$4 sm:$0xff]   ;;  %v4603_v2 = vld [vmem:[#allocation5 + $0xe0] ss:$16 sps:$4 sm:$0xff]  }
  0x42   :  { %v4601_v1 = vld [vmem:[#allocation5 + $0x2e4] ss:$16 sps:$4 sm:$0xff]   ;;  %1753 = vmatprep.subr.bf16.mxu0 %v4599_v0  ;;  %v4604_v3 = vld [vmem:[#allocation5 + $0x2e0] ss:$16 sps:$4 sm:$0xff]   ;;  %v4700_v51 = vld [vmem:[#allocation2 + $0xc] ss:$28 sps:$4 sm:$0xff]  }
  0x43   :  { %1886 = vmatprep.subr.bf16.mxu1 %v4601_v1  ;;  %v4605_v4 = vld [vmem:[#allocation5 + $0xc4] ss:$16 sps:$4 sm:$0xff]   ;;  %1754 = vmatpush1.bf16.msra.mxu0 %v4603_v2  ;;  %v4609_v6 = vld [vmem:[#allocation5 + $0xc0] ss:$16 sps:$4 sm:$0xff]   ;;  %vm1722_vm0 = vcmask 130048  }
  0x44   :  { %1887 = vmatpush1.bf16.msra.mxu1 %v4604_v3  ;;  %v4607_v5 = vld [vmem:[#allocation5 + $0x2c4] ss:$16 sps:$4 sm:$0xff]   ;;  %1755 = vmatprep.subr.bf16.mxu0 %v4605_v4  ;;  %v4610_v7 = vld [vmem:[#allocation5 + $0x2c0] ss:$16 sps:$4 sm:$0xff]  }
  0x45   :  { %1888 = vmatprep.subr.bf16.mxu1 %v4607_v5  ;;  %v4611_v8 = vld [vmem:[#allocation5 + $0xa4] ss:$16 sps:$4 sm:$0xff]   ;;  %v4615_v10 = vld [vmem:[#allocation5 + $0xa0] ss:$16 sps:$4 sm:$0xff]   ;;  %1918 = vmatprep.mubr.bf16.mxu1 %v4700_v51 }
  0x46   :  { %v4613_v9 = vld [vmem:[#allocation5 + $0x2a4] ss:$16 sps:$4 sm:$0xff]   ;;  %v4616_v11 = vld [vmem:[#allocation5 + $0x2a0] ss:$16 sps:$4 sm:$0xff]  }
  0x47   :  { %1756 = vmatpush1.bf16.msra.mxu0 %v4609_v6  ;;  %v4617_v12 = vld [vmem:[#allocation5 + $0x84] ss:$16 sps:$4 sm:$0xff]   ;;  %v4621_v14 = vld [vmem:[#allocation5 + $0x80] ss:$16 sps:$4 sm:$0xff]  }
  0x48   :  { %1889 = vmatpush1.bf16.msra.mxu1 %v4610_v7  ;;  %1757 = vmatprep.subr.bf16.mxu0 %v4611_v8  ;;  %v4619_v13 = vld [vmem:[#allocation5 + $0x284] ss:$16 sps:$4 sm:$0xff]   ;;  %v4622_v15 = vld [vmem:[#allocation5 + $0x280] ss:$16 sps:$4 sm:$0xff]  }
  0x49   :  { %1890 = vmatprep.subr.bf16.mxu1 %v4613_v9  ;;  %v4623_v16 = vld [vmem:[#allocation5 + $0x64] ss:$16 sps:$4 sm:$0xff]   ;;  %v4627_v18 = vld [vmem:[#allocation5 + $0x60] ss:$16 sps:$4 sm:$0xff]   ;;  %v4710_v9 = vld [vmem:[#allocation2 + $0x3c] ss:$28 sps:$4 sm:$0xff]  }
  0x4a   :  { %v4625_v17 = vld [vmem:[#allocation5 + $0x264] ss:$16 sps:$4 sm:$0xff]   ;;  %v4628_v19 = vld [vmem:[#allocation5 + $0x260] ss:$16 sps:$4 sm:$0xff]  }
  0x4b   :  { %1758 = vmatpush1.bf16.msra.mxu0 %v4615_v10  ;;  %v4629_v20 = vld [vmem:[#allocation5 + $0x44] ss:$16 sps:$4 sm:$0xff]   ;;  %v4633_v22 = vld [vmem:[#allocation5 + $0x40] ss:$16 sps:$4 sm:$0xff]  }
  0x4c   :  { %1891 = vmatpush1.bf16.msra.mxu1 %v4616_v11  ;;  %1759 = vmatprep.subr.bf16.mxu0 %v4617_v12  ;;  %v4631_v21 = vld [vmem:[#allocation5 + $0x244] ss:$16 sps:$4 sm:$0xff]   ;;  %v4634_v23 = vld [vmem:[#allocation5 + $0x240] ss:$16 sps:$4 sm:$0xff]  }
  0x4d   :  { %1892 = vmatprep.subr.bf16.mxu1 %v4619_v13  ;;  %v4635_v24 = vld [vmem:[#allocation5 + $0x24] ss:$16 sps:$4 sm:$0xff]   ;;  %v4639_v26 = vld [vmem:[#allocation5 + $0x20] ss:$16 sps:$4 sm:$0xff]  }
  0x4e   :  { %v4637_v25 = vld [vmem:[#allocation5 + $0x224] ss:$16 sps:$4 sm:$0xff]   ;;  %v4640_v27 = vld [vmem:[#allocation5 + $0x220] ss:$16 sps:$4 sm:$0xff]  }
  0x4f   :  { %1760 = vmatpush1.bf16.msra.mxu0 %v4621_v14  ;;  %v4641_v28 = vld [vmem:[#allocation5 + $0x4] ss:$16 sps:$4 sm:$0xff]   ;;  %v4645_v30 = vld [vmem:[#allocation5] ss:$16 sps:$4 sm:$0xff]  }
  0x50   :  { %1893 = vmatpush1.bf16.msra.mxu1 %v4622_v15  ;;  %1761 = vmatprep.subr.bf16.mxu0 %v4623_v16  ;;  %v4643_v29 = vld [vmem:[#allocation5 + $0x204] ss:$16 sps:$4 sm:$0xff]   ;;  %v4646_v31 = vld [vmem:[#allocation5 + $0x200] ss:$16 sps:$4 sm:$0xff]  }
  0x51   :  { %1894 = vmatprep.subr.bf16.mxu1 %v4625_v17  ;;  %v4647_v32 = vld [vmem:[#allocation5 + $0x1e4] ss:$16 sps:$4 sm:$0xff]   ;;  %v4651_v34 = vld [vmem:[#allocation5 + $0x1e0] ss:$16 sps:$4 sm:$0xff]   ;;  %v4721_v17 = vld [vmem:[#allocation2 + $0x7c] ss:$28 sps:$4 sm:$0xff]  }
  0x52   :  { %v4649_v33 = vld [vmem:[#allocation5 + $0x3e4] ss:$16 sps:$4 sm:$0xff]   ;;  %v4652_v35 = vld [vmem:[#allocation5 + $0x3e0] ss:$16 sps:$4 sm:$0xff]  }
  0x53   :  { %1762 = vmatpush1.bf16.msra.mxu0 %v4627_v18  ;;  %v4653_v36 = vld [vmem:[#allocation5 + $0x1c4] ss:$16 sps:$4 sm:$0xff]   ;;  %v4657_v38 = vld [vmem:[#allocation5 + $0x1c0] ss:$16 sps:$4 sm:$0xff]  }
  0x54   :  { %1895 = vmatpush1.bf16.msra.mxu1 %v4628_v19  ;;  %1763 = vmatprep.subr.bf16.mxu0 %v4629_v20  ;;  %v4655_v37 = vld [vmem:[#allocation5 + $0x3c4] ss:$16 sps:$4 sm:$0xff]   ;;  %v4658_v39 = vld [vmem:[#allocation5 + $0x3c0] ss:$16 sps:$4 sm:$0xff]  }
  0x55   :  { %1896 = vmatprep.subr.bf16.mxu1 %v4631_v21  ;;  %v4659_v40 = vld [vmem:[#allocation5 + $0x1a4] ss:$16 sps:$4 sm:$0xff]   ;;  %v4663_v42 = vld [vmem:[#allocation5 + $0x1a0] ss:$16 sps:$4 sm:$0xff]  }
  0x56   :  { %v4661_v41 = vld [vmem:[#allocation5 + $0x3a4] ss:$16 sps:$4 sm:$0xff]   ;;  %v4664_v43 = vld [vmem:[#allocation5 + $0x3a0] ss:$16 sps:$4 sm:$0xff]  }
  0x57   :  { %1764 = vmatpush1.bf16.msra.mxu0 %v4633_v22  ;;  %v4665_v44 = vld [vmem:[#allocation5 + $0x184] ss:$16 sps:$4 sm:$0xff]   ;;  %v4669_v46 = vld [vmem:[#allocation5 + $0x180] ss:$16 sps:$4 sm:$0xff]  }
  0x58   :  { %1897 = vmatpush1.bf16.msra.mxu1 %v4634_v23  ;;  %1765 = vmatprep.subr.bf16.mxu0 %v4635_v24  ;;  %v4667_v45 = vld [vmem:[#allocation5 + $0x384] ss:$16 sps:$4 sm:$0xff]   ;;  %v4670_v47 = vld [vmem:[#allocation5 + $0x380] ss:$16 sps:$4 sm:$0xff]   ;;  %v4731_v24 = vld [vmem:[#allocation2 + $0xac] ss:$28 sps:$4 sm:$0xff]  }
  0x59   :  { %1898 = vmatprep.subr.bf16.mxu1 %v4637_v25  ;;  %v4671_v48 = vld [vmem:[#allocation5 + $0x164] ss:$16 sps:$4 sm:$0xff]   ;;  %v4675_v52 = vld [vmem:[#allocation5 + $0x160] ss:$16 sps:$4 sm:$0xff]  }
  0x5a   :  { %v4697_v49 = vld [vmem:[#allocation2 + $0x4] ss:$28 sps:$4 sm:$0xff]   ;;  %v4714_v13 = vld [vmem:[#allocation2 + $0x38] ss:$28 sps:$4 sm:$0xff]   ;;  %v4726_v21 = vld [vmem:[#allocation2 + $0x70] ss:$28 sps:$4 sm:$0xff]  }
  0x5b   :  { %1766 = vmatpush1.bf16.msra.mxu0 %v4639_v26  ;;  %v4673_v50 = vld [vmem:[#allocation5 + $0x364] ss:$16 sps:$4 sm:$0xff]   ;;  %1785 = vmatprep.mubr.bf16.mxu0 %v4697_v49  ;;  %v4676_v53 = vld [vmem:[#allocation5 + $0x360] ss:$16 sps:$4 sm:$0xff]   ;;  %v4766_v49 = vld [vmem:[#allocation2 + $0x15c] ss:$28 sps:$4 sm:$0xff]  }
  0x5c   :  { %1899 = vmatpush1.bf16.msra.mxu1 %v4640_v27  ;;  %1767 = vmatprep.subr.bf16.mxu0 %v4641_v28  ;;  %v4677_v54 = vld [vmem:[#allocation5 + $0x144] ss:$16 sps:$4 sm:$0xff]   ;;  %v4681_v56 = vld [vmem:[#allocation5 + $0x140] ss:$16 sps:$4 sm:$0xff]  }
  0x5d   :  { %1900 = vmatprep.subr.bf16.mxu1 %v4643_v29  ;;  %v4679_v55 = vld [vmem:[#allocation5 + $0x344] ss:$16 sps:$4 sm:$0xff]   ;;  %v4682_v57 = vld [vmem:[#allocation5 + $0x340] ss:$16 sps:$4 sm:$0xff]  }
  0x5e   :  { %v4683_v58 = vld [vmem:[#allocation5 + $0x124] ss:$16 sps:$4 sm:$0xff]   ;;  %v4687_v60 = vld [vmem:[#allocation5 + $0x120] ss:$16 sps:$4 sm:$0xff]  }
  0x5f   :  { %1768 = vmatpush1.bf16.msra.mxu0 %v4645_v30  ;;  %v4685_v59 = vld [vmem:[#allocation5 + $0x324] ss:$16 sps:$4 sm:$0xff]   ;;  %v4688_v61 = vld [vmem:[#allocation5 + $0x320] ss:$16 sps:$4 sm:$0xff]  }
  0x60   :  { %1901 = vmatpush1.bf16.msra.mxu1 %v4646_v31  ;;  %1769 = vmatprep.subr.bf16.mxu0 %v4647_v32  ;;  %v4689_v62 = vld [vmem:[#allocation5 + $0x104] ss:$16 sps:$4 sm:$0xff]   ;;  %v4693_v0 = vld [vmem:[#allocation5 + $0x100] ss:$16 sps:$4 sm:$0xff]   ;;  %v4745_v32 = vld [vmem:[#allocation2 + $0xec] ss:$28 sps:$4 sm:$0xff]  }
  0x61   :  { %1902 = vmatprep.subr.bf16.mxu1 %v4649_v33  ;;  %v4691_v63 = vld [vmem:[#allocation5 + $0x304] ss:$16 sps:$4 sm:$0xff]   ;;  %v4694_v1 = vld [vmem:[#allocation5 + $0x300] ss:$16 sps:$4 sm:$0xff]  }
  0x62   :  { %v4703_v2 = vld [vmem:[#allocation5 + $0x4e4] ss:$16 sps:$4 sm:$0xff]   ;;  %v4695_v4 = vld [vmem:[#allocation2] ss:$28 sps:$4 sm:$0xff]   ;;  %v4736_v30 = vld [vmem:[#allocation2 + $0xb0] ss:$28 sps:$4 sm:$0xff]  }
  0x63   :  { %1770 = vmatpush2.bf16.msra.mxu0 %v4651_v34  ;;  %v4706_v3 = vld [vmem:[#allocation5 + $0x604] ss:$16 sps:$4 sm:$0xff]   ;;  %v4701_v6 = vld [vmem:[#allocation5 + $0x4e0] ss:$16 sps:$4 sm:$0xff]  }
  0x64   :  { %1903 = vmatpush2.bf16.msra.mxu1 %v4652_v35  ;;  %1771 = vmatprep.subr.bf16.mxu0 %v4653_v36  ;;  %v4698_v5 = vld [vmem:[#allocation2 + $0x8] ss:$28 sps:$4 sm:$0xff]   ;;  %v4704_v7 = vld [vmem:[#allocation5 + $0x600] ss:$16 sps:$4 sm:$0xff]   ;;  %v4727_v22 = vld [vmem:[#allocation2 + $0x78] ss:$28 sps:$4 sm:$0xff]  }
  0x65   :  { %1904 = vmatprep.subr.bf16.mxu1 %v4655_v37  ;;  %v4709_v8 = vld [vmem:[#allocation5 + $0x4c4] ss:$16 sps:$4 sm:$0xff]   ;;  %v4707_v11 = vld [vmem:[#allocation5 + $0x4c0] ss:$16 sps:$4 sm:$0xff]  }
  0x66   :  { %v4712_v10 = vld [vmem:[#allocation2 + $0x44] ss:$28 sps:$4 sm:$0xff]   ;;  %v4719_v16 = vld [vmem:[#allocation2 + $0x74] ss:$28 sps:$4 sm:$0xff]  }
  0x67   :  { %1772 = vmatpush2.bf16.msra.mxu0 %v4657_v38  ;;  %v4718_v12 = vld [vmem:[#allocation5 + $0x4a4] ss:$16 sps:$4 sm:$0xff]   ;;  %v4715_v14 = vld [vmem:[#allocation2 + $0x40] ss:$28 sps:$4 sm:$0xff]  }
  0x68   :  { %1905 = vmatpush2.bf16.msra.mxu1 %v4658_v39  ;;  %1773 = vmatprep.subr.bf16.mxu0 %v4659_v40  ;;  %v4716_v15 = vld [vmem:[#allocation5 + $0x4a0] ss:$16 sps:$4 sm:$0xff]   ;;  %v4725_v18 = vld [vmem:[#allocation5 + $0x484] ss:$16 sps:$4 sm:$0xff]   ;;  %v4752_v39 = vld [vmem:[#allocation2 + $0x11c] ss:$28 sps:$4 sm:$0xff]  }
  0x69   :  { %1906 = vmatprep.subr.bf16.mxu1 %v4661_v41  ;;  %v4723_v19 = vld [vmem:[#allocation5 + $0x480] ss:$16 sps:$4 sm:$0xff]   ;;  %v4730_v20 = vld [vmem:[#allocation5 + $0x464] ss:$16 sps:$4 sm:$0xff]   ;;  %v4815_v41 = vld [vmem:[#allocation5 + $0x2ec] ss:$16 sps:$4 sm:$0xff]  }
  0x6a   :  { %v4728_v23 = vld [vmem:[#allocation5 + $0x460] ss:$16 sps:$4 sm:$0xff]   ;;  %v4739_v26 = vld [vmem:[#allocation5 + $0x444] ss:$16 sps:$4 sm:$0xff]  }
  0x6b   :  { %1774 = vmatpush2.bf16.msra.mxu0 %v4663_v42  ;;  %v4733_v25 = vld [vmem:[#allocation2 + $0xb4] ss:$28 sps:$4 sm:$0xff]   ;;  %v4735_v29 = vld [vmem:[#allocation2 + $0xa8] ss:$28 sps:$4 sm:$0xff]   ;;  %v4747_v35 = vld [vmem:[#allocation2 + $0xe0] ss:$28 sps:$4 sm:$0xff]  }
  0x6c   :  { %1907 = vmatpush2.bf16.msra.mxu1 %v4664_v43  ;;  %1775 = vmatprep.subr.bf16.mxu0 %v4665_v44  ;;  %v4737_v27 = vld [vmem:[#allocation5 + $0x440] ss:$16 sps:$4 sm:$0xff]   ;;  %v4742_v28 = vld [vmem:[#allocation5 + $0x424] ss:$16 sps:$4 sm:$0xff]  }
  0x6d   :  { %1908 = vmatprep.subr.bf16.mxu1 %v4667_v45  ;;  %v4743_v31 = vld [vmem:[#allocation2 + $0xe4] ss:$28 sps:$4 sm:$0xff]   ;;  %v4756_v44 = vld [vmem:[#allocation2 + $0x118] ss:$28 sps:$4 sm:$0xff]  }
  0x6e   :  { %v4740_v33 = vld [vmem:[#allocation5 + $0x420] ss:$16 sps:$4 sm:$0xff]   ;;  %v4751_v34 = vld [vmem:[#allocation5 + $0x404] ss:$16 sps:$4 sm:$0xff]  }
  0x6f   :  { %1776 = vmatpush2.bf16.msra.mxu0 %v4669_v46  ;;  %v4749_v36 = vld [vmem:[#allocation5 + $0x400] ss:$16 sps:$4 sm:$0xff]   ;;  %v4760_v37 = vld [vmem:[#allocation5 + $0x5e4] ss:$16 sps:$4 sm:$0xff]  }
  0x70   :  { %1909 = vmatpush2.bf16.msra.mxu1 %v4670_v47  ;;  %1777 = vmatprep.subr.bf16.mxu0 %v4671_v48  ;;  %v4748_v38 = vld [vmem:[#allocation2 + $0xe8] ss:$28 sps:$4 sm:$0xff]   ;;  %v4758_v42 = vld [vmem:[#allocation5 + $0x5e0] ss:$16 sps:$4 sm:$0xff]  }
  0x71   :  { %1910 = vmatprep.subr.bf16.mxu1 %v4673_v50  ;;  %v4754_v40 = vld [vmem:[#allocation2 + $0x124] ss:$28 sps:$4 sm:$0xff]   ;;  %v4764_v48 = vld [vmem:[#allocation2 + $0x154] ss:$28 sps:$4 sm:$0xff]  }
  0x72   :  { %v4763_v43 = vld [vmem:[#allocation5 + $0x5c4] ss:$16 sps:$4 sm:$0xff]   ;;  %v4761_v45 = vld [vmem:[#allocation5 + $0x5c0] ss:$16 sps:$4 sm:$0xff]  }
  0x73   :  { %1778 = vmatpush2.bf16.msra.mxu0 %v4675_v52  ;;  %v4772_v46 = vld [vmem:[#allocation5 + $0x5a4] ss:$16 sps:$4 sm:$0xff]   ;;  %v4757_v47 = vld [vmem:[#allocation2 + $0x120] ss:$28 sps:$4 sm:$0xff]   ;;  %v4768_v52 = vld [vmem:[#allocation2 + $0x150] ss:$28 sps:$4 sm:$0xff]  }
  0x74   :  { %1911 = vmatpush2.bf16.msra.mxu1 %v4676_v53  ;;  %1779 = vmatprep.subr.bf16.mxu0 %v4677_v54  ;;  %v4770_v50 = vld [vmem:[#allocation5 + $0x5a0] ss:$16 sps:$4 sm:$0xff]   ;;  %v4779_v51 = vld [vmem:[#allocation5 + $0x584] ss:$16 sps:$4 sm:$0xff]  }
  0x75   :  { %1912 = vmatprep.subr.bf16.mxu1 %v4679_v55  ;;  %v4777_v53 = vld [vmem:[#allocation5 + $0x580] ss:$16 sps:$4 sm:$0xff]   ;;  %v4769_v54 = vld [vmem:[#allocation2 + $0x158] ss:$28 sps:$4 sm:$0xff]  }
  0x76   :  { %v4784_v55 = vld [vmem:[#allocation5 + $0x564] ss:$16 sps:$4 sm:$0xff]  }
  0x77   :  { %1780 = vmatpush2.bf16.msra.mxu0 %v4681_v56  ;;  %v4773_v56 = vld [vmem:[#allocation2 + $0x18c] ss:$28 sps:$4 sm:$0xff]  }
  0x78   :  { %1913 = vmatpush2.bf16.msra.mxu1 %v4682_v57  ;;  %1781 = vmatprep.subr.bf16.mxu0 %v4683_v58  ;;  %v4775_v57 = vld [vmem:[#allocation2 + $0x194] ss:$28 sps:$4 sm:$0xff]  }
  0x79   :  { %1914 = vmatprep.subr.bf16.mxu1 %v4685_v59  ;;  %v4782_v58 = vld [vmem:[#allocation5 + $0x560] ss:$16 sps:$4 sm:$0xff]   ;;  %v4793_v59 = vld [vmem:[#allocation5 + $0x544] ss:$16 sps:$4 sm:$0xff]  }
  0x7b   :  { %1782 = vmatpush2.bf16.msra.mxu0 %v4687_v60  ;;  %v4791_v60 = vld [vmem:[#allocation5 + $0x540] ss:$16 sps:$4 sm:$0xff]  }
  0x7c   :  { %1915 = vmatpush2.bf16.msra.mxu1 %v4688_v61  ;;  %1783 = vmatprep.subr.bf16.mxu0 %v4689_v62  ;;  %v4780_v61 = vld [vmem:[#allocation2 + $0x188] ss:$28 sps:$4 sm:$0xff]  }
  0x7d   :  { %1916 = vmatprep.subr.bf16.mxu1 %v4691_v63  ;;  %v4796_v62 = vld [vmem:[#allocation5 + $0x524] ss:$16 sps:$4 sm:$0xff]   ;;  %v4781_v63 = vld [vmem:[#allocation2 + $0x190] ss:$28 sps:$4 sm:$0xff]  }
  0x7f   :  { %1784 = vmatpush2.bf16.msra.mxu0 %v4693_v0  ;;  %v4785_v0 = vld [vmem:[#allocation2 + $0x1c4] ss:$28 sps:$4 sm:$0xff]  }
  0x80   :  { %1917 = vmatpush2.bf16.msra.mxu1 %v4694_v1  ;;  %2019 = vmatprep.subr.bf16.mxu0 %v4703_v2  ;;  %v4787_v1 = vld [vmem:[#allocation2 + $0x1cc] ss:$28 sps:$4 sm:$0xff]   ;;  %v4794_v2 = vld [vmem:[#allocation5 + $0x520] ss:$16 sps:$4 sm:$0xff]  }
  0x81   :  { %2166 = vmatprep.subr.bf16.mxu1 %v4706_v3  ;;  %v4805_v3 = vld [vmem:[#allocation5 + $0x504] ss:$16 sps:$4 sm:$0xff]  }
  0x82   :  { %1786 = vmatmul.mubr.bf16.vlgmr.msra.gmra.mxu0 %v4695_v4  ;;  %v4789_v4 = vld [vmem:[#allocation2 + $0x1c0] ss:$28 sps:$4 sm:$0xff]  }
  0x83   :  { %1919 = vmatmul.mubr.bf16.vlgmr.msra.gmra.mxu1 %v4698_v5  ;;  %2020 = vmatpush1.bf16.msra.mxu0 %v4701_v6  ;;  %v4803_v5 = vld [vmem:[#allocation5 + $0x500] ss:$16 sps:$4 sm:$0xff]   ;;  %v4812_v6 = vld [vmem:[#allocation5 + $0xec] ss:$16 sps:$4 sm:$0xff]  }
  0x84   :  { %2167 = vmatpush1.bf16.msra.mxu1 %v4704_v7  ;;  %2021 = vmatprep.subr.bf16.mxu0 %v4709_v8  ;;  %v4790_v7 = vld [vmem:[#allocation2 + $0x1c8] ss:$28 sps:$4 sm:$0xff]   ;;  %v4797_v8 = vld [vmem:[#allocation2 + $0x1fc] ss:$28 sps:$4 sm:$0xff]  }
  0x85   :  { %1795 = vmatprep.mubr.bf16.mxu0 %v4710_v9  ;;  %1928 = vmatprep.mubr.bf16.mxu1 %v4712_v10  ;;  %v4799_v9 = vld [vmem:[#allocation2 + $0x204] ss:$28 sps:$4 sm:$0xff]   ;;  %v4801_v10 = vld [vmem:[#allocation2 + $0x1f8] ss:$28 sps:$4 sm:$0xff]  }
  0x86   :  { %2418 = vmatprep.subr.bf16.mxu1 %v4815_v41  ;;  %v4854_v41 = vld [vmem:[#allocation5 + $0x4c] ss:$16 sps:$4 sm:$0xff]  }
  0x87   :  { %2022 = vmatpush1.bf16.msra.mxu0 %v4707_v11  ;;  %v4802_v11 = vld [vmem:[#allocation2 + $0x200] ss:$28 sps:$4 sm:$0xff]  }
  0x88   :  { %2023 = vmatprep.subr.bf16.mxu0 %v4718_v12  ;;  %v4808_v12 = vld [vmem:[#allocation2 + $0x14] ss:$28 sps:$4 sm:$0xff]  }
  0x8a   :  { %1796 = vmatmul.mubr.bf16.gmra.mxu0 %v4714_v13  ;;  %v5317_v13 = vmov 0  }
  0x8b   :  { %1929 = vmatmul.mubr.bf16.gmra.mxu1 %v4715_v14  ;;  %2024 = vmatpush1.bf16.msra.mxu0 %v4716_v15  ;;  %v4806_v14 = vld [vmem:[#allocation2 + $0x10] ss:$28 sps:$4 sm:$0xff]   ;;  %v4809_v15 = vld [vmem:[#allocation2 + $0x18] ss:$28 sps:$4 sm:$0xff]  }
  0x8c   :  { %1805 = vmatprep.mubr.bf16.mxu0 %v4719_v16  ;;  %1938 = vmatprep.mubr.bf16.mxu1 %v4721_v17  ;;  %v4810_v16 = vld [vmem:[#allocation5 + $0xe8] ss:$16 sps:$4 sm:$0xff]  }
  0x8d   :  { %2025 = vmatprep.subr.bf16.mxu0 %v4725_v18  ;;  %v4813_v17 = vld [vmem:[#allocation5 + $0x2e8] ss:$16 sps:$4 sm:$0xff]   ;;  %v4818_v18 = vld [vmem:[#allocation5 + $0xcc] ss:$16 sps:$4 sm:$0xff]  }
  0x8f   :  { %2026 = vmatpush1.bf16.msra.mxu0 %v4723_v19  ;;  %v4819_v19 = vld [vmem:[#allocation2 + $0x4c] ss:$28 sps:$4 sm:$0xff]  }
  0x90   :  { %2027 = vmatprep.subr.bf16.mxu0 %v4730_v20  ;;  %v4823_v20 = vld [vmem:[#allocation5 + $0x2cc] ss:$16 sps:$4 sm:$0xff]  }
  0x92   :  { %1806 = vmatmul.mubr.bf16.gmra.mxu0 %v4726_v21  ;;  %v4816_v21 = vld [vmem:[#allocation5 + $0xc8] ss:$16 sps:$4 sm:$0xff]  }
  0x93   :  { %1939 = vmatmul.mubr.bf16.gmra.mxu1 %v4727_v22  ;;  %2028 = vmatpush1.bf16.msra.mxu0 %v4728_v23  ;;  %v4821_v22 = vld [vmem:[#allocation5 + $0x2c8] ss:$16 sps:$4 sm:$0xff]   ;;  %v4828_v23 = vld [vmem:[#allocation5 + $0xac] ss:$16 sps:$4 sm:$0xff]  }
  0x94   :  { %1815 = vmatprep.mubr.bf16.mxu0 %v4731_v24  ;;  %1948 = vmatprep.mubr.bf16.mxu1 %v4733_v25  ;;  %v4831_v24 = vld [vmem:[#allocation5 + $0x2ac] ss:$16 sps:$4 sm:$0xff]   ;;  %v4824_v25 = vld [vmem:[#allocation2 + $0x48] ss:$28 sps:$4 sm:$0xff]  }
  0x95   :  { %2029 = vmatprep.subr.bf16.mxu0 %v4739_v26  ;;  %v4825_v26 = vld [vmem:[#allocation2 + $0x50] ss:$28 sps:$4 sm:$0xff]  }
  0x97   :  { %2030 = vmatpush1.bf16.msra.mxu0 %v4737_v27  ;;  %v4826_v27 = vld [vmem:[#allocation5 + $0xa8] ss:$16 sps:$4 sm:$0xff]  }
  0x98   :  { %2031 = vmatprep.subr.bf16.mxu0 %v4742_v28  ;;  %v4829_v28 = vld [vmem:[#allocation5 + $0x2a8] ss:$16 sps:$4 sm:$0xff]  }
  0x9a   :  { %1816 = vmatmul.mubr.bf16.gmra.mxu0 %v4735_v29  ;;  %v4832_v29 = vld [vmem:[#allocation2 + $0x84] ss:$28 sps:$4 sm:$0xff]  }
  0x9b   :  { %1949 = vmatmul.mubr.bf16.gmra.mxu1 %v4736_v30  ;;  %1825 = vmatprep.mubr.bf16.mxu0 %v4743_v31  ;;  %v4836_v30 = vld [vmem:[#allocation5 + $0x8c] ss:$16 sps:$4 sm:$0xff]  }
  0x9c   :  { %1958 = vmatprep.mubr.bf16.mxu1 %v4745_v32  ;;  %2032 = vmatpush1.bf16.msra.mxu0 %v4740_v33  ;;  %v4841_v31 = vld [vmem:[#allocation5 + $0x28c] ss:$16 sps:$4 sm:$0xff]   ;;  %v4834_v32 = vld [vmem:[#allocation5 + $0x88] ss:$16 sps:$4 sm:$0xff]  }
  0x9d   :  { %2033 = vmatprep.subr.bf16.mxu0 %v4751_v34  ;;  %v4839_v33 = vld [vmem:[#allocation5 + $0x288] ss:$16 sps:$4 sm:$0xff]   ;;  %v4844_v34 = vld [vmem:[#allocation5 + $0x6c] ss:$16 sps:$4 sm:$0xff]  }
  0xa0   :  { %2034 = vmatpush1.bf16.msra.mxu0 %v4749_v36  ;;  %v4837_v36 = vld [vmem:[#allocation2 + $0x80] ss:$28 sps:$4 sm:$0xff]  }
  0xa1   :  { %2035 = vmatprep.subr.bf16.mxu0 %v4760_v37  ;;  %v4838_v37 = vld [vmem:[#allocation2 + $0x88] ss:$28 sps:$4 sm:$0xff]  }
  0xa2   :  { %1826 = vmatmul.mubr.bf16.gmra.mxu0 %v4747_v35  ;;  %v4847_v35 = vld [vmem:[#allocation5 + $0x26c] ss:$16 sps:$4 sm:$0xff]  }
  0xa3   :  { %1959 = vmatmul.mubr.bf16.gmra.mxu1 %v4748_v38  ;;  %1835 = vmatprep.mubr.bf16.mxu0 %v4752_v39  ;;  %v4842_v38 = vld [vmem:[#allocation5 + $0x68] ss:$16 sps:$4 sm:$0xff]  }
  0xa4   :  { %1968 = vmatprep.mubr.bf16.mxu1 %v4754_v40  ;;  %2036 = vmatpush2.bf16.msra.mxu0 %v4758_v42  ;;  %v4848_v39 = vld [vmem:[#allocation2 + $0xbc] ss:$28 sps:$4 sm:$0xff]  }
  0xa5   :  { %2037 = vmatprep.subr.bf16.mxu0 %v4763_v43  ;;  %v4845_v40 = vld [vmem:[#allocation5 + $0x268] ss:$16 sps:$4 sm:$0xff]   ;;  %v4857_v42 = vld [vmem:[#allocation5 + $0x24c] ss:$16 sps:$4 sm:$0xff]  }
  0xa6   :  { %v4852_v43 = vld [vmem:[#allocation5 + $0x48] ss:$16 sps:$4 sm:$0xff]  }
  0xa8   :  { %2038 = vmatpush2.bf16.msra.mxu0 %v4761_v45  ;;  %v4855_v45 = vld [vmem:[#allocation5 + $0x248] ss:$16 sps:$4 sm:$0xff]  }
  0xa9   :  { %2039 = vmatprep.subr.bf16.mxu0 %v4772_v46  ;;  %v4860_v46 = vld [vmem:[#allocation5 + $0x2c] ss:$16 sps:$4 sm:$0xff]  }
  0xaa   :  { %1836 = vmatmul.mubr.bf16.gmra.mxu0 %v4756_v44  ;;  %v4850_v44 = vld [vmem:[#allocation2 + $0xb8] ss:$28 sps:$4 sm:$0xff]  }
  0xab   :  { %1969 = vmatmul.mubr.bf16.gmra.mxu1 %v4757_v47  ;;  %1845 = vmatprep.mubr.bf16.mxu0 %v4764_v48  ;;  %v4867_v47 = vld [vmem:[#allocation5 + $0x22c] ss:$16 sps:$4 sm:$0xff]  }
  0xac   :  { %1978 = vmatprep.mubr.bf16.mxu1 %v4766_v49  ;;  %2040 = vmatpush2.bf16.msra.mxu0 %v4770_v50  ;;  %v4851_v48 = vld [vmem:[#allocation2 + $0xc0] ss:$28 sps:$4 sm:$0xff]   ;;  %v4858_v49 = vld [vmem:[#allocation5 + $0x28] ss:$16 sps:$4 sm:$0xff]   ;;  %v4861_v50 = vld [vmem:[#allocation2 + $0xf4] ss:$28 sps:$4 sm:$0xff]  }
  0xad   :  { %2041 = vmatprep.subr.bf16.mxu0 %v4779_v51  ;;  %v4865_v51 = vld [vmem:[#allocation5 + $0x228] ss:$16 sps:$4 sm:$0xff]  }
  0xb0   :  { %2042 = vmatpush2.bf16.msra.mxu0 %v4777_v53  ;;  %v4873_v53 = vld [vmem:[#allocation5 + $0x20c] ss:$16 sps:$4 sm:$0xff]  }
  0xb1   :  { %2043 = vmatprep.subr.bf16.mxu0 %v4784_v55  ;;  %v4871_v55 = vld [vmem:[#allocation5 + $0x208] ss:$16 sps:$4 sm:$0xff]  }
  0xb2   :  { %1846 = vmatmul.mubr.bf16.gmra.mxu0 %v4768_v52  ;;  %v4870_v52 = vld [vmem:[#allocation5 + $0xc] ss:$16 sps:$4 sm:$0xff]  }
  0xb3   :  { %1979 = vmatmul.mubr.bf16.gmra.mxu1 %v4769_v54  ;;  %1855 = vmatprep.mubr.bf16.mxu0 %v4773_v56  ;;  %v4868_v54 = vld [vmem:[#allocation5 + $0x8] ss:$16 sps:$4 sm:$0xff]   ;;  %v4863_v56 = vld [vmem:[#allocation2 + $0xf0] ss:$28 sps:$4 sm:$0xff]  }
  0xb4   :  { %1988 = vmatprep.mubr.bf16.mxu1 %v4775_v57  ;;  %2044 = vmatpush2.bf16.msra.mxu0 %v4782_v58  ;;  %v4880_v57 = vld [vmem:[#allocation5 + $0x1ec] ss:$16 sps:$4 sm:$0xff]  }
  0xb5   :  { %2045 = vmatprep.subr.bf16.mxu0 %v4793_v59  ;;  %v4883_v58 = vld [vmem:[#allocation5 + $0x3ec] ss:$16 sps:$4 sm:$0xff]   ;;  %v4864_v59 = vld [vmem:[#allocation2 + $0xf8] ss:$28 sps:$4 sm:$0xff]  }
  0xb8   :  { %2046 = vmatpush2.bf16.msra.mxu0 %v4791_v60  ;;  %v4874_v60 = vld [vmem:[#allocation2 + $0x12c] ss:$28 sps:$4 sm:$0xff]  }
  0xb9   :  { %2047 = vmatprep.subr.bf16.mxu0 %v4796_v62  ;;  %v4881_v62 = vld [vmem:[#allocation5 + $0x3e8] ss:$16 sps:$4 sm:$0xff]  }
  0xba   :  { %1856 = vmatmul.mubr.bf16.gmra.mxu0 %v4780_v61  ;;  %v4878_v61 = vld [vmem:[#allocation5 + $0x1e8] ss:$16 sps:$4 sm:$0xff]  }
  0xbb   :  { %1989 = vmatmul.mubr.bf16.gmra.mxu1 %v4781_v63  ;;  %1865 = vmatprep.mubr.bf16.mxu0 %v4785_v0  ;;  %v4886_v63 = vld [vmem:[#allocation5 + $0x1cc] ss:$16 sps:$4 sm:$0xff]  }
  0xbc   :  { %1998 = vmatprep.mubr.bf16.mxu1 %v4787_v1  ;;  %2048 = vmatpush2.bf16.msra.mxu0 %v4794_v2  ;;  %v4891_v0 = vld [vmem:[#allocation5 + $0x3cc] ss:$16 sps:$4 sm:$0xff]   ;;  %v4884_v1 = vld [vmem:[#allocation5 + $0x1c8] ss:$16 sps:$4 sm:$0xff]  }
  0xbd   :  { %2049 = vmatprep.subr.bf16.mxu0 %v4805_v3  ;;  %v4889_v2 = vld [vmem:[#allocation5 + $0x3c8] ss:$16 sps:$4 sm:$0xff]   ;;  %v4896_v3 = vld [vmem:[#allocation5 + $0x1ac] ss:$16 sps:$4 sm:$0xff]  }
  0xc0   :  { %2050 = vmatpush2.bf16.msra.mxu0 %v4803_v5  ;;  %v4876_v5 = vld [vmem:[#allocation2 + $0x128] ss:$28 sps:$4 sm:$0xff]  }
  0xc1   :  { %2285 = vmatprep.subr.bf16.mxu0 %v4812_v6  ;;  %v4877_v6 = vld [vmem:[#allocation2 + $0x130] ss:$28 sps:$4 sm:$0xff]  }
  0xc2   :  { %1866 = vmatmul.mubr.bf16.gmra.mxu0 %v4789_v4  ;;  %v4899_v4 = vld [vmem:[#allocation5 + $0x3ac] ss:$16 sps:$4 sm:$0xff]  }
  0xc3   :  { %1999 = vmatmul.mubr.bf16.gmra.mxu1 %v4790_v7  ;;  %1875 = vmatprep.mubr.bf16.mxu0 %v4797_v8  ;;  %v4887_v7 = vld [vmem:[#allocation2 + $0x164] ss:$28 sps:$4 sm:$0xff]   ;;  %v4894_v8 = vld [vmem:[#allocation5 + $0x1a8] ss:$16 sps:$4 sm:$0xff]  }
  0xc4   :  { %2008 = vmatprep.mubr.bf16.mxu1 %v4799_v9  ;;  %v4897_v9 = vld [vmem:[#allocation5 + $0x3a8] ss:$16 sps:$4 sm:$0xff]  }
  0xca   :  { %1876 = vmatmul.mubr.bf16.gmra.mxu0 %v4801_v10  ;;  %v4904_v10 = vld [vmem:[#allocation5 + $0x18c] ss:$16 sps:$4 sm:$0xff]  }
  0xcb   :  { %2009 = vmatmul.mubr.bf16.gmra.mxu1 %v4802_v11  ;;  %2051 = vmatprep.mubr.bf16.mxu0 %v4808_v12  ;;  %v4909_v11 = vld [vmem:[#allocation5 + $0x38c] ss:$16 sps:$4 sm:$0xff]   ;;  %v4902_v12 = vld [vmem:[#allocation5 + $0x188] ss:$16 sps:$4 sm:$0xff]  }
  0xcc   :  { %2184 = vmatprep.mubr.bf16.mxu1 %v5317_v13 }
  0xd2   :  { %2052 = vmatmul.mubr.bf16.vlgmr.msra.gmra.mxu0 %v4806_v14  ;;  %v4907_v14 = vld [vmem:[#allocation5 + $0x388] ss:$16 sps:$4 sm:$0xff]  }
  0xd3   :  { %4292 = vmatmul.mubr.msk.bf16.vlgmr.msra.gmra.mxu1 %vm1722_vm0, %v4809_v15  ;;  %2286 = vmatpush1.bf16.msra.mxu0 %v4810_v16  ;;  %v4912_v15 = vld [vmem:[#allocation5 + $0x16c] ss:$16 sps:$4 sm:$0xff]  }
  0xd4   :  { %2419 = vmatpush1.bf16.msra.mxu1 %v4813_v17  ;;  %2287 = vmatprep.subr.bf16.mxu0 %v4818_v18  ;;  %v4915_v16 = vld [vmem:[#allocation5 + $0x36c] ss:$16 sps:$4 sm:$0xff]   ;;  %v4893_v18 = vld [vmem:[#allocation2 + $0x168] ss:$28 sps:$4 sm:$0xff]  }
  0xd5   :  { %2061 = vmatprep.mubr.bf16.mxu0 %v4819_v19  ;;  %2194 = vmatprep.mubr.bf16.mxu1 %v5317_v13  ;;  %v4892_v17 = vld [vmem:[#allocation2 + $0x160] ss:$28 sps:$4 sm:$0xff]  }
  0xd6   :  { %2420 = vmatprep.subr.bf16.mxu1 %v4823_v20  ;;  %v4900_v19 = vld [vmem:[#allocation2 + $0x19c] ss:$28 sps:$4 sm:$0xff]  }
  0xd7   :  { %2288 = vmatpush1.bf16.msra.mxu0 %v4816_v21  ;;  %v4910_v20 = vld [vmem:[#allocation5 + $0x168] ss:$16 sps:$4 sm:$0xff]  }
  0xd8   :  { %2421 = vmatpush1.bf16.msra.mxu1 %v4821_v22  ;;  %2289 = vmatprep.subr.bf16.mxu0 %v4828_v23  ;;  %v4913_v21 = vld [vmem:[#allocation5 + $0x368] ss:$16 sps:$4 sm:$0xff]   ;;  %v4922_v22 = vld [vmem:[#allocation5 + $0x14c] ss:$16 sps:$4 sm:$0xff]  }
  0xd9   :  { %2422 = vmatprep.subr.bf16.mxu1 %v4831_v24  ;;  %v4925_v23 = vld [vmem:[#allocation5 + $0x34c] ss:$16 sps:$4 sm:$0xff]   ;;  %v4920_v24 = vld [vmem:[#allocation5 + $0x148] ss:$16 sps:$4 sm:$0xff]  }
  0xda   :  { %2062 = vmatmul.mubr.bf16.gmra.mxu0 %v4824_v25  ;;  %v4923_v25 = vld [vmem:[#allocation5 + $0x348] ss:$16 sps:$4 sm:$0xff]  }
  0xdb   :  { %4293 = vmatmul.mubr.msk.bf16.gmra.mxu1 %vm1722_vm0, %v4825_v26  ;;  %2290 = vmatpush1.bf16.msra.mxu0 %v4826_v27  ;;  %v4905_v26 = vld [vmem:[#allocation2 + $0x198] ss:$28 sps:$4 sm:$0xff]   ;;  %v4906_v27 = vld [vmem:[#allocation2 + $0x1a0] ss:$28 sps:$4 sm:$0xff]  }
  0xdc   :  { %2423 = vmatpush1.bf16.msra.mxu1 %v4829_v28  ;;  %2071 = vmatprep.mubr.bf16.mxu0 %v4832_v29  ;;  %v4928_v28 = vld [vmem:[#allocation5 + $0x12c] ss:$16 sps:$4 sm:$0xff]   ;;  %v4916_v29 = vld [vmem:[#allocation2 + $0x1d4] ss:$28 sps:$4 sm:$0xff]  }
  0xdd   :  { %2204 = vmatprep.mubr.bf16.mxu1 %v5317_v13  ;;  %2291 = vmatprep.subr.bf16.mxu0 %v4836_v30  ;;  %v4935_v30 = vld [vmem:[#allocation5 + $0x32c] ss:$16 sps:$4 sm:$0xff]  }
  0xde   :  { %2424 = vmatprep.subr.bf16.mxu1 %v4841_v31  ;;  %v4926_v31 = vld [vmem:[#allocation5 + $0x128] ss:$16 sps:$4 sm:$0xff]  }
  0xdf   :  { %2292 = vmatpush1.bf16.msra.mxu0 %v4834_v32  ;;  %v4933_v32 = vld [vmem:[#allocation5 + $0x328] ss:$16 sps:$4 sm:$0xff]  }
  0xe0   :  { %2425 = vmatpush1.bf16.msra.mxu1 %v4839_v33  ;;  %2293 = vmatprep.subr.bf16.mxu0 %v4844_v34  ;;  %v4938_v33 = vld [vmem:[#allocation5 + $0x10c] ss:$16 sps:$4 sm:$0xff]  }
  0xe1   :  { %2426 = vmatprep.subr.bf16.mxu1 %v4847_v35  ;;  %v4941_v34 = vld [vmem:[#allocation5 + $0x30c] ss:$16 sps:$4 sm:$0xff]   ;;  %v4936_v35 = vld [vmem:[#allocation5 + $0x108] ss:$16 sps:$4 sm:$0xff]  }
  0xe2   :  { %2072 = vmatmul.mubr.bf16.gmra.mxu0 %v4837_v36  ;;  %v4939_v36 = vld [vmem:[#allocation5 + $0x308] ss:$16 sps:$4 sm:$0xff]  }
  0xe3   :  { %4294 = vmatmul.mubr.msk.bf16.gmra.mxu1 %vm1722_vm0, %v4838_v37  ;;  %2294 = vmatpush1.bf16.msra.mxu0 %v4842_v38  ;;  %v4918_v37 = vld [vmem:[#allocation2 + $0x1d0] ss:$28 sps:$4 sm:$0xff]   ;;  %v4919_v38 = vld [vmem:[#allocation2 + $0x1d8] ss:$28 sps:$4 sm:$0xff]  }
  0xe4   :  { %2081 = vmatprep.mubr.bf16.mxu0 %v4848_v39  ;;  %2214 = vmatprep.mubr.bf16.mxu1 %v5317_v13  ;;  %v4944_v39 = vld [vmem:[#allocation5 + $0x4ec] ss:$16 sps:$4 sm:$0xff]  }
  0xe5   :  { %2427 = vmatpush1.bf16.msra.mxu1 %v4845_v40  ;;  %2295 = vmatprep.subr.bf16.mxu0 %v4854_v41  ;;  %v4929_v40 = vld [vmem:[#allocation2 + $0x20c] ss:$28 sps:$4 sm:$0xff]  }
  0xe6   :  { %2428 = vmatprep.subr.bf16.mxu1 %v4857_v42  ;;  %v4947_v41 = vld [vmem:[#allocation5 + $0x60c] ss:$16 sps:$4 sm:$0xff]   ;;  %v4931_v42 = vld [vmem:[#allocation2 + $0x208] ss:$28 sps:$4 sm:$0xff]  }
  0xe7   :  { %2296 = vmatpush1.bf16.msra.mxu0 %v4852_v43  ;;  %v4932_v43 = vld [vmem:[#allocation2 + $0x210] ss:$28 sps:$4 sm:$0xff]  }
  0xe8   :  { %2297 = vmatprep.subr.bf16.mxu0 %v4860_v46  ;;  %v4942_v46 = vld [vmem:[#allocation5 + $0x4e8] ss:$16 sps:$4 sm:$0xff]  }
  0xe9   :  { %2429 = vmatpush1.bf16.msra.mxu1 %v4855_v45  ;;  %v5106_v45 = vld [vmem:[#allocation2 + $0xc] ss:$28 sps:$4 sm:$0xff]  }
  0xea   :  { %2430 = vmatprep.subr.bf16.mxu1 %v4867_v47  ;;  %2082 = vmatmul.mubr.bf16.gmra.mxu0 %v4850_v44  ;;  %v5105_v44 = vld [vmem:[#allocation2 + $0x4] ss:$28 sps:$4 sm:$0xff]   ;;  %v4945_v47 = vld [vmem:[#allocation5 + $0x608] ss:$16 sps:$4 sm:$0xff]  }
  0xeb   :  { %4295 = vmatmul.mubr.msk.bf16.gmra.mxu1 %vm1722_vm0, %v4851_v48  ;;  %2091 = vmatprep.mubr.bf16.mxu0 %v4861_v50  ;;  %v4950_v48 = vld [vmem:[#allocation5 + $0x4cc] ss:$16 sps:$4 sm:$0xff]   ;;  %v5108_v50 = vld [vmem:[#allocation2 + $0x8] ss:$28 sps:$4 sm:$0xff]  }
  0xec   :  { %2224 = vmatprep.mubr.bf16.mxu1 %v5317_v13  ;;  %2298 = vmatpush1.bf16.msra.mxu0 %v4858_v49  ;;  %v5107_v49 = vld [vmem:[#allocation2] ss:$28 sps:$4 sm:$0xff]  }
  0xed   :  { %2431 = vmatpush1.bf16.msra.mxu1 %v4865_v51  ;;  %2299 = vmatprep.subr.bf16.mxu0 %v4870_v52  ;;  %v4948_v51 = vld [vmem:[#allocation5 + $0x4c8] ss:$16 sps:$4 sm:$0xff]  }
  0xee   :  { %2432 = vmatprep.subr.bf16.mxu1 %v4873_v53  ;;  %v5109_v52 = vld [vmem:[#allocation2 + $0x3c] ss:$28 sps:$4 sm:$0xff]  }
  0xef   :  { %v4953_v53 = vld [vmem:[#allocation5 + $0x4ac] ss:$16 sps:$4 sm:$0xff]  }
  0xf0   :  { %2300 = vmatpush1.bf16.msra.mxu0 %v4868_v54  ;;  %v5110_v54 = vld [vmem:[#allocation2 + $0x44] ss:$28 sps:$4 sm:$0xff]  }
  0xf1   :  { %2433 = vmatpush1.bf16.msra.mxu1 %v4871_v55  ;;  %2301 = vmatprep.subr.bf16.mxu0 %v4880_v57  ;;  %v4951_v55 = vld [vmem:[#allocation5 + $0x4a8] ss:$16 sps:$4 sm:$0xff]  }
  0xf2   :  { %2434 = vmatprep.subr.bf16.mxu1 %v4883_v58  ;;  %2092 = vmatmul.mubr.bf16.gmra.mxu0 %v4863_v56  ;;  %v4956_v56 = vld [vmem:[#allocation5 + $0x48c] ss:$16 sps:$4 sm:$0xff]   ;;  %v5111_v57 = vld [vmem:[#allocation2 + $0x38] ss:$28 sps:$4 sm:$0xff]  }
  0xf3   :  { %4296 = vmatmul.mubr.msk.bf16.gmra.mxu1 %vm1722_vm0, %v4864_v59  ;;  %2101 = vmatprep.mubr.bf16.mxu0 %v4874_v60  ;;  %v5112_v58 = vld [vmem:[#allocation2 + $0x40] ss:$28 sps:$4 sm:$0xff]   ;;  %v5113_v59 = vld [vmem:[#allocation2 + $0x74] ss:$28 sps:$4 sm:$0xff]   ;;  %v4954_v60 = vld [vmem:[#allocation5 + $0x488] ss:$16 sps:$4 sm:$0xff]  }
  0xf4   :  { %2234 = vmatprep.mubr.bf16.mxu1 %v5317_v13  ;;  %2302 = vmatpush2.bf16.msra.mxu0 %v4878_v61  ;;  %v5114_v61 = vld [vmem:[#allocation2 + $0x7c] ss:$28 sps:$4 sm:$0xff]  }
  0xf5   :  { %2435 = vmatpush2.bf16.msra.mxu1 %v4881_v62  ;;  %2303 = vmatprep.subr.bf16.mxu0 %v4886_v63  ;;  %v4959_v62 = vld [vmem:[#allocation5 + $0x46c] ss:$16 sps:$4 sm:$0xff]   ;;  %v4957_v63 = vld [vmem:[#allocation5 + $0x468] ss:$16 sps:$4 sm:$0xff]  }
  0xf6   :  { %2436 = vmatprep.subr.bf16.mxu1 %v4891_v0  ;;  %v4962_v0 = vld [vmem:[#allocation5 + $0x44c] ss:$16 sps:$4 sm:$0xff]  }
  0xf8   :  { %2304 = vmatpush2.bf16.msra.mxu0 %v4884_v1  ;;  %v5115_v1 = vld [vmem:[#allocation2 + $0x70] ss:$28 sps:$4 sm:$0xff]  }
  0xf9   :  { %2437 = vmatpush2.bf16.msra.mxu1 %v4889_v2  ;;  %2305 = vmatprep.subr.bf16.mxu0 %v4896_v3  ;;  %v5116_v2 = vld [vmem:[#allocation2 + $0x78] ss:$28 sps:$4 sm:$0xff]   ;;  %v5117_v3 = vld [vmem:[#allocation2 + $0xac] ss:$28 sps:$4 sm:$0xff]  }
  0xfa   :  { %2438 = vmatprep.subr.bf16.mxu1 %v4899_v4  ;;  %2102 = vmatmul.mubr.bf16.gmra.mxu0 %v4876_v5  ;;  %v4960_v4 = vld [vmem:[#allocation5 + $0x448] ss:$16 sps:$4 sm:$0xff]   ;;  %v372_v5 = vlaneseq }
  0xfb   :  { %4297 = vmatmul.mubr.msk.bf16.gmra.mxu1 %vm1722_vm0, %v4877_v6  ;;  %2111 = vmatprep.mubr.bf16.mxu0 %v4887_v7  ;;  %v5118_v6 = vld [vmem:[#allocation2 + $0xb4] ss:$28 sps:$4 sm:$0xff]   ;;  %v4965_v7 = vld [vmem:[#allocation5 + $0x42c] ss:$16 sps:$4 sm:$0xff]  }
  0xfc   :  { %2244 = vmatprep.mubr.bf16.mxu1 %v5317_v13  ;;  %2306 = vmatpush2.bf16.msra.mxu0 %v4894_v8  ;;  %v5397_v8 = vshrl.u32 %v372_v5, 7 }
  0xfd   :  { %2439 = vmatpush2.bf16.msra.mxu1 %v4897_v9  ;;  %2307 = vmatprep.subr.bf16.mxu0 %v4904_v10  ;;  %v4963_v9 = vld [vmem:[#allocation5 + $0x428] ss:$16 sps:$4 sm:$0xff]   ;;  %v4968_v10 = vld [vmem:[#allocation5 + $0x40c] ss:$16 sps:$4 sm:$0xff]  }
  0xfe   :  { %2440 = vmatprep.subr.bf16.mxu1 %v4909_v11  ;;  %5981 = vst [vmem:[#allocation16_spill] sm:$0xff] %v5397_v8  ;;  %v5119_v11 = vld [vmem:[#allocation2 + $0xa8] ss:$28 sps:$4 sm:$0xff]  }
 0x100   :  { %2308 = vmatpush2.bf16.msra.mxu0 %v4902_v12  ;;  %v5120_v12 = vld [vmem:[#allocation2 + $0xb0] ss:$28 sps:$4 sm:$0xff]  }
 0x101   :  { %2441 = vmatpush2.bf16.msra.mxu1 %v4907_v14  ;;  %2309 = vmatprep.subr.bf16.mxu0 %v4912_v15  ;;  %v5121_v14 = vld [vmem:[#allocation2 + $0xe4] ss:$28 sps:$4 sm:$0xff]   ;;  %v5122_v15 = vld [vmem:[#allocation2 + $0xec] ss:$28 sps:$4 sm:$0xff]  }
 0x102   :  { %2442 = vmatprep.subr.bf16.mxu1 %v4915_v16  ;;  %2112 = vmatmul.mubr.bf16.gmra.mxu0 %v4892_v17  ;;  %v5977_v16 = vsub.s32 0, %v5397_v8  ;;  %v370_v17 = vld [vmem:[#allocation7] sm:$0xf] }
 0x103   :  { %4298 = vmatmul.mubr.msk.bf16.gmra.mxu1 %vm1722_vm0, %v4893_v18  ;;  %2121 = vmatprep.mubr.bf16.mxu0 %v4900_v19  ;;  %v4966_v18 = vld [vmem:[#allocation5 + $0x408] ss:$16 sps:$4 sm:$0xff]   ;;  %v5978_v19 = vsub.s32 1, %v5397_v8 }
 0x104   :  { %2254 = vmatprep.mubr.bf16.mxu1 %v5317_v13  ;;  %2310 = vmatpush2.bf16.msra.mxu0 %v4910_v20  ;;  %v4971_v20 = vld [vmem:[#allocation5 + $0x5ec] ss:$16 sps:$4 sm:$0xff]  }
 0x105   :  { %2443 = vmatpush2.bf16.msra.mxu1 %v4913_v21  ;;  %2311 = vmatprep.subr.bf16.mxu0 %v4922_v22  ;;  %v5403_v21 = vrot.slane %v370_v17, %v5977_v16  ;;  %v4969_v22 = vld [vmem:[#allocation5 + $0x5e8] ss:$16 sps:$4 sm:$0xff]  }
 0x106   :  { %2444 = vmatprep.subr.bf16.mxu1 %v4925_v23  ;;  %v5407_v23 = vrot.slane %v370_v17, %v5978_v19  ;;  %v5133_v17 = vld [vmem:[#allocation2 + $0x18c] ss:$28 sps:$4 sm:$0xff]  }
 0x108   :  { %2312 = vmatpush2.bf16.msra.mxu0 %v4920_v24  ;;  %v4974_v24 = vld [vmem:[#allocation5 + $0x5cc] ss:$16 sps:$4 sm:$0xff]  }
 0x109   :  { %2445 = vmatpush2.bf16.msra.mxu1 %v4923_v25  ;;  %2313 = vmatprep.subr.bf16.mxu0 %v4928_v28  ;;  %v5124_v28 = vld [vmem:[#allocation2 + $0xe8] ss:$28 sps:$4 sm:$0xff]  }
 0x10a   :  { %2446 = vmatprep.subr.bf16.mxu1 %v4935_v30  ;;  %2122 = vmatmul.mubr.bf16.gmra.mxu0 %v4905_v26  ;;  %v5125_v30 = vld [vmem:[#allocation2 + $0x11c] ss:$28 sps:$4 sm:$0xff]  }
 0x10b   :  { %4299 = vmatmul.mubr.msk.bf16.gmra.mxu1 %vm1722_vm0, %v4906_v27  ;;  %2131 = vmatprep.mubr.bf16.mxu0 %v4916_v29  ;;  %v5123_v27 = vld [vmem:[#allocation2 + $0xe0] ss:$28 sps:$4 sm:$0xff]  }
 0x10c   :  { %2264 = vmatprep.mubr.bf16.mxu1 %v5317_v13  ;;  %2314 = vmatpush2.bf16.msra.mxu0 %v4926_v31  ;;  %v5126_v31 = vld [vmem:[#allocation2 + $0x124] ss:$28 sps:$4 sm:$0xff]  }
 0x10d   :  { %2447 = vmatpush2.bf16.msra.mxu1 %v4933_v32  ;;  %2315 = vmatprep.subr.bf16.mxu0 %v4938_v33 }
 0x10e   :  { %2448 = vmatprep.subr.bf16.mxu1 %v4941_v34  ;;  %v4972_v34 = vld [vmem:[#allocation5 + $0x5c8] ss:$16 sps:$4 sm:$0xff]  }
 0x110   :  { %2316 = vmatpush2.bf16.msra.mxu0 %v4936_v35 }
 0x111   :  { %2449 = vmatpush2.bf16.msra.mxu1 %v4939_v36  ;;  %2551 = vmatprep.subr.bf16.mxu0 %v4944_v39 }
 0x112   :  { %2698 = vmatprep.subr.bf16.mxu1 %v4947_v41  ;;  %2132 = vmatmul.mubr.bf16.gmra.mxu0 %v4918_v37  ;;  %v4977_v37 = vld [vmem:[#allocation5 + $0x5ac] ss:$16 sps:$4 sm:$0xff]  }
 0x113   :  { %4300 = vmatmul.mubr.msk.bf16.gmra.mxu1 %vm1722_vm0, %v4919_v38  ;;  %2141 = vmatprep.mubr.bf16.mxu0 %v4929_v40 }
 0x114   :  { %2274 = vmatprep.mubr.bf16.mxu1 %v5317_v13 }
 0x11a   :  { %2142 = vmatmul.mubr.bf16.gmra.mxu0 %v4931_v42 }
 0x11b   :  { %4301 = vmatmul.mubr.msk.bf16.gmra.mxu1 %vm1722_vm0, %v4932_v43  ;;  %2317 = vmatprep.mubr.bf16.mxu0 %v5105_v44  ;;  %v4975_v44 = vld [vmem:[#allocation5 + $0x5a8] ss:$16 sps:$4 sm:$0xff]  }
 0x11c   :  { %2450 = vmatprep.mubr.bf16.mxu1 %v5106_v45 }
 0x122   :  { %2318 = vmatmul.mubr.bf16.vlgmr.msra.gmra.mxu0 %v5107_v49 }
 0x123   :  { %2451 = vmatmul.mubr.bf16.vlgmr.msra.gmra.mxu1 %v5108_v50  ;;  %2552 = vmatpush1.bf16.msra.mxu0 %v4942_v46  ;;  %v5127_v50 = vld [vmem:[#allocation2 + $0x118] ss:$28 sps:$4 sm:$0xff]  }
 0x124   :  { %2699 = vmatpush1.bf16.msra.mxu1 %v4945_v47  ;;  %2553 = vmatprep.subr.bf16.mxu0 %v4950_v48  ;;  %v4980_v47 = vld [vmem:[#allocation5 + $0x58c] ss:$16 sps:$4 sm:$0xff]  }
 0x125   :  { %2327 = vmatprep.mubr.bf16.mxu0 %v5109_v52  ;;  %2460 = vmatprep.mubr.bf16.mxu1 %v5110_v54  ;;  %v5129_v54 = vld [vmem:[#allocation2 + $0x154] ss:$28 sps:$4 sm:$0xff]  }
 0x127   :  { %2554 = vmatpush1.bf16.msra.mxu0 %v4948_v51  ;;  %v5128_v51 = vld [vmem:[#allocation2 + $0x120] ss:$28 sps:$4 sm:$0xff]  }
 0x128   :  { %2555 = vmatprep.subr.bf16.mxu0 %v4953_v53 }
 0x12a   :  { %2328 = vmatmul.mubr.bf16.gmra.mxu0 %v5111_v57 }
 0x12b   :  { %2461 = vmatmul.mubr.bf16.gmra.mxu1 %v5112_v58  ;;  %2556 = vmatpush1.bf16.msra.mxu0 %v4951_v55  ;;  %v5130_v55 = vld [vmem:[#allocation2 + $0x15c] ss:$28 sps:$4 sm:$0xff]  }
 0x12c   :  { %2337 = vmatprep.mubr.bf16.mxu0 %v5113_v59  ;;  %2470 = vmatprep.mubr.bf16.mxu1 %v5114_v61  ;;  %v4978_v58 = vld [vmem:[#allocation5 + $0x588] ss:$16 sps:$4 sm:$0xff]   ;;  %v4983_v61 = vld [vmem:[#allocation5 + $0x56c] ss:$16 sps:$4 sm:$0xff]  }
 0x12d   :  { %2557 = vmatprep.subr.bf16.mxu0 %v4956_v56 }
 0x12f   :  { %2558 = vmatpush1.bf16.msra.mxu0 %v4954_v60 }
 0x130   :  { %2559 = vmatprep.subr.bf16.mxu0 %v4959_v62 }
 0x132   :  { %2338 = vmatmul.mubr.bf16.gmra.mxu0 %v5115_v1 }
 0x133   :  { %2471 = vmatmul.mubr.bf16.gmra.mxu1 %v5116_v2  ;;  %2560 = vmatpush1.bf16.msra.mxu0 %v4957_v63 }
 0x134   :  { %2347 = vmatprep.mubr.bf16.mxu0 %v5117_v3  ;;  %2480 = vmatprep.mubr.bf16.mxu1 %v5118_v6 }
 0x135   :  { %2561 = vmatprep.subr.bf16.mxu0 %v4962_v0 }
 0x137   :  { %2562 = vmatpush1.bf16.msra.mxu0 %v4960_v4  ;;  %v4981_v4 = vld [vmem:[#allocation5 + $0x568] ss:$16 sps:$4 sm:$0xff]  }
 0x138   :  { %2563 = vmatprep.subr.bf16.mxu0 %v4965_v7  ;;  %v4986_v7 = vld [vmem:[#allocation5 + $0x54c] ss:$16 sps:$4 sm:$0xff]  }
 0x13a   :  { %2348 = vmatmul.mubr.bf16.gmra.mxu0 %v5119_v11  ;;  %v5131_v11 = vld [vmem:[#allocation2 + $0x150] ss:$28 sps:$4 sm:$0xff]  }
 0x13b   :  { %2481 = vmatmul.mubr.bf16.gmra.mxu1 %v5120_v12  ;;  %2357 = vmatprep.mubr.bf16.mxu0 %v5121_v14  ;;  %v5132_v12 = vld [vmem:[#allocation2 + $0x158] ss:$28 sps:$4 sm:$0xff]  }
 0x13c   :  { %2490 = vmatprep.mubr.bf16.mxu1 %v5122_v15  ;;  %2564 = vmatpush1.bf16.msra.mxu0 %v4963_v9 }
 0x13d   :  { %2565 = vmatprep.subr.bf16.mxu0 %v4968_v10 }
 0x140   :  { %2566 = vmatpush1.bf16.msra.mxu0 %v4966_v18  ;;  %v5134_v18 = vld [vmem:[#allocation2 + $0x194] ss:$28 sps:$4 sm:$0xff]  }
 0x141   :  { %2567 = vmatprep.subr.bf16.mxu0 %v4971_v20 }
 0x142   :  { %v1787_v25 = vpop.f32.mrf.mxu0  ;;  %2358 = vmatmul.mubr.bf16.gmra.mxu0 %v5123_v27  ;;  %v4989_v27 = vld [vmem:[#allocation5 + $0x52c] ss:$16 sps:$4 sm:$0xff]  }
 0x143   :  { %v1920_v26 = vpop.f32.mrf.mxu1  ;;  %2491 = vmatmul.mubr.bf16.gmra.mxu1 %v5124_v28  ;;  %v1788_v29 = vadd.f32 %v1787_v25, %v5403_v21  ;;  %2367 = vmatprep.mubr.bf16.mxu0 %v5125_v30 }
 0x144   :  { %2500 = vmatprep.mubr.bf16.mxu1 %v5126_v31  ;;  %v1789_v32 = vpop.f32.mrf.mxu0  ;;  %2568 = vmatpush2.bf16.msra.mxu0 %v4969_v22 }
 0x145   :  { %v1922_v33 = vpop.f32.mrf.mxu1  ;;  %v5410_v35 = vadd.f32 %v1920_v26, %v1788_v29  ;;  %v1790_v36 = vadd.f32 %v1789_v32, %v5407_v23  ;;  %2569 = vmatprep.subr.bf16.mxu0 %v4974_v24  ;;  %v4984_v24 = vld [vmem:[#allocation5 + $0x548] ss:$16 sps:$4 sm:$0xff]  }
 0x146   :  { %v1791_v38 = vpop.f32.mrf.mxu0 }
 0x147   :  { %v1924_v39 = vpop.f32.mrf.mxu1  ;;  %v5413_v40 = vadd.f32 %v1922_v33, %v1790_v36  ;;  %v1792_v41 = vadd.f32 %v1791_v38, %v5403_v21  ;;  %v4992_v38 = vld [vmem:[#allocation5 + $0x50c] ss:$16 sps:$4 sm:$0xff]  }
 0x148   :  { %v1793_v42 = vpop.f32.mrf.mxu0  ;;  %2570 = vmatpush2.bf16.msra.mxu0 %v4972_v34  ;;  %v4987_v34 = vld [vmem:[#allocation5 + $0x528] ss:$16 sps:$4 sm:$0xff]  }
 0x149   :  { %v1926_v43 = vpop.f32.mrf.mxu1  ;;  %v5416_v45 = vadd.f32 %v1924_v39, %v1792_v41  ;;  %v1794_v46 = vadd.f32 %v1793_v42, %v5407_v23  ;;  %2571 = vmatprep.subr.bf16.mxu0 %v4977_v37  ;;  %v5135_v42 = vld [vmem:[#allocation2 + $0x188] ss:$28 sps:$4 sm:$0xff]  }
 0x14a   :  { %v1797_v48 = vpop.f32.mrf.mxu0  ;;  %2368 = vmatmul.mubr.bf16.gmra.mxu0 %v5127_v50 }
 0x14b   :  { %v1930_v49 = vpop.f32.mrf.mxu1  ;;  %2501 = vmatmul.mubr.bf16.gmra.mxu1 %v5128_v51  ;;  %v5419_v52 = vadd.f32 %v1926_v43, %v1794_v46  ;;  %v1798_v53 = vadd.f32 %v1797_v48, %v5403_v21  ;;  %2377 = vmatprep.mubr.bf16.mxu0 %v5129_v54  ;;  %v5136_v43 = vld [vmem:[#allocation2 + $0x190] ss:$28 sps:$4 sm:$0xff]   ;;  %v4990_v51 = vld [vmem:[#allocation5 + $0x508] ss:$16 sps:$4 sm:$0xff]  }
 0x14c   :  { %2510 = vmatprep.mubr.bf16.mxu1 %v5130_v55  ;;  %v1799_v56 = vpop.f32.mrf.mxu0  ;;  %2572 = vmatpush2.bf16.msra.mxu0 %v4975_v44  ;;  %v5138_v48 = vld [vmem:[#allocation2 + $0x1cc] ss:$28 sps:$4 sm:$0xff]  }
 0x14d   :  { %v1932_v57 = vpop.f32.mrf.mxu1  ;;  %v5422_v59 = vadd.f32 %v1930_v49, %v1798_v53  ;;  %v1800_v60 = vadd.f32 %v1799_v56, %v5407_v23  ;;  %2573 = vmatprep.subr.bf16.mxu0 %v4980_v47  ;;  %v5137_v47 = vld [vmem:[#allocation2 + $0x1c4] ss:$28 sps:$4 sm:$0xff]   ;;  %v4995_v55 = vld [vmem:[#allocation8 + $0x74] ss:$8 sps:$4 sm:$0xff]  }
 0x14e   :  { %v1801_v62 = vpop.f32.mrf.mxu0 }
 0x14f   :  { %v1934_v63 = vpop.f32.mrf.mxu1  ;;  %v5425_v0 = vadd.f32 %v1932_v57, %v1800_v60  ;;  %v1802_v1 = vadd.f32 %v1801_v62, %v5403_v21 }
 0x150   :  { %v1803_v2 = vpop.f32.mrf.mxu0  ;;  %2574 = vmatpush2.bf16.msra.mxu0 %v4978_v58 }
 0x151   :  { %v1936_v3 = vpop.f32.mrf.mxu1  ;;  %v5428_v5 = vadd.f32 %v1934_v63, %v1802_v1  ;;  %v1804_v6 = vadd.f32 %v1803_v2, %v5407_v23  ;;  %2575 = vmatprep.subr.bf16.mxu0 %v4983_v61 }
 0x152   :  { %v1807_v9 = vpop.f32.mrf.mxu0  ;;  %2378 = vmatmul.mubr.bf16.gmra.mxu0 %v5131_v11  ;;  %v5142_v11 = vld [vmem:[#allocation2 + $0x204] ss:$28 sps:$4 sm:$0xff]  }
 0x153   :  { %v1940_v10 = vpop.f32.mrf.mxu1  ;;  %2511 = vmatmul.mubr.bf16.gmra.mxu1 %v5132_v12  ;;  %v5431_v14 = vadd.f32 %v1936_v3, %v1804_v6  ;;  %v1808_v15 = vadd.f32 %v1807_v9, %v5403_v21  ;;  %2387 = vmatprep.mubr.bf16.mxu0 %v5133_v17  ;;  %v5140_v6 = vld [vmem:[#allocation2 + $0x1c8] ss:$28 sps:$4 sm:$0xff]  }
 0x154   :  { %2520 = vmatprep.mubr.bf16.mxu1 %v5134_v18  ;;  %v1809_v20 = vpop.f32.mrf.mxu0  ;;  %2576 = vmatpush2.bf16.msra.mxu0 %v4981_v4  ;;  %v5139_v4 = vld [vmem:[#allocation2 + $0x1c0] ss:$28 sps:$4 sm:$0xff]  }
 0x155   :  { %v1942_v22 = vpop.f32.mrf.mxu1  ;;  %v5434_v25 = vadd.f32 %v1940_v10, %v1808_v15  ;;  %v1810_v26 = vadd.f32 %v1809_v20, %v5407_v23  ;;  %2577 = vmatprep.subr.bf16.mxu0 %v4986_v7  ;;  %v5141_v10 = vld [vmem:[#allocation2 + $0x1fc] ss:$28 sps:$4 sm:$0xff]  }
 0x156   :  { %v1811_v28 = vpop.f32.mrf.mxu0 }
 0x157   :  { %v1944_v29 = vpop.f32.mrf.mxu1  ;;  %v5437_v30 = vadd.f32 %v1942_v22, %v1810_v26  ;;  %v1812_v31 = vadd.f32 %v1811_v28, %v5403_v21 }
 0x158   :  { %v1813_v32 = vpop.f32.mrf.mxu0  ;;  %2578 = vmatpush2.bf16.msra.mxu0 %v4984_v24 }
 0x159   :  { %v1946_v33 = vpop.f32.mrf.mxu1  ;;  %v5440_v36 = vadd.f32 %v1944_v29, %v1812_v31  ;;  %v1814_v37 = vadd.f32 %v1813_v32, %v5407_v23  ;;  %2579 = vmatprep.subr.bf16.mxu0 %v4989_v27 }
 0x15a   :  { %v1817_v39 = vpop.f32.mrf.mxu0  ;;  %2388 = vmatmul.mubr.bf16.gmra.mxu0 %v5135_v42 }
 0x15b   :  { %v1950_v41 = vpop.f32.mrf.mxu1  ;;  %2521 = vmatmul.mubr.bf16.gmra.mxu1 %v5136_v43  ;;  %v5443_v44 = vadd.f32 %v1946_v33, %v1814_v37  ;;  %v1818_v46 = vadd.f32 %v1817_v39, %v5403_v21  ;;  %2397 = vmatprep.mubr.bf16.mxu0 %v5137_v47  ;;  %v5144_v37 = vld [vmem:[#allocation2 + $0x200] ss:$28 sps:$4 sm:$0xff]  }
 0x15c   :  { %2530 = vmatprep.mubr.bf16.mxu1 %v5138_v48  ;;  %v1819_v49 = vpop.f32.mrf.mxu0  ;;  %2580 = vmatpush2.bf16.msra.mxu0 %v4987_v34  ;;  %v5143_v34 = vld [vmem:[#allocation2 + $0x1f8] ss:$28 sps:$4 sm:$0xff]  }
 0x15d   :  { %v1952_v50 = vpop.f32.mrf.mxu1  ;;  %v5446_v53 = vadd.f32 %v1950_v41, %v1818_v46  ;;  %v1820_v54 = vadd.f32 %v1819_v49, %v5407_v23  ;;  %2581 = vmatprep.subr.bf16.mxu0 %v4992_v38  ;;  %v5145_v41 = vld [vmem:[#allocation2 + $0x14] ss:$28 sps:$4 sm:$0xff]  }
 0x15e   :  { %v1821_v56 = vpop.f32.mrf.mxu0 }
 0x15f   :  { %v1954_v57 = vpop.f32.mrf.mxu1  ;;  %v5449_v58 = vadd.f32 %v1952_v50, %v1820_v54  ;;  %v1822_v60 = vadd.f32 %v1821_v56, %v5403_v21  ;;  %v4993_v56 = vld [vmem:[#allocation8 + $0x70] ss:$8 sps:$4 sm:$0xff]  }
 0x160   :  { %v1823_v61 = vpop.f32.mrf.mxu0  ;;  %2582 = vmatpush2.bf16.msra.mxu0 %v4990_v51 }
 0x161   :  { %v1956_v62 = vpop.f32.mrf.mxu1  ;;  %v5452_v63 = vadd.f32 %v1954_v57, %v1822_v60  ;;  %v1824_v1 = vadd.f32 %v1823_v61, %v5407_v23  ;;  %3333 = vmatprep.subr.bf16.mxu0 %v4995_v55  ;;  %v4998_v61 = vld [vmem:[#allocation8 + $0x64] ss:$8 sps:$4 sm:$0xff]  }
 0x162   :  { %v1827_v2 = vpop.f32.mrf.mxu0  ;;  %2398 = vmatmul.mubr.bf16.gmra.mxu0 %v5139_v4 }
 0x163   :  { %v1960_v3 = vpop.f32.mrf.mxu1  ;;  %2531 = vmatmul.mubr.bf16.gmra.mxu1 %v5140_v6  ;;  %v5455_v7 = vadd.f32 %v1956_v62, %v1824_v1  ;;  %v1828_v9 = vadd.f32 %v1827_v2, %v5403_v21  ;;  %2407 = vmatprep.mubr.bf16.mxu0 %v5141_v10  ;;  %v5146_v2 = vld [vmem:[#allocation2 + $0x10] ss:$28 sps:$4 sm:$0xff]  }
 0x164   :  { %2540 = vmatprep.mubr.bf16.mxu1 %v5142_v11  ;;  %v1829_v12 = vpop.f32.mrf.mxu0 }
 0x165   :  { %v1962_v15 = vpop.f32.mrf.mxu1  ;;  %v5458_v17 = vadd.f32 %v1960_v3, %v1828_v9  ;;  %v1830_v18 = vadd.f32 %v1829_v12, %v5407_v23  ;;  %v5147_v3 = vld [vmem:[#allocation2 + $0x18] ss:$28 sps:$4 sm:$0xff]   ;;  %v5148_v9 = vld [vmem:[#allocation2 + $0x4c] ss:$28 sps:$4 sm:$0xff]  }
 0x166   :  { %v1831_v20 = vpop.f32.mrf.mxu0  ;;  %v4996_v12 = vld [vmem:[#allocation8 + $0x60] ss:$8 sps:$4 sm:$0xff]  }
 0x167   :  { %v1964_v22 = vpop.f32.mrf.mxu1  ;;  %v5461_v24 = vadd.f32 %v1962_v15, %v1830_v18  ;;  %v1832_v26 = vadd.f32 %v1831_v20, %v5403_v21  ;;  %v5001_v20 = vld [vmem:[#allocation8 + $0x54] ss:$8 sps:$4 sm:$0xff]  }
 0x168   :  { %v1833_v27 = vpop.f32.mrf.mxu0 }
 0x169   :  { %v1966_v28 = vpop.f32.mrf.mxu1  ;;  %v5464_v29 = vadd.f32 %v1964_v22, %v1832_v26  ;;  %v1834_v31 = vadd.f32 %v1833_v27, %v5407_v23  ;;  %v5041_v22 = vld [vmem:[#allocation8 + $0x170] ss:$8 sps:$4 sm:$0xff]   ;;  %v5043_v26 = vld [vmem:[#allocation8 + $0x174] ss:$8 sps:$4 sm:$0xff]  }
 0x16a   :  { %v1837_v32 = vpop.f32.mrf.mxu0  ;;  %2408 = vmatmul.mubr.bf16.gmra.mxu0 %v5143_v34  ;;  %3466 = vmatprep.subr.bf16.mxu1 %v5043_v26  ;;  %v5005_v26 = vld [vmem:[#allocation8 + $0x30] ss:$8 sps:$4 sm:$0xff]  }
 0x16b   :  { %v1970_v33 = vpop.f32.mrf.mxu1  ;;  %2541 = vmatmul.mubr.bf16.gmra.mxu1 %v5144_v37  ;;  %v5467_v38 = vadd.f32 %v1966_v28, %v1834_v31  ;;  %v1838_v39 = vadd.f32 %v1837_v32, %v5403_v21  ;;  %2583 = vmatprep.mubr.bf16.mxu0 %v5145_v41  ;;  %v4999_v37 = vld [vmem:[#allocation8 + $0x50] ss:$8 sps:$4 sm:$0xff]  }
 0x16c   :  { %2716 = vmatprep.mubr.bf16.mxu1 %v5317_v13  ;;  %v1839_v42 = vpop.f32.mrf.mxu0 }
 0x16d   :  { %v1972_v43 = vpop.f32.mrf.mxu1  ;;  %v5471_v46 = vadd.f32 %v1970_v33, %v1838_v39  ;;  %v1840_v47 = vadd.f32 %v1839_v42, %v5407_v23  ;;  %v5004_v42 = vld [vmem:[#allocation8 + $0x44] ss:$8 sps:$4 sm:$0xff]  }
 0x16e   :  { %v1841_v48 = vpop.f32.mrf.mxu0 }
 0x16f   :  { %v1974_v49 = vpop.f32.mrf.mxu1  ;;  %v5474_v50 = vadd.f32 %v1972_v43, %v1840_v47  ;;  %v1842_v51 = vadd.f32 %v1841_v48, %v5403_v21  ;;  %v5044_v43 = vld [vmem:[#allocation8 + $0x160] ss:$8 sps:$4 sm:$0xff]   ;;  %v5046_v47 = vld [vmem:[#allocation8 + $0x164] ss:$8 sps:$4 sm:$0xff]  }
 0x170   :  { %v1843_v54 = vpop.f32.mrf.mxu0 }
 0x171   :  { %v1976_v55 = vpop.f32.mrf.mxu1  ;;  %v5477_v57 = vadd.f32 %v1974_v49, %v1842_v51  ;;  %v1844_v60 = vadd.f32 %v1843_v54, %v5407_v23  ;;  %v5149_v51 = vld [vmem:[#allocation2 + $0x48] ss:$28 sps:$4 sm:$0xff]   ;;  %v5150_v54 = vld [vmem:[#allocation2 + $0x50] ss:$28 sps:$4 sm:$0xff]  }
 0x172   :  { %v1847_v62 = vpop.f32.mrf.mxu0  ;;  %2584 = vmatmul.mubr.bf16.vlgmr.msra.gmra.mxu0 %v5146_v2 }
 0x173   :  { %v1980_v1 = vpop.f32.mrf.mxu1  ;;  %4302 = vmatmul.mubr.msk.bf16.vlgmr.msra.gmra.mxu1 %vm1722_vm0, %v5147_v3  ;;  %v5481_v4 = vadd.f32 %v1976_v55, %v1844_v60  ;;  %v1848_v6 = vadd.f32 %v1847_v62, %v5403_v21  ;;  %2593 = vmatprep.mubr.bf16.mxu0 %v5148_v9  ;;  %v5151_v60 = vld [vmem:[#allocation2 + $0x84] ss:$28 sps:$4 sm:$0xff]  }
 0x174   :  { %2726 = vmatprep.mubr.bf16.mxu1 %v5317_v13  ;;  %v1849_v10 = vpop.f32.mrf.mxu0  ;;  %3334 = vmatpush1.bf16.msra.mxu0 %v4993_v56 }
 0x175   :  { %v1982_v11 = vpop.f32.mrf.mxu1  ;;  %v5485_v15 = vadd.f32 %v1980_v1, %v1848_v6  ;;  %v1850_v18 = vadd.f32 %v1849_v10, %v5407_v23  ;;  %3335 = vmatprep.subr.bf16.mxu0 %v4998_v61  ;;  %3467 = vmatpush1.bf16.msra.mxu1 %v5041_v22  ;;  %v5002_v1 = vld [vmem:[#allocation8 + $0x40] ss:$8 sps:$4 sm:$0xff]   ;;  %v5007_v6 = vld [vmem:[#allocation8 + $0x34] ss:$8 sps:$4 sm:$0xff]  }
 0x176   :  { %v1851_v27 = vpop.f32.mrf.mxu0  ;;  %3468 = vmatprep.subr.bf16.mxu1 %v5046_v47 }
 0x177   :  { %v1984_v28 = vpop.f32.mrf.mxu1  ;;  %v5488_v31 = vadd.f32 %v1982_v11, %v1850_v18  ;;  %v1852_v32 = vadd.f32 %v1851_v27, %v5403_v21  ;;  %v5049_v18 = vld [vmem:[#allocation8 + $0x154] ss:$8 sps:$4 sm:$0xff]   ;;  %v5047_v27 = vld [vmem:[#allocation8 + $0x150] ss:$8 sps:$4 sm:$0xff]  }
 0x178   :  { %v1853_v33 = vpop.f32.mrf.mxu0  ;;  %3336 = vmatpush1.bf16.msra.mxu0 %v4996_v12 }
 0x179   :  { %v1986_v34 = vpop.f32.mrf.mxu1  ;;  %v5491_v39 = vadd.f32 %v1984_v28, %v1852_v32  ;;  %v1854_v41 = vadd.f32 %v1853_v33, %v5407_v23  ;;  %3337 = vmatprep.subr.bf16.mxu0 %v5001_v20  ;;  %3469 = vmatpush1.bf16.msra.mxu1 %v5044_v43  ;;  %v5010_v33 = vld [vmem:[#allocation8 + $0x24] ss:$8 sps:$4 sm:$0xff]  }
 0x17a   :  { %v1857_v48 = vpop.f32.mrf.mxu0  ;;  %2594 = vmatmul.mubr.bf16.gmra.mxu0 %v5149_v51  ;;  %3470 = vmatprep.subr.bf16.mxu1 %v5049_v18 }
 0x17b   :  { %v1990_v49 = vpop.f32.mrf.mxu1  ;;  %4303 = vmatmul.mubr.msk.bf16.gmra.mxu1 %vm1722_vm0, %v5150_v54  ;;  %v5495_v55 = vadd.f32 %v1986_v34, %v1854_v41  ;;  %v1858_v56 = vadd.f32 %v1857_v48, %v5403_v21  ;;  %2603 = vmatprep.mubr.bf16.mxu0 %v5151_v60  ;;  %v5152_v41 = vld [vmem:[#allocation2 + $0x80] ss:$28 sps:$4 sm:$0xff]  }
 0x17c   :  { %2736 = vmatprep.mubr.bf16.mxu1 %v5317_v13  ;;  %v1859_v61 = vpop.f32.mrf.mxu0  ;;  %3338 = vmatpush1.bf16.msra.mxu0 %v4999_v37  ;;  %v5154_v48 = vld [vmem:[#allocation2 + $0xbc] ss:$28 sps:$4 sm:$0xff]  }
 0x17d   :  { %v1992_v62 = vpop.f32.mrf.mxu1  ;;  %v5499_v2 = vadd.f32 %v1990_v49, %v1858_v56  ;;  %v1860_v3 = vadd.f32 %v1859_v61, %v5407_v23  ;;  %3339 = vmatprep.subr.bf16.mxu0 %v5004_v42  ;;  %v5153_v42 = vld [vmem:[#allocation2 + $0x88] ss:$28 sps:$4 sm:$0xff]   ;;  %v5052_v49 = vld [vmem:[#allocation8 + $0x144] ss:$8 sps:$4 sm:$0xff]   ;;  %v5008_v56 = vld [vmem:[#allocation8 + $0x20] ss:$8 sps:$4 sm:$0xff]   ;;  %3471 = vmatpush1.bf16.msra.mxu1 %v5047_v27 }
 0x17e   :  { %v1861_v9 = vpop.f32.mrf.mxu0  ;;  %v5050_v60 = vld [vmem:[#allocation8 + $0x140] ss:$8 sps:$4 sm:$0xff]   ;;  %3472 = vmatprep.subr.bf16.mxu1 %v5052_v49  ;;  %v5016_v27 = vld [vmem:[#allocation8 + $0x4] ss:$8 sps:$4 sm:$0xff]  }
 0x17f   :  { %v1994_v10 = vpop.f32.mrf.mxu1  ;;  %v5502_v11 = vadd.f32 %v1992_v62, %v1860_v3  ;;  %v1862_v12 = vadd.f32 %v1861_v9, %v5403_v21  ;;  %v5157_v49 = vld [vmem:[#allocation2 + $0xf4] ss:$28 sps:$4 sm:$0xff]  }
 0x180   :  { %v1863_v20 = vpop.f32.mrf.mxu0  ;;  %3340 = vmatpush1.bf16.msra.mxu0 %v5002_v1  ;;  %v5013_v1 = vld [vmem:[#allocation8 + $0x14] ss:$8 sps:$4 sm:$0xff]  }
 0x181   :  { %v1996_v22 = vpop.f32.mrf.mxu1  ;;  %v5505_v28 = vadd.f32 %v1994_v10, %v1862_v12  ;;  %v1864_v32 = vadd.f32 %v1863_v20, %v5407_v23  ;;  %3341 = vmatprep.subr.bf16.mxu0 %v5007_v6  ;;  %v5011_v20 = vld [vmem:[#allocation8 + $0x10] ss:$8 sps:$4 sm:$0xff]   ;;  %3473 = vmatpush1.bf16.msra.mxu1 %v5050_v60 }
 0x182   :  { %v1867_v34 = vpop.f32.mrf.mxu0  ;;  %2604 = vmatmul.mubr.bf16.gmra.mxu0 %v5152_v41  ;;  %v5155_v41 = vld [vmem:[#allocation2 + $0xb8] ss:$28 sps:$4 sm:$0xff]  }
 0x183   :  { %v2000_v37 = vpop.f32.mrf.mxu1  ;;  %4304 = vmatmul.mubr.msk.bf16.gmra.mxu1 %vm1722_vm0, %v5153_v42  ;;  %v5509_v43 = vadd.f32 %v1996_v22, %v1864_v32  ;;  %v1868_v47 = vadd.f32 %v1867_v34, %v5403_v21  ;;  %2613 = vmatprep.mubr.bf16.mxu0 %v5154_v48  ;;  %v5053_v32 = vld [vmem:[#allocation8 + $0x130] ss:$8 sps:$4 sm:$0xff]   ;;  %v5156_v42 = vld [vmem:[#allocation2 + $0xc0] ss:$28 sps:$4 sm:$0xff]  }
 0x184   :  { %2746 = vmatprep.mubr.bf16.mxu1 %v5317_v13  ;;  %v1869_v51 = vpop.f32.mrf.mxu0  ;;  %3342 = vmatpush1.bf16.msra.mxu0 %v5005_v26 }
 0x185   :  { %v2002_v54 = vpop.f32.mrf.mxu1  ;;  %v5513_v61 = vadd.f32 %v2000_v37, %v1868_v47  ;;  %v1870_v62 = vadd.f32 %v1869_v51, %v5407_v23  ;;  %3343 = vmatprep.subr.bf16.mxu0 %v5010_v33  ;;  %v5055_v33 = vld [vmem:[#allocation8 + $0x134] ss:$8 sps:$4 sm:$0xff]  }
 0x186   :  { %v1871_v3 = vpop.f32.mrf.mxu0  ;;  %3474 = vmatprep.subr.bf16.mxu1 %v5055_v33  ;;  %v5017_v33 = vld [vmem:[#allocation8 + $0xf0] ss:$8 sps:$4 sm:$0xff]  }
 0x187   :  { %v2004_v6 = vpop.f32.mrf.mxu1  ;;  %v5516_v9 = vadd.f32 %v2002_v54, %v1870_v62  ;;  %v1872_v10 = vadd.f32 %v1871_v3, %v5403_v21  ;;  %3475 = vmatpush1.bf16.msra.mxu1 %v5053_v32  ;;  %v5056_v3 = vld [vmem:[#allocation8 + $0x120] ss:$8 sps:$4 sm:$0xff]  }
 0x188   :  { %v1873_v12 = vpop.f32.mrf.mxu0  ;;  %3344 = vmatpush1.bf16.msra.mxu0 %v5008_v56  ;;  %v5014_v56 = vld [vmem:[#allocation8] ss:$8 sps:$4 sm:$0xff]  }
 0x189   :  { %v2006_v18 = vpop.f32.mrf.mxu1  ;;  %v5519_v22 = vadd.f32 %v2004_v6, %v1872_v10  ;;  %v1874_v26 = vadd.f32 %v1873_v12, %v5407_v23  ;;  %3345 = vmatprep.subr.bf16.mxu0 %v5013_v1  ;;  %v5019_v1 = vld [vmem:[#allocation8 + $0xf4] ss:$8 sps:$4 sm:$0xff]   ;;  %v5058_v6 = vld [vmem:[#allocation8 + $0x124] ss:$8 sps:$4 sm:$0xff]  }
 0x18a   :  { %v1877_v34 = vpop.f32.mrf.mxu0  ;;  %2614 = vmatmul.mubr.bf16.gmra.mxu0 %v5155_v41  ;;  %3476 = vmatprep.subr.bf16.mxu1 %v5058_v6 }
 0x18b   :  { %v2010_v37 = vpop.f32.mrf.mxu1  ;;  %4305 = vmatmul.mubr.msk.bf16.gmra.mxu1 %vm1722_vm0, %v5156_v42  ;;  %v5523_v47 = vadd.f32 %v2006_v18, %v1874_v26  ;;  %v1878_v48 = vadd.f32 %v1877_v34, %v5403_v21  ;;  %2623 = vmatprep.mubr.bf16.mxu0 %v5157_v49  ;;  %v5159_v49 = vld [vmem:[#allocation2 + $0xf8] ss:$28 sps:$4 sm:$0xff]  }
 0x18c   :  { %2756 = vmatprep.mubr.bf16.mxu1 %v5317_v13  ;;  %v1879_v51 = vpop.f32.mrf.mxu0  ;;  %3346 = vmatpush1.bf16.msra.mxu0 %v5011_v20 }
 0x18d   :  { %v2012_v54 = vpop.f32.mrf.mxu1  ;;  %v5527_v60 = vadd.f32 %v2010_v37, %v1878_v48  ;;  %v1880_v62 = vadd.f32 %v1879_v51, %v5407_v23  ;;  %3347 = vmatprep.subr.bf16.mxu0 %v5016_v27  ;;  %v5022_v27 = vld [vmem:[#allocation8 + $0xe4] ss:$8 sps:$4 sm:$0xff]   ;;  %3477 = vmatpush1.bf16.msra.mxu1 %v5056_v3  ;;  %v5158_v48 = vld [vmem:[#allocation2 + $0xf0] ss:$28 sps:$4 sm:$0xff]   ;;  %v5020_v3 = vld [vmem:[#allocation8 + $0xe0] ss:$8 sps:$4 sm:$0xff]  }
 0x18e   :  { %v1881_v10 = vpop.f32.mrf.mxu0 }
 0x18f   :  { %v2014_v12 = vpop.f32.mrf.mxu1  ;;  %v5530_v18 = vadd.f32 %v2012_v54, %v1880_v62  ;;  %v1882_v26 = vadd.f32 %v1881_v10, %v5403_v21  ;;  %v5160_v54 = vld [vmem:[#allocation2 + $0x12c] ss:$28 sps:$4 sm:$0xff]  }
 0x190   :  { %v1883_v34 = vpop.f32.mrf.mxu0  ;;  %3348 = vmatpush1.bf16.msra.mxu0 %v5014_v56  ;;  %v5059_v56 = vld [vmem:[#allocation8 + $0x110] ss:$8 sps:$4 sm:$0xff]   ;;  %v5025_v10 = vld [vmem:[#allocation8 + $0xd4] ss:$8 sps:$4 sm:$0xff]  }
 0x191   :  { %v2016_v20 = vpop.f32.mrf.mxu1  ;;  %v5533_v37 = vadd.f32 %v2014_v12, %v1882_v26  ;;  %v1884_v41 = vadd.f32 %v1883_v34, %v5407_v23  ;;  %3349 = vmatprep.subr.bf16.mxu0 %v5019_v1  ;;  %v5061_v23 = vld [vmem:[#allocation8 + $0x114] ss:$8 sps:$4 sm:$0xff]  }
 0x192   :  { %v2053_v32 = vpop.f32.mrf.mxu0  ;;  %2624 = vmatmul.mubr.bf16.gmra.mxu0 %v5158_v48  ;;  %3478 = vmatprep.subr.bf16.mxu1 %v5061_v23  ;;  %v5023_v48 = vld [vmem:[#allocation8 + $0xd0] ss:$8 sps:$4 sm:$0xff]  }
 0x193   :  { %v2186_v42 = vpop.f32.mrf.mxu1  ;;  %4306 = vmatmul.mubr.msk.bf16.gmra.mxu1 %vm1722_vm0, %v5159_v49  ;;  %v5537_v21 = vadd.f32 %v2016_v20, %v1884_v41  ;;  %v2054_v51 = vadd.f32 %v2053_v32, %v5410_v35  ;;  %2633 = vmatprep.mubr.bf16.mxu0 %v5160_v54  ;;  %v5064_v20 = vld [vmem:[#allocation8 + $0x104] ss:$8 sps:$4 sm:$0xff]   ;;  %v5062_v49 = vld [vmem:[#allocation8 + $0x100] ss:$8 sps:$4 sm:$0xff]  }
 0x194   :  { %2766 = vmatprep.mubr.bf16.mxu1 %v5317_v13  ;;  %v2055_v62 = vpop.f32.mrf.mxu0  ;;  %3350 = vmatpush2.bf16.msra.mxu0 %v5017_v33 }
 0x195   :  { %v2188_v1 = vpop.f32.mrf.mxu1  ;;  %v2056_v6 = vadd.f32 %v2055_v62, %v5413_v40  ;;  %3351 = vmatprep.subr.bf16.mxu0 %v5022_v27  ;;  %3479 = vmatpush1.bf16.msra.mxu1 %v5059_v56  ;;  %v2187_v34 = vadd.f32 %v2186_v42, %v2054_v51  ;;  %v5028_v40 = vld [vmem:[#allocation8 + $0xc4] ss:$8 sps:$4 sm:$0xff]   ;;  %v5161_v62 = vld [vmem:[#allocation2 + $0x128] ss:$28 sps:$4 sm:$0xff]   ;;  %v5162_v42 = vld [vmem:[#allocation2 + $0x130] ss:$28 sps:$4 sm:$0xff]  }
 0x196   :  { %v2057_v12 = vpop.f32.mrf.mxu0  ;;  %3480 = vmatprep.subr.bf16.mxu1 %v5064_v20 }
 0x197   :  { %v2190_v26 = vpop.f32.mrf.mxu1  ;;  %v2058_v35 = vadd.f32 %v2057_v12, %v5416_v45  ;;  %v2189_v54 = vadd.f32 %v2188_v1, %v2056_v6  ;;  %v2817_v45 = vmax.f32 %v2187_v34, 0.0  ;;  %v5163_v12 = vld [vmem:[#allocation2 + $0x164] ss:$28 sps:$4 sm:$0xff]   ;;  %v5026_v6 = vld [vmem:[#allocation8 + $0xc0] ss:$8 sps:$4 sm:$0xff]  }
 0x198   :  { %v2059_v41 = vpop.f32.mrf.mxu0  ;;  %3352 = vmatpush2.bf16.msra.mxu0 %v5020_v3 }
 0x199   :  { %v2192_v32 = vpop.f32.mrf.mxu1  ;;  %v2191_v33 = vadd.f32 %v2190_v26, %v2058_v35  ;;  %v2060_v16 = vadd.f32 %v2059_v41, %v5419_v52  ;;  %3353 = vmatprep.subr.bf16.mxu0 %v5025_v10  ;;  %v5031_v10 = vld [vmem:[#allocation8 + $0xb4] ss:$8 sps:$4 sm:$0xff]   ;;  %3481 = vmatpush1.bf16.msra.mxu1 %v5062_v49  ;;  %v2818_v26 = vmax.f32 %v2189_v54, 0.0  ;;  %v5029_v49 = vld [vmem:[#allocation8 + $0xb0] ss:$8 sps:$4 sm:$0xff]  }
 0x19a   :  { %v2063_v27 = vpop.f32.mrf.mxu0  ;;  %2634 = vmatmul.mubr.bf16.gmra.mxu0 %v5161_v62  ;;  %v5067_v41 = vld [vmem:[#allocation8 + $0x1f4] ss:$8 sps:$4 sm:$0xff]  }
 0x19b   :  { %v2196_v23 = vpop.f32.mrf.mxu1  ;;  %4307 = vmatmul.mubr.msk.bf16.gmra.mxu1 %vm1722_vm0, %v5162_v42  ;;  %v2821_v51 = vmax.f32 %v2191_v33, 0.0  ;;  %v2193_v56 = vadd.f32 %v2192_v32, %v2060_v16  ;;  %v2064_v3 = vadd.f32 %v2063_v27, %v5422_v59  ;;  %2643 = vmatprep.mubr.bf16.mxu0 %v5163_v12  ;;  %v5065_v16 = vld [vmem:[#allocation8 + $0x1f0] ss:$8 sps:$4 sm:$0xff]  }
 0x19c   :  { %2776 = vmatprep.mubr.bf16.mxu1 %v5317_v13  ;;  %v2065_v52 = vpop.f32.mrf.mxu0  ;;  %3354 = vmatpush2.bf16.msra.mxu0 %v5023_v48 }
 0x19d   :  { %v2198_v1 = vpop.f32.mrf.mxu1  ;;  %v5547_v35 = vpack.c.bf16 %v2821_v51, %v2817_v45  ;;  %v2822_v20 = vmax.f32 %v2193_v56, 0.0  ;;  %v2066_v34 = vadd.f32 %v2065_v52, %v5425_v0  ;;  %3355 = vmatprep.subr.bf16.mxu0 %v5028_v40  ;;  %v2197_v33 = vadd.f32 %v2196_v23, %v2064_v3  ;;  %3482 = vmatprep.subr.bf16.mxu1 %v5067_v41  ;;  %v5034_v40 = vld [vmem:[#allocation8 + $0xa4] ss:$8 sps:$4 sm:$0xff]   ;;  %v5068_v51 = vld [vmem:[#allocation8 + $0x1e0] ss:$8 sps:$4 sm:$0xff]  }
 0x19e   :  { %v2067_v59 = vpop.f32.mrf.mxu0  ;;  %3483 = vmatpush2.bf16.msra.mxu1 %v5065_v16  ;;  %v5070_v56 = vld [vmem:[#allocation8 + $0x1e4] ss:$8 sps:$4 sm:$0xff]  }
 0x19f   :  { %v2200_v32 = vpop.f32.mrf.mxu1  ;;  %v2068_v27 = vadd.f32 %v2067_v59, %v5428_v5  ;;  %v5551_v62 = vpack.c.bf16 %v2822_v20, %v2818_v26  ;;  %v2199_v54 = vadd.f32 %v2198_v1, %v2066_v34  ;;  %v5164_v3 = vld [vmem:[#allocation2 + $0x160] ss:$28 sps:$4 sm:$0xff]   ;;  %v5165_v5 = vld [vmem:[#allocation2 + $0x168] ss:$28 sps:$4 sm:$0xff]   ;;  %v2825_v52 = vmax.f32 %v2197_v33, 0.0  ;;  %3484 = vmatprep.subr.bf16.mxu1 %v5070_v56 }
 0x1a0   :  { %v2069_v48 = vpop.f32.mrf.mxu0  ;;  %3356 = vmatpush2.bf16.msra.mxu0 %v5026_v6  ;;  %v5166_v1 = vld [vmem:[#allocation2 + $0x19c] ss:$28 sps:$4 sm:$0xff]   ;;  %v5037_v33 = vld [vmem:[#allocation8 + $0x94] ss:$8 sps:$4 sm:$0xff]   ;;  %v5071_v56 = vld [vmem:[#allocation8 + $0x1d0] ss:$8 sps:$4 sm:$0xff]  }
 0x1a1   :  { %v2202_v42 = vpop.f32.mrf.mxu1  ;;  %v2201_v45 = vadd.f32 %v2200_v32, %v2068_v27  ;;  %v2070_v0 = vadd.f32 %v2069_v48, %v5431_v14  ;;  %3357 = vmatprep.subr.bf16.mxu0 %v5031_v10  ;;  %v5032_v34 = vld [vmem:[#allocation8 + $0xa0] ss:$8 sps:$4 sm:$0xff]   ;;  %v2826_v16 = vmax.f32 %v2199_v54, 0.0  ;;  %v5035_v54 = vld [vmem:[#allocation8 + $0x90] ss:$8 sps:$4 sm:$0xff]  }
 0x1a2   :  { %v2073_v12 = vpop.f32.mrf.mxu0  ;;  %2644 = vmatmul.mubr.bf16.gmra.mxu0 %v5164_v3  ;;  %3485 = vmatpush2.bf16.msra.mxu1 %v5068_v51 }
 0x1a3   :  { %v2206_v23 = vpop.f32.mrf.mxu1  ;;  %4308 = vmatmul.mubr.msk.bf16.gmra.mxu1 %vm1722_vm0, %v5165_v5  ;;  %v2829_v26 = vmax.f32 %v2201_v45, 0.0  ;;  %v2203_v6 = vadd.f32 %v2202_v42, %v2070_v0  ;;  %v2074_v20 = vadd.f32 %v2073_v12, %v5434_v25  ;;  %2653 = vmatprep.mubr.bf16.mxu0 %v5166_v1  ;;  %v5073_v0 = vld [vmem:[#allocation8 + $0x1d4] ss:$8 sps:$4 sm:$0xff]  }
 0x1a4   :  { %2786 = vmatprep.mubr.bf16.mxu1 %v5317_v13  ;;  %v2075_v14 = vpop.f32.mrf.mxu0  ;;  %3358 = vmatpush2.bf16.msra.mxu0 %v5029_v49 }
 0x1a5   :  { %v2208_v10 = vpop.f32.mrf.mxu1  ;;  %v5557_v41 = vpack.c.bf16 %v2829_v26, %v2825_v52  ;;  %v2830_v59 = vmax.f32 %v2203_v6, 0.0  ;;  %v2076_v32 = vadd.f32 %v2075_v14, %v5437_v30  ;;  %3359 = vmatprep.subr.bf16.mxu0 %v5034_v40  ;;  %v2207_v48 = vadd.f32 %v2206_v23, %v2074_v20  ;;  %v5040_v40 = vld [vmem:[#allocation8 + $0x84] ss:$8 sps:$4 sm:$0xff]   ;;  %3486 = vmatprep.subr.bf16.mxu1 %v5073_v0  ;;  %v5169_v14 = vld [vmem:[#allocation2 + $0x1d4] ss:$28 sps:$4 sm:$0xff]  }
 0x1a6   :  { %v2077_v27 = vpop.f32.mrf.mxu0  ;;  %v5167_v23 = vld [vmem:[#allocation2 + $0x198] ss:$28 sps:$4 sm:$0xff]   ;;  %3487 = vmatpush2.bf16.msra.mxu1 %v5071_v56  ;;  %v5079_v56 = vld [vmem:[#allocation8 + $0x1b4] ss:$8 sps:$4 sm:$0xff]  }
 0x1a7   :  { %v2210_v25 = vpop.f32.mrf.mxu1  ;;  %v2078_v42 = vadd.f32 %v2077_v27, %v5440_v36  ;;  %v5561_v45 = vpack.c.bf16 %v2830_v59, %v2826_v16  ;;  %v2209_v3 = vadd.f32 %v2208_v10, %v2076_v32  ;;  %v5168_v36 = vld [vmem:[#allocation2 + $0x1a0] ss:$28 sps:$4 sm:$0xff]   ;;  %v2833_v26 = vmax.f32 %v2207_v48, 0.0 }
 0x1a8   :  { %v2079_v49 = vpop.f32.mrf.mxu0  ;;  %3360 = vmatpush2.bf16.msra.mxu0 %v5032_v34  ;;  %v5038_v16 = vld [vmem:[#allocation8 + $0x80] ss:$8 sps:$4 sm:$0xff]  }
 0x1a9   :  { %v2212_v12 = vpop.f32.mrf.mxu1  ;;  %v2211_v5 = vadd.f32 %v2210_v25, %v2078_v42  ;;  %v2080_v30 = vadd.f32 %v2079_v49, %v5443_v44  ;;  %3361 = vmatprep.subr.bf16.mxu0 %v5037_v33  ;;  %v5076_v44 = vld [vmem:[#allocation8 + $0x1c4] ss:$8 sps:$4 sm:$0xff]   ;;  %v5074_v59 = vld [vmem:[#allocation8 + $0x1c0] ss:$8 sps:$4 sm:$0xff]   ;;  %v2834_v32 = vmax.f32 %v2209_v3, 0.0 }
 0x1aa   :  { %v2083_v51 = vpop.f32.mrf.mxu0  ;;  %2654 = vmatmul.mubr.bf16.gmra.mxu0 %v5167_v23  ;;  %3488 = vmatprep.subr.bf16.mxu1 %v5076_v44  ;;  %v5170_v23 = vld [vmem:[#allocation2 + $0x1d0] ss:$28 sps:$4 sm:$0xff]  }
 0x1ab   :  { %v2216_v52 = vpop.f32.mrf.mxu1  ;;  %4309 = vmatmul.mubr.msk.bf16.gmra.mxu1 %vm1722_vm0, %v5168_v36  ;;  %v2837_v6 = vmax.f32 %v2211_v5, 0.0  ;;  %v2213_v20 = vadd.f32 %v2212_v12, %v2080_v30  ;;  %v2084_v1 = vadd.f32 %v2083_v51, %v5446_v53  ;;  %2663 = vmatprep.mubr.bf16.mxu0 %v5169_v14  ;;  %v5077_v51 = vld [vmem:[#allocation8 + $0x1b0] ss:$8 sps:$4 sm:$0xff]   ;;  %v5171_v36 = vld [vmem:[#allocation2 + $0x1d8] ss:$28 sps:$4 sm:$0xff]  }
 0x1ac   :  { %2796 = vmatprep.mubr.bf16.mxu1 %v5317_v13  ;;  %v2085_v10 = vpop.f32.mrf.mxu0  ;;  %3362 = vmatpush2.bf16.msra.mxu0 %v5035_v54 }
 0x1ad   :  { %v2218_v34 = vpop.f32.mrf.mxu1  ;;  %v5567_v33 = vpack.c.bf16 %v2837_v6, %v2833_v26  ;;  %v2838_v27 = vmax.f32 %v2213_v20, 0.0  ;;  %v2086_v25 = vadd.f32 %v2085_v10, %v5449_v58  ;;  %3363 = vmatprep.subr.bf16.mxu0 %v5040_v40  ;;  %v2217_v42 = vadd.f32 %v2216_v52, %v2084_v1  ;;  %3489 = vmatpush2.bf16.msra.mxu1 %v5074_v59  ;;  %v5172_v20 = vld [vmem:[#allocation2 + $0x20c] ss:$28 sps:$4 sm:$0xff]   ;;  %v5080_v59 = vld [vmem:[#allocation8 + $0x1a0] ss:$8 sps:$4 sm:$0xff]  }
 0x1ae   :  { %v2087_v53 = vpop.f32.mrf.mxu0  ;;  %3490 = vmatprep.subr.bf16.mxu1 %v5079_v56  ;;  %v5083_v56 = vld [vmem:[#allocation8 + $0x190] ss:$8 sps:$4 sm:$0xff]  }
 0x1af   :  { %v2220_v48 = vpop.f32.mrf.mxu1  ;;  %v2088_v0 = vadd.f32 %v2087_v53, %v5452_v63  ;;  %v5571_v49 = vpack.c.bf16 %v2838_v27, %v2834_v32  ;;  %v2219_v3 = vadd.f32 %v2218_v34, %v2086_v25  ;;  %v2841_v63 = vmax.f32 %v2217_v42, 0.0  ;;  %v5085_v42 = vld [vmem:[#allocation8 + $0x194] ss:$8 sps:$4 sm:$0xff]  }
 0x1b0   :  { %v2089_v12 = vpop.f32.mrf.mxu0  ;;  %3364 = vmatpush2.bf16.msra.mxu0 %v5038_v16 }
 0x1b1   :  { %v2222_v54 = vpop.f32.mrf.mxu1  ;;  %v2221_v5 = vadd.f32 %v2220_v48, %v2088_v0  ;;  %v2090_v30 = vadd.f32 %v2089_v12, %v5455_v7  ;;  %v5082_v7 = vld [vmem:[#allocation8 + $0x1a4] ss:$8 sps:$4 sm:$0xff]   ;;  %v2842_v44 = vmax.f32 %v2219_v3, 0.0  ;;  %3491 = vmatpush2.bf16.msra.mxu1 %v5077_v51 }
 0x1b2   :  { %v2093_v58 = vpop.f32.mrf.mxu0  ;;  %2664 = vmatmul.mubr.bf16.gmra.mxu0 %v5170_v23  ;;  %3492 = vmatprep.subr.bf16.mxu1 %v5082_v7 }
 0x1b3   :  { %v2226_v40 = vpop.f32.mrf.mxu1  ;;  %4310 = vmatmul.mubr.msk.bf16.gmra.mxu1 %vm1722_vm0, %v5171_v36  ;;  %v2845_v52 = vmax.f32 %v2221_v5, 0.0  ;;  %v2223_v26 = vadd.f32 %v2222_v54, %v2090_v30  ;;  %v2094_v6 = vadd.f32 %v2093_v58, %v5458_v17  ;;  %2673 = vmatprep.mubr.bf16.mxu0 %v5172_v20  ;;  %v5173_v5 = vld [vmem:[#allocation2 + $0x208] ss:$28 sps:$4 sm:$0xff]   ;;  %v5174_v30 = vld [vmem:[#allocation2 + $0x210] ss:$28 sps:$4 sm:$0xff]  }
 0x1b4   :  { %2806 = vmatprep.mubr.bf16.mxu1 %v5317_v13  ;;  %v2095_v1 = vpop.f32.mrf.mxu0  ;;  %v5086_v20 = vld [vmem:[#allocation8 + $0x180] ss:$8 sps:$4 sm:$0xff]  }
 0x1b5   :  { %v2228_v14 = vpop.f32.mrf.mxu1  ;;  %v5577_v10 = vpack.c.bf16 %v2845_v52, %v2841_v63  ;;  %v2846_v34 = vmax.f32 %v2223_v26, 0.0  ;;  %v2096_v16 = vadd.f32 %v2095_v1, %v5461_v24  ;;  %v2227_v17 = vadd.f32 %v2226_v40, %v2094_v6  ;;  %3493 = vmatpush2.bf16.msra.mxu1 %v5080_v59 }
 0x1b6   :  { %v2097_v32 = vpop.f32.mrf.mxu0  ;;  %3494 = vmatprep.subr.bf16.mxu1 %v5085_v42 }
 0x1b7   :  { %v2230_v27 = vpop.f32.mrf.mxu1  ;;  %v2098_v25 = vadd.f32 %v2097_v32, %v5464_v29  ;;  %v5581_v53 = vpack.c.bf16 %v2846_v34, %v2842_v44  ;;  %v2229_v0 = vadd.f32 %v2228_v14, %v2096_v16  ;;  %v2849_v51 = vmax.f32 %v2227_v17, 0.0 }
 0x1b8   :  { %v2099_v13 = vpop.f32.mrf.mxu0 }
 0x1b9   :  { %v2232_v48 = vpop.f32.mrf.mxu1  ;;  %v2231_v12 = vadd.f32 %v2230_v27, %v2098_v25  ;;  %v2100_v54 = vadd.f32 %v2099_v13, %v5467_v38  ;;  %v5088_v38 = vld [vmem:[#allocation8 + $0x184] ss:$8 sps:$4 sm:$0xff]   ;;  %v2850_v63 = vmax.f32 %v2229_v0, 0.0  ;;  %3495 = vmatpush2.bf16.msra.mxu1 %v5083_v56 }
 0x1ba   :  { %v2103_v24 = vpop.f32.mrf.mxu0  ;;  %2674 = vmatmul.mubr.bf16.gmra.mxu0 %v5173_v5  ;;  %3496 = vmatprep.subr.bf16.mxu1 %v5088_v38 }
 0x1bb   :  { %v2236_v3 = vpop.f32.mrf.mxu1  ;;  %4311 = vmatmul.mubr.msk.bf16.gmra.mxu1 %vm1722_vm0, %v5174_v30  ;;  %v2853_v29 = vmax.f32 %v2231_v12, 0.0  ;;  %v2233_v58 = vadd.f32 %v2232_v48, %v2100_v54  ;;  %v2104_v40 = vadd.f32 %v2103_v24, %v5471_v46  ;;  %3365 = vmatprep.mubr.bf16.mxu0 %v5551_v62 }
 0x1bc   :  { %v2105_v23 = vpop.f32.mrf.mxu0 }
 0x1bd   :  { %v2238_v36 = vpop.f32.mrf.mxu1  ;;  %v5587_v52 = vpack.c.bf16 %v2853_v29, %v2849_v51  ;;  %v2854_v26 = vmax.f32 %v2233_v58, 0.0  ;;  %v2106_v6 = vadd.f32 %v2105_v23, %v5474_v50  ;;  %v2237_v7 = vadd.f32 %v2236_v3, %v2104_v40  ;;  %3497 = vmatpush2.bf16.msra.mxu1 %v5086_v20 }
 0x1be   :  { %v2107_v1 = vpop.f32.mrf.mxu0 }
 0x1bf   :  { %v2240_v14 = vpop.f32.mrf.mxu1  ;;  %v2108_v46 = vadd.f32 %v2107_v1, %v5477_v57  ;;  %v5591_v44 = vpack.c.bf16 %v2854_v26, %v2850_v63  ;;  %v2239_v16 = vadd.f32 %v2238_v36, %v2106_v6  ;;  %v2857_v50 = vmax.f32 %v2237_v7, 0.0 }
 0x1c0   :  { %v2109_v62 = vpop.f32.mrf.mxu0 }
 0x1c1   :  { %v2242_v34 = vpop.f32.mrf.mxu1  ;;  %v2241_v59 = vadd.f32 %v2240_v14, %v2108_v46  ;;  %v2110_v32 = vadd.f32 %v2109_v62, %v5481_v4  ;;  %v2858_v0 = vmax.f32 %v2239_v16, 0.0 }
 0x1c2   :  { %v2113_v27 = vpop.f32.mrf.mxu0  ;;  %3366 = vmatmul.mubr.bf16.vlgmr.msra.gmra.mxu0 %v5547_v35 }
 0x1c3   :  { %v2246_v17 = vpop.f32.mrf.mxu1  ;;  %v2861_v25 = vmax.f32 %v2241_v59, 0.0  ;;  %v2243_v13 = vadd.f32 %v2242_v34, %v2110_v32  ;;  %v2114_v48 = vadd.f32 %v2113_v27, %v5485_v15  ;;  %3375 = vmatprep.mubr.bf16.mxu0 %v5561_v45 }
 0x1c4   :  { %v2115_v57 = vpop.f32.mrf.mxu0 }
 0x1c5   :  { %v2248_v42 = vpop.f32.mrf.mxu1  ;;  %v5597_v12 = vpack.c.bf16 %v2861_v25, %v2857_v50  ;;  %v2862_v54 = vmax.f32 %v2243_v13, 0.0  ;;  %v2116_v4 = vadd.f32 %v2115_v57, %v5488_v31  ;;  %v2247_v3 = vadd.f32 %v2246_v17, %v2114_v48 }
 0x1c6   :  { %v2117_v56 = vpop.f32.mrf.mxu0 }
 0x1c7   :  { %v2250_v24 = vpop.f32.mrf.mxu1  ;;  %v2118_v35 = vadd.f32 %v2117_v56, %v5491_v39  ;;  %v5601_v5 = vpack.c.bf16 %v2862_v54, %v2858_v0  ;;  %v2249_v15 = vadd.f32 %v2248_v42, %v2116_v4  ;;  %v2865_v23 = vmax.f32 %v2247_v3, 0.0 }
 0x1c8   :  { %v2119_v30 = vpop.f32.mrf.mxu0 }
 0x1c9   :  { %v2252_v51 = vpop.f32.mrf.mxu1  ;;  %v2251_v29 = vadd.f32 %v2250_v24, %v2118_v35  ;;  %v2120_v45 = vadd.f32 %v2119_v30, %v5495_v55  ;;  %v2866_v26 = vmax.f32 %v2249_v15, 0.0  ;;  %v382_v35 = vsub.s32 2, %v5397_v8 }
 0x1ca   :  { %v2123_v58 = vpop.f32.mrf.mxu0  ;;  %3376 = vmatmul.mubr.bf16.gmra.mxu0 %v5557_v41 }
 0x1cb   :  { %v2256_v40 = vpop.f32.mrf.mxu1  ;;  %v2869_v36 = vmax.f32 %v2251_v29, 0.0  ;;  %v2253_v31 = vadd.f32 %v2252_v51, %v2120_v45  ;;  %v2124_v38 = vadd.f32 %v2123_v58, %v5499_v2  ;;  %3385 = vmatprep.mubr.bf16.mxu0 %v5571_v49 }
 0x1cc   :  { %v2125_v39 = vpop.f32.mrf.mxu0 }
 0x1cd   :  { %v2258_v63 = vpop.f32.mrf.mxu1  ;;  %v5607_v6 = vpack.c.bf16 %v2869_v36, %v2865_v23  ;;  %v2870_v20 = vmax.f32 %v2253_v31, 0.0  ;;  %v2126_v1 = vadd.f32 %v2125_v39, %v5502_v11  ;;  %v2257_v7 = vadd.f32 %v2256_v40, %v2124_v38 }
 0x1ce   :  { %v2127_v55 = vpop.f32.mrf.mxu0  ;;  %v386_v40 = vsub.s32 3, %v5397_v8 }
 0x1cf   :  { %v2260_v14 = vpop.f32.mrf.mxu1  ;;  %v2128_v41 = vadd.f32 %v2127_v55, %v5505_v28  ;;  %v5611_v46 = vpack.c.bf16 %v2870_v20, %v2866_v26  ;;  %v2259_v2 = vadd.f32 %v2258_v63, %v2126_v1  ;;  %v2873_v27 = vmax.f32 %v2257_v7, 0.0  ;;  %v5175_v26 = vld [vmem:[#allocation7] sm:$0xf] }
 0x1d0   :  { %v2129_v62 = vpop.f32.mrf.mxu0  ;;  %v5633_v20 = vrot.slane %v5175_v26, %v382_v35 }
 0x1d1   :  { %v2262_v34 = vpop.f32.mrf.mxu1  ;;  %v2261_v16 = vadd.f32 %v2260_v14, %v2128_v41  ;;  %v2130_v49 = vadd.f32 %v2129_v62, %v5509_v43  ;;  %v2874_v13 = vmax.f32 %v2259_v2, 0.0  ;;  %v5638_v41 = vrot.slane %v5175_v26, %v386_v40 }
 0x1d2   :  { %v2133_v59 = vpop.f32.mrf.mxu0  ;;  %3386 = vmatmul.mubr.bf16.gmra.mxu0 %v5567_v33 }
 0x1d3   :  { %v2266_v32 = vpop.f32.mrf.mxu1  ;;  %v2877_v17 = vmax.f32 %v2261_v16, 0.0  ;;  %v2263_v11 = vadd.f32 %v2262_v34, %v2130_v49  ;;  %v2134_v50 = vadd.f32 %v2133_v59, %v5513_v61  ;;  %3395 = vmatprep.mubr.bf16.mxu0 %v5581_v53 }
 0x1d4   :  { %v2135_v28 = vpop.f32.mrf.mxu0 }
 0x1d5   :  { %v2268_v25 = vpop.f32.mrf.mxu1  ;;  %v5617_v48 = vpack.c.bf16 %v2877_v17, %v2873_v27  ;;  %v2878_v57 = vmax.f32 %v2263_v11, 0.0  ;;  %v2136_v42 = vadd.f32 %v2135_v28, %v5516_v9  ;;  %v2267_v54 = vadd.f32 %v2266_v32, %v2134_v50 }
 0x1d6   :  { %v2137_v43 = vpop.f32.mrf.mxu0 }
 0x1d7   :  { %v2270_v0 = vpop.f32.mrf.mxu1  ;;  %v2138_v33 = vadd.f32 %v2137_v43, %v5519_v22  ;;  %v5621_v4 = vpack.c.bf16 %v2878_v57, %v2874_v13  ;;  %v2269_v61 = vadd.f32 %v2268_v25, %v2136_v42  ;;  %v2881_v9 = vmax.f32 %v2267_v54, 0.0 }
 0x1d8   :  { %v2139_v56 = vpop.f32.mrf.mxu0 }
 0x1d9   :  { %v2272_v24 = vpop.f32.mrf.mxu1  ;;  %v2271_v3 = vadd.f32 %v2270_v0, %v2138_v33  ;;  %v2140_v53 = vadd.f32 %v2139_v56, %v5523_v47  ;;  %v2882_v23 = vmax.f32 %v2269_v61, 0.0 }
 0x1da   :  { %v2143_v30 = vpop.f32.mrf.mxu0  ;;  %3396 = vmatmul.mubr.bf16.gmra.mxu0 %v5577_v10 }
 0x1db   :  { %v2276_v51 = vpop.f32.mrf.mxu1  ;;  %v2885_v15 = vmax.f32 %v2271_v3, 0.0  ;;  %v2273_v29 = vadd.f32 %v2272_v24, %v2140_v53  ;;  %v2144_v45 = vadd.f32 %v2143_v30, %v5527_v60  ;;  %3405 = vmatprep.mubr.bf16.mxu0 %v5591_v44 }
 0x1dc   :  { %v2145_v22 = vpop.f32.mrf.mxu0 }
 0x1dd   :  { %v2278_v58 = vpop.f32.mrf.mxu1  ;;  %v5629_v36 = vpack.c.bf16 %v2885_v15, %v2881_v9  ;;  %v2886_v47 = vmax.f32 %v2273_v29, 0.0  ;;  %v2146_v31 = vadd.f32 %v2145_v22, %v5530_v18  ;;  %v2277_v10 = vadd.f32 %v2276_v51, %v2144_v45 }
 0x1de   :  { %v2147_v38 = vpop.f32.mrf.mxu0 }
 0x1df   :  { %v2280_v39 = vpop.f32.mrf.mxu1  ;;  %v2148_v63 = vadd.f32 %v2147_v38, %v5533_v37  ;;  %v5635_v60 = vpack.c.bf16 %v2886_v47, %v2882_v23  ;;  %v2279_v44 = vadd.f32 %v2278_v58, %v2146_v31  ;;  %v2889_v34 = vmax.f32 %v2277_v10, 0.0 }
 0x1e0   :  { %v2149_v1 = vpop.f32.mrf.mxu0 }
 0x1e1   :  { %v2282_v55 = vpop.f32.mrf.mxu1  ;;  %v2281_v14 = vadd.f32 %v2280_v39, %v2148_v63  ;;  %v2150_v7 = vadd.f32 %v2149_v1, %v5537_v21  ;;  %v2890_v49 = vmax.f32 %v2279_v44, 0.0 }
 0x1e2   :  { %v2319_v62 = vpop.f32.mrf.mxu0  ;;  %3406 = vmatmul.mubr.bf16.gmra.mxu0 %v5587_v52 }
 0x1e3   :  { %v2452_v18 = vpop.f32.mrf.mxu1  ;;  %v2893_v2 = vmax.f32 %v2281_v14, 0.0  ;;  %v2283_v37 = vadd.f32 %v2282_v55, %v2150_v7  ;;  %v2320_v16 = vadd.f32 %v2319_v62, %v5633_v20  ;;  %3415 = vmatprep.mubr.bf16.mxu0 %v5601_v5 }
 0x1e4   :  { %v2321_v59 = vpop.f32.mrf.mxu0 }
 0x1e5   :  { %v2454_v32 = vpop.f32.mrf.mxu1  ;;  %v5643_v27 = vpack.c.bf16 %v2893_v2, %v2889_v34  ;;  %v2894_v17 = vmax.f32 %v2283_v37, 0.0  ;;  %v5645_v21 = vadd.f32 %v2452_v18, %v2320_v16  ;;  %v2322_v11 = vadd.f32 %v2321_v59, %v5638_v41 }
 0x1e6   :  { %v2323_v50 = vpop.f32.mrf.mxu0 }
 0x1e7   :  { %v2456_v28 = vpop.f32.mrf.mxu1  ;;  %v5648_v52 = vadd.f32 %v2454_v32, %v2322_v11  ;;  %v2324_v25 = vadd.f32 %v2323_v50, %v5633_v20  ;;  %v2934_v13 = vpack.c.bf16 %v2894_v17, %v2890_v49 }
 0x1e8   :  { %v5651_v57 = vpop.f32.mrf.mxu0 }
 0x1e9   :  { %v5653_v5 = vpop.f32.mrf.mxu1  ;;  %v5655_v42 = vadd.f32 %v2456_v28, %v2324_v25 }
 0x1ea   :  { %v2329_v43 = vpop.f32.mrf.mxu0  ;;  %3416 = vmatmul.mubr.bf16.gmra.mxu0 %v5597_v12 }
 0x1eb   :  { %v2462_v0 = vpop.f32.mrf.mxu1  ;;  %v2330_v54 = vadd.f32 %v2329_v43, %v5633_v20  ;;  %3425 = vmatprep.mubr.bf16.mxu0 %v5611_v46 }
 0x1ec   :  { %v2331_v33 = vpop.f32.mrf.mxu0 }
 0x1ed   :  { %v2464_v56 = vpop.f32.mrf.mxu1  ;;  %v5660_v24 = vadd.f32 %v2462_v0, %v2330_v54  ;;  %v2332_v61 = vadd.f32 %v2331_v33, %v5638_v41 }
 0x1ee   :  { %v2333_v3 = vpop.f32.mrf.mxu0 }
 0x1ef   :  { %v2466_v53 = vpop.f32.mrf.mxu1  ;;  %v5663_v35 = vadd.f32 %v2464_v56, %v2332_v61  ;;  %v2334_v30 = vadd.f32 %v2333_v3, %v5633_v20 }
 0x1f0   :  { %v5666_v51 = vpop.f32.mrf.mxu0 }
 0x1f1   :  { %v5668_v9 = vpop.f32.mrf.mxu1  ;;  %v5670_v12 = vadd.f32 %v2466_v53, %v2334_v30 }
 0x1f2   :  { %v2339_v15 = vpop.f32.mrf.mxu0  ;;  %3426 = vmatmul.mubr.bf16.gmra.mxu0 %v5607_v6 }
 0x1f3   :  { %v2472_v46 = vpop.f32.mrf.mxu1  ;;  %v2340_v29 = vadd.f32 %v2339_v15, %v5633_v20  ;;  %3435 = vmatprep.mubr.bf16.mxu0 %v5621_v4 }
 0x1f4   :  { %v2341_v45 = vpop.f32.mrf.mxu0 }
 0x1f5   :  { %v2474_v22 = vpop.f32.mrf.mxu1  ;;  %v5675_v58 = vadd.f32 %v2472_v46, %v2340_v29  ;;  %v2342_v40 = vadd.f32 %v2341_v45, %v5638_v41 }
 0x1f6   :  { %v2343_v23 = vpop.f32.mrf.mxu0 }
 0x1f7   :  { %v2476_v47 = vpop.f32.mrf.mxu1  ;;  %v5678_v31 = vadd.f32 %v2474_v22, %v2342_v40  ;;  %v2344_v38 = vadd.f32 %v2343_v23, %v5633_v20 }
 0x1f8   :  { %v5681_v39 = vpop.f32.mrf.mxu0 }
 0x1f9   :  { %v5683_v10 = vpop.f32.mrf.mxu1  ;;  %v5685_v6 = vadd.f32 %v2476_v47, %v2344_v38 }
 0x1fa   :  { %v2349_v63 = vpop.f32.mrf.mxu0  ;;  %3436 = vmatmul.mubr.bf16.gmra.mxu0 %v5617_v48 }
 0x1fb   :  { %v2482_v4 = vpop.f32.mrf.mxu1  ;;  %v2350_v26 = vadd.f32 %v2349_v63, %v5633_v20  ;;  %3445 = vmatprep.mubr.bf16.mxu0 %v5635_v60 }
 0x1fc   :  { %v2351_v44 = vpop.f32.mrf.mxu0 }
 0x1fd   :  { %v2484_v1 = vpop.f32.mrf.mxu1  ;;  %v5690_v55 = vadd.f32 %v2482_v4, %v2350_v26  ;;  %v2352_v14 = vadd.f32 %v2351_v44, %v5638_v41 }
 0x1fe   :  { %v2353_v7 = vpop.f32.mrf.mxu0 }
 0x1ff   :  { %v2486_v62 = vpop.f32.mrf.mxu1  ;;  %v5693_v18 = vadd.f32 %v2484_v1, %v2352_v14  ;;  %v2354_v34 = vadd.f32 %v2353_v7, %v5633_v20 }
 0x200   :  { %v5696_v2 = vpop.f32.mrf.mxu0 }
 0x201   :  { %v5698_v37 = vpop.f32.mrf.mxu1  ;;  %v5700_v48 = vadd.f32 %v2486_v62, %v2354_v34 }
 0x202   :  { %v2359_v16 = vpop.f32.mrf.mxu0  ;;  %3446 = vmatmul.mubr.bf16.gmra.mxu0 %v5629_v36 }
 0x203   :  { %v2492_v60 = vpop.f32.mrf.mxu1  ;;  %v2360_v49 = vadd.f32 %v2359_v16, %v5633_v20  ;;  %3455 = vmatprep.mubr.bf16.mxu0 %v2934_v13 }
 0x204   :  { %v2361_v59 = vpop.f32.mrf.mxu0 }
 0x205   :  { %v2494_v32 = vpop.f32.mrf.mxu1  ;;  %v5704_v17 = vadd.f32 %v2492_v60, %v2360_v49  ;;  %v2362_v11 = vadd.f32 %v2361_v59, %v5638_v41 }
 0x206   :  { %v2363_v50 = vpop.f32.mrf.mxu0 }
 0x207   :  { %v2496_v28 = vpop.f32.mrf.mxu1  ;;  %v5707_v25 = vadd.f32 %v2494_v32, %v2362_v11  ;;  %v2364_v43 = vadd.f32 %v2363_v50, %v5633_v20 }
 0x208   :  { %v5710_v0 = vpop.f32.mrf.mxu0 }
 0x209   :  { %v5712_v54 = vpop.f32.mrf.mxu1  ;;  %v5714_v36 = vadd.f32 %v2496_v28, %v2364_v43 }
 0x20a   :  { %v2369_v33 = vpop.f32.mrf.mxu0  ;;  %3456 = vmatmul.mubr.bf16.gmra.mxu0 %v5643_v27 }
 0x20b   :  { %v2502_v13 = vpop.f32.mrf.mxu1  ;;  %v2370_v56 = vadd.f32 %v2369_v33, %v5633_v20 }
 0x20c   :  { %v2371_v61 = vpop.f32.mrf.mxu0 }
 0x20d   :  { %v2504_v3 = vpop.f32.mrf.mxu1  ;;  %v5718_v53 = vadd.f32 %v2502_v13, %v2370_v56  ;;  %v2372_v30 = vadd.f32 %v2371_v61, %v5638_v41 }
 0x20e   :  { %v2373_v15 = vpop.f32.mrf.mxu0 }
 0x20f   :  { %v2506_v46 = vpop.f32.mrf.mxu1  ;;  %v5721_v29 = vadd.f32 %v2504_v3, %v2372_v30  ;;  %v2374_v45 = vadd.f32 %v2373_v15, %v5633_v20 }
 0x210   :  { %v5724_v22 = vpop.f32.mrf.mxu0 }
 0x211   :  { %v5726_v40 = vpop.f32.mrf.mxu1  ;;  %v5728_v23 = vadd.f32 %v2506_v46, %v2374_v45 }
 0x212   :  { %v2379_v27 = vpop.f32.mrf.mxu0 }
 0x213   :  { %v2512_v47 = vpop.f32.mrf.mxu1  ;;  %v2380_v38 = vadd.f32 %v2379_v27, %v5633_v20 }
 0x214   :  { %v2381_v63 = vpop.f32.mrf.mxu0 }
 0x215   :  { %v2514_v4 = vpop.f32.mrf.mxu1  ;;  %v5731_v26 = vadd.f32 %v2512_v47, %v2380_v38  ;;  %v2382_v44 = vadd.f32 %v2381_v63, %v5638_v41 }
 0x216   :  { %v2383_v1 = vpop.f32.mrf.mxu0 }
 0x217   :  { %v2516_v14 = vpop.f32.mrf.mxu1  ;;  %v5734_v7 = vadd.f32 %v2514_v4, %v2382_v44  ;;  %v2384_v62 = vadd.f32 %v2383_v1, %v5633_v20 }
 0x218   :  { %v5737_v34 = vpop.f32.mrf.mxu0 }
 0x219   :  { %v5739_v16 = vpop.f32.mrf.mxu1  ;;  %v5741_v60 = vadd.f32 %v2516_v14, %v2384_v62 }
 0x21a   :  { %v2389_v49 = vpop.f32.mrf.mxu0 }
 0x21b   :  { %v2522_v59 = vpop.f32.mrf.mxu1  ;;  %v2390_v32 = vadd.f32 %v2389_v49, %v5633_v20 }
 0x21c   :  { %v2391_v11 = vpop.f32.mrf.mxu0 }
 0x21d   :  { %v2524_v50 = vpop.f32.mrf.mxu1  ;;  %v5744_v28 = vadd.f32 %v2522_v59, %v2390_v32  ;;  %v2392_v43 = vadd.f32 %v2391_v11, %v5638_v41 }
 0x21e   :  { %v2393_v33 = vpop.f32.mrf.mxu0 }
 0x21f   :  { %v2526_v13 = vpop.f32.mrf.mxu1  ;;  %v5747_v56 = vadd.f32 %v2524_v50, %v2392_v43  ;;  %v2394_v61 = vadd.f32 %v2393_v33, %v5633_v20 }
 0x220   :  { %v2395_v3 = vpop.f32.mrf.mxu0 }
 0x221   :  { %v2528_v30 = vpop.f32.mrf.mxu1  ;;  %v5750_v15 = vadd.f32 %v2526_v13, %v2394_v61  ;;  %v2396_v46 = vadd.f32 %v2395_v3, %v5638_v41 }
 0x222   :  { %v2399_v45 = vpop.f32.mrf.mxu0 }
 0x223   :  { %v2532_v27 = vpop.f32.mrf.mxu1  ;;  %v5753_v47 = vadd.f32 %v2528_v30, %v2396_v46  ;;  %v2400_v38 = vadd.f32 %v2399_v45, %v5633_v20 }
 0x224   :  { %v2401_v63 = vpop.f32.mrf.mxu0 }
 0x225   :  { %v2534_v4 = vpop.f32.mrf.mxu1  ;;  %v5756_v44 = vadd.f32 %v2532_v27, %v2400_v38  ;;  %v2402_v1 = vadd.f32 %v2401_v63, %v5638_v41 }
 0x226   :  { %v2403_v14 = vpop.f32.mrf.mxu0 }
 0x227   :  { %v2536_v62 = vpop.f32.mrf.mxu1  ;;  %v5759_v49 = vadd.f32 %v2534_v4, %v2402_v1  ;;  %v2404_v59 = vadd.f32 %v2403_v14, %v5633_v20 }
 0x228   :  { %v2405_v32 = vpop.f32.mrf.mxu0 }
 0x229   :  { %v2538_v11 = vpop.f32.mrf.mxu1  ;;  %v5762_v50 = vadd.f32 %v2536_v62, %v2404_v59  ;;  %v2406_v43 = vadd.f32 %v2405_v32, %v5638_v41 }
 0x22a   :  { %v2409_v33 = vpop.f32.mrf.mxu0 }
 0x22b   :  { %v2542_v13 = vpop.f32.mrf.mxu1  ;;  %v5765_v61 = vadd.f32 %v2538_v11, %v2406_v43  ;;  %v2410_v3 = vadd.f32 %v2409_v33, %v5633_v20  ;;  %v2326_v33 = vadd.f32 %v5651_v57, %v5638_v41 }
 0x22c   :  { %v2411_v30 = vpop.f32.mrf.mxu0 }
 0x22d   :  { %v2544_v46 = vpop.f32.mrf.mxu1  ;;  %v5768_v45 = vadd.f32 %v2542_v13, %v2410_v3  ;;  %v2412_v27 = vadd.f32 %v2411_v30, %v5638_v41 }
 0x22e   :  { %v2413_v38 = vpop.f32.mrf.mxu0 }
 0x22f   :  { %5982 = vst [vmem:[#allocation17_spill] sm:$0xff] %v5768_v45  ;;  %v2546_v63 = vpop.f32.mrf.mxu1  ;;  %v5771_v4 = vadd.f32 %v2544_v46, %v2412_v27  ;;  %v2414_v1 = vadd.f32 %v2413_v38, %v5633_v20 }
 0x230   :  { %v2415_v14 = vpop.f32.mrf.mxu0 }
 0x231   :  { %5983 = vst [vmem:[#allocation18_spill] sm:$0xff] %v5771_v4  ;;  %v2548_v62 = vpop.f32.mrf.mxu1  ;;  %v5774_v59 = vadd.f32 %v2546_v63, %v2414_v1  ;;  %v2416_v32 = vadd.f32 %v2415_v14, %v5638_v41  ;;  %v2459_v63 = vadd.f32 %v5653_v5, %v2326_v33 }
 0x232   :  { %v2585_v11 = vpop.f32.mrf.mxu0 }
 0x233   :  { %5984 = vst [vmem:[#allocation19_spill] sm:$0xff] %v5774_v59  ;;  %v2718_v43 = vpop.f32.mrf.mxu1  ;;  %v5779_v13 = vadd.f32 %v2548_v62, %v2416_v32  ;;  %v2586_v3 = vadd.f32 %v2585_v11, %v5645_v21  ;;  %v2336_v62 = vadd.f32 %v5666_v51, %v5638_v41 }
 0x234   :  { %v2587_v30 = vpop.f32.mrf.mxu0 }
 0x235   :  { %5985 = vst [vmem:[#allocation20_spill] sm:$0xff] %v5779_v13  ;;  %v2720_v46 = vpop.f32.mrf.mxu1  ;;  %v2588_v27 = vadd.f32 %v2587_v30, %v5648_v52  ;;  %v2719_v1 = vadd.f32 %v2718_v43, %v2586_v3 }
 0x236   :  { %v2589_v20 = vpop.f32.mrf.mxu0 }
 0x237   :  { %v2722_v38 = vpop.f32.mrf.mxu1  ;;  %v2590_v14 = vadd.f32 %v2589_v20, %v5655_v42  ;;  %v2721_v59 = vadd.f32 %v2720_v46, %v2588_v27  ;;  %v2819_v11 = vmax.f32 %v2719_v1, 0.0 }
 0x238   :  { %v2591_v19 = vpop.f32.mrf.mxu0 }
 0x239   :  { %v2724_v8 = vpop.f32.mrf.mxu1  ;;  %v2723_v4 = vadd.f32 %v2722_v38, %v2590_v14  ;;  %v2592_v57 = vadd.f32 %v2591_v19, %v2459_v63  ;;  %v2820_v43 = vmax.f32 %v2721_v59, 0.0  ;;  %v2469_v19 = vadd.f32 %v5668_v9, %v2336_v62 }
 0x23a   :  { %v2595_v21 = vpop.f32.mrf.mxu0  ;;  %v2346_v59 = vadd.f32 %v5681_v39, %v5638_v41 }
 0x23b   :  { %v2728_v32 = vpop.f32.mrf.mxu1  ;;  %v2823_v13 = vmax.f32 %v2723_v4, 0.0  ;;  %v2725_v52 = vadd.f32 %v2724_v8, %v2592_v57  ;;  %v2596_v30 = vadd.f32 %v2595_v21, %v5660_v24 }
 0x23c   :  { %v2597_v45 = vpop.f32.mrf.mxu0 }
 0x23d   :  { %v2730_v5 = vpop.f32.mrf.mxu1  ;;  %v2899_v33 = vpack.c.bf16 %v2823_v13, %v2819_v11  ;;  %v2824_v42 = vmax.f32 %v2725_v52, 0.0  ;;  %v2598_v3 = vadd.f32 %v2597_v45, %v5663_v35  ;;  %v2729_v51 = vadd.f32 %v2728_v32, %v2596_v30 }
 0x23e   :  { %v2599_v46 = vpop.f32.mrf.mxu0 }
 0x23f   :  { %v2732_v27 = vpop.f32.mrf.mxu1  ;;  %v2900_v20 = vpack.c.bf16 %v2824_v42, %v2820_v43  ;;  %v2600_v38 = vadd.f32 %v2599_v46, %v5670_v12  ;;  %v2731_v8 = vadd.f32 %v2730_v5, %v2598_v3  ;;  %v2827_v35 = vmax.f32 %v2729_v51, 0.0 }
 0x240   :  { %v2601_v63 = vpop.f32.mrf.mxu0  ;;  %v2479_v43 = vadd.f32 %v5683_v10, %v2346_v59 }
 0x241   :  { %v2734_v4 = vpop.f32.mrf.mxu1  ;;  %v2733_v1 = vadd.f32 %v2732_v27, %v2600_v38  ;;  %v2602_v24 = vadd.f32 %v2601_v63, %v2469_v19  ;;  %3498 = vmatprep.mubr.bf16.mxu1 %v2900_v20  ;;  %v2828_v12 = vmax.f32 %v2731_v8, 0.0  ;;  %v2356_v20 = vadd.f32 %v5696_v2, %v5638_v41 }
 0x242   :  { %v2605_v13 = vpop.f32.mrf.mxu0  ;;  %3499 = vmatmul.mubr.bf16.vlgmr.msra.gmra.mxu1 %v2899_v33 }
 0x243   :  { %v2738_v14 = vpop.f32.mrf.mxu1  ;;  %v2831_v45 = vmax.f32 %v2733_v1, 0.0  ;;  %v2735_v57 = vadd.f32 %v2734_v4, %v2602_v24  ;;  %v2606_v9 = vadd.f32 %v2605_v13, %v5675_v58 }
 0x244   :  { %v2607_v62 = vpop.f32.mrf.mxu0 }
 0x245   :  { %v2740_v21 = vpop.f32.mrf.mxu1  ;;  %v2903_v32 = vpack.c.bf16 %v2831_v45, %v2827_v35  ;;  %v2832_v11 = vmax.f32 %v2735_v57, 0.0  ;;  %v2608_v52 = vadd.f32 %v2607_v62, %v5678_v31  ;;  %v2739_v42 = vadd.f32 %v2738_v14, %v2606_v9 }
 0x246   :  { %v2609_v30 = vpop.f32.mrf.mxu0  ;;  %v2489_v45 = vadd.f32 %v5698_v37, %v2356_v20  ;;  %v5093_v20 = vld [vmem:[#allocation10 + $0x68] sm:$0xff]  }
 0x247   :  { %v2742_v5 = vpop.f32.mrf.mxu1  ;;  %v2904_v39 = vpack.c.bf16 %v2832_v11, %v2828_v12  ;;  %v2610_v33 = vadd.f32 %v2609_v30, %v5685_v6  ;;  %v2741_v27 = vadd.f32 %v2740_v21, %v2608_v52  ;;  %v2835_v31 = vmax.f32 %v2739_v42, 0.0  ;;  %v5089_v11 = vld [vmem:[#allocation10 + $0x78] sm:$0xff]   ;;  %v5091_v30 = vld [vmem:[#allocation10 + $0x70] sm:$0xff]  }
 0x248   :  { %v2611_v3 = vpop.f32.mrf.mxu0  ;;  %v5090_v52 = vld [vmem:[#allocation10 + $0x38] sm:$0xff]   ;;  %4492 = vmatprep.subr.bf16.mxu0 %v5089_v11  ;;  %4568 = vmatprep.subr.bf16.mxu1 %v5089_v11 }
 0x249   :  { %v2744_v46 = vpop.f32.mrf.mxu1  ;;  %v2743_v19 = vadd.f32 %v2742_v5, %v2610_v33  ;;  %v2612_v58 = vadd.f32 %v2611_v3, %v2479_v43  ;;  %3508 = vmatprep.mubr.bf16.mxu1 %v2904_v39  ;;  %v2836_v6 = vmax.f32 %v2741_v27, 0.0  ;;  %4493 = vmatpush3.bf16.msra.mxu0 %v5090_v52 }
 0x24a   :  { %v2615_v51 = vpop.f32.mrf.mxu0  ;;  %3509 = vmatmul.mubr.bf16.gmra.mxu1 %v2903_v32  ;;  %4494 = vmatprep.subr.bf16.mxu0 %v5091_v30 }
 0x24b   :  { %v2748_v38 = vpop.f32.mrf.mxu1  ;;  %v2839_v63 = vmax.f32 %v2743_v19, 0.0  ;;  %v2745_v4 = vadd.f32 %v2744_v46, %v2612_v58  ;;  %v2616_v10 = vadd.f32 %v2615_v51, %v5690_v55  ;;  %4576 = vmatpush3.bf16.msra.mxu1 %v5090_v52  ;;  %v5092_v46 = vld [vmem:[#allocation10 + $0x30] sm:$0xff]  }
 0x24c   :  { %v2617_v8 = vpop.f32.mrf.mxu0  ;;  %4569 = vmatprep.subr.bf16.mxu1 %v5091_v30 }
 0x24d   :  { %v2750_v1 = vpop.f32.mrf.mxu1  ;;  %v2907_v24 = vpack.c.bf16 %v2839_v63, %v2835_v31  ;;  %v2840_v59 = vmax.f32 %v2745_v4, 0.0  ;;  %v2618_v13 = vadd.f32 %v2617_v8, %v5693_v18  ;;  %v2749_v57 = vadd.f32 %v2748_v38, %v2616_v10  ;;  %4495 = vmatpush3.bf16.msra.mxu0 %v5092_v46 }
 0x24e   :  { %v2619_v14 = vpop.f32.mrf.mxu0  ;;  %v2366_v18 = vadd.f32 %v5710_v0, %v5638_v41  ;;  %4496 = vmatprep.subr.bf16.mxu0 %v5093_v20 }
 0x24f   :  { %v2752_v35 = vpop.f32.mrf.mxu1  ;;  %v2908_v2 = vpack.c.bf16 %v2840_v59, %v2836_v6  ;;  %v2620_v9 = vadd.f32 %v2619_v14, %v5700_v48  ;;  %v2751_v12 = vadd.f32 %v2750_v1, %v2618_v13  ;;  %v2843_v37 = vmax.f32 %v2749_v57, 0.0  ;;  %4577 = vmatpush3.bf16.msra.mxu1 %v5092_v46  ;;  %v5094_v1 = vld [vmem:[#allocation10 + $0x28] sm:$0xff]  }
 0x250   :  { %v2621_v62 = vpop.f32.mrf.mxu0  ;;  %v2499_v31 = vadd.f32 %v5712_v54, %v2366_v18  ;;  %v2376_v13 = vadd.f32 %v5724_v22, %v5638_v41  ;;  %4570 = vmatprep.subr.bf16.mxu1 %v5093_v20  ;;  %v5097_v22 = vld [vmem:[#allocation10 + $0x58] sm:$0xff]  }
 0x251   :  { %v2754_v21 = vpop.f32.mrf.mxu1  ;;  %v2753_v32 = vadd.f32 %v2752_v35, %v2620_v9  ;;  %v2622_v55 = vadd.f32 %v2621_v62, %v2489_v45  ;;  %3518 = vmatprep.mubr.bf16.mxu1 %v2908_v2  ;;  %v2844_v27 = vmax.f32 %v2751_v12, 0.0  ;;  %4497 = vmatpush3.bf16.msra.mxu0 %v5094_v1  ;;  %v5096_v62 = vld [vmem:[#allocation10 + $0x20] sm:$0xff]  }
 0x252   :  { %v2625_v5 = vpop.f32.mrf.mxu0  ;;  %3519 = vmatmul.mubr.bf16.gmra.mxu1 %v2907_v24  ;;  %v2509_v30 = vadd.f32 %v5726_v40, %v2376_v13 }
 0x253   :  { %v2758_v43 = vpop.f32.mrf.mxu1  ;;  %v2847_v39 = vmax.f32 %v2753_v32, 0.0  ;;  %v2755_v42 = vadd.f32 %v2754_v21, %v2622_v55  ;;  %v2626_v48 = vadd.f32 %v2625_v5, %v5704_v17  ;;  %4578 = vmatpush3.bf16.msra.mxu1 %v5094_v1 }
 0x254   :  { %v2627_v33 = vpop.f32.mrf.mxu0 }
 0x255   :  { %v2760_v3 = vpop.f32.mrf.mxu1  ;;  %v2911_v19 = vpack.c.bf16 %v2847_v39, %v2843_v37  ;;  %v2848_v58 = vmax.f32 %v2755_v42, 0.0  ;;  %v2628_v0 = vadd.f32 %v2627_v33, %v5707_v25  ;;  %v2759_v63 = vadd.f32 %v2758_v43, %v2626_v48  ;;  %v5095_v25 = vld [vmem:[#allocation10 + $0x60] sm:$0xff]   ;;  %v5098_v39 = vld [vmem:[#allocation10 + $0x18] sm:$0xff]  }
 0x256   :  { %v2629_v51 = vpop.f32.mrf.mxu0  ;;  %4498 = vmatprep.subr.bf16.mxu0 %v5095_v25  ;;  %4571 = vmatprep.subr.bf16.mxu1 %v5095_v25 }
 0x257   :  { %v2762_v38 = vpop.f32.mrf.mxu1  ;;  %v2912_v17 = vpack.c.bf16 %v2848_v58, %v2844_v27  ;;  %v2630_v4 = vadd.f32 %v2629_v51, %v5714_v36  ;;  %v2761_v6 = vadd.f32 %v2760_v3, %v2628_v0  ;;  %v2851_v35 = vmax.f32 %v2759_v63, 0.0  ;;  %4499 = vmatpush3.bf16.msra.mxu0 %v5096_v62  ;;  %4579 = vmatpush3.bf16.msra.mxu1 %v5096_v62 }
 0x258   :  { %v2631_v10 = vpop.f32.mrf.mxu0  ;;  %4500 = vmatprep.subr.bf16.mxu0 %v5097_v22  ;;  %4572 = vmatprep.subr.bf16.mxu1 %v5097_v22 }
 0x259   :  { %v2764_v8 = vpop.f32.mrf.mxu1  ;;  %v2763_v24 = vadd.f32 %v2762_v38, %v2630_v4  ;;  %v2632_v59 = vadd.f32 %v2631_v10, %v2499_v31  ;;  %3528 = vmatprep.mubr.bf16.mxu1 %v2912_v17  ;;  %v2852_v21 = vmax.f32 %v2761_v6, 0.0 }
 0x25a   :  { %v2635_v14 = vpop.f32.mrf.mxu0  ;;  %3529 = vmatmul.mubr.bf16.gmra.mxu1 %v2911_v19 }
 0x25b   :  { %v2768_v54 = vpop.f32.mrf.mxu1  ;;  %v2855_v36 = vmax.f32 %v2763_v24, 0.0  ;;  %v2765_v45 = vadd.f32 %v2764_v8, %v2632_v59  ;;  %v2636_v2 = vadd.f32 %v2635_v14, %v5718_v53  ;;  %4501 = vmatpush3.bf16.msra.mxu0 %v5098_v39  ;;  %4580 = vmatpush3.bf16.msra.mxu1 %v5098_v39 }
 0x25c   :  { %v2637_v57 = vpop.f32.mrf.mxu0 }
 0x25d   :  { %v2770_v9 = vpop.f32.mrf.mxu1  ;;  %v2915_v12 = vpack.c.bf16 %v2855_v36, %v2851_v35  ;;  %v2856_v32 = vmax.f32 %v2765_v45, 0.0  ;;  %v2638_v55 = vadd.f32 %v2637_v57, %v5721_v29  ;;  %v2769_v5 = vadd.f32 %v2768_v54, %v2636_v2 }
 0x25e   :  { %v2639_v11 = vpop.f32.mrf.mxu0  ;;  %v2386_v29 = vadd.f32 %v5737_v34, %v5638_v41 }
 0x25f   :  { %v2772_v52 = vpop.f32.mrf.mxu1  ;;  %v2916_v18 = vpack.c.bf16 %v2856_v32, %v2852_v21  ;;  %v2640_v53 = vadd.f32 %v2639_v11, %v5728_v23  ;;  %v2771_v42 = vadd.f32 %v2770_v9, %v2638_v55  ;;  %v2859_v40 = vmax.f32 %v2769_v5, 0.0 }
 0x260   :  { %v2641_v43 = vpop.f32.mrf.mxu0  ;;  %v2519_v34 = vadd.f32 %v5739_v16, %v2386_v29 }
 0x261   :  { %v2774_v37 = vpop.f32.mrf.mxu1  ;;  %v2773_v48 = vadd.f32 %v2772_v52, %v2640_v53  ;;  %v2642_v33 = vadd.f32 %v2641_v43, %v2509_v30  ;;  %3538 = vmatprep.mubr.bf16.mxu1 %v2916_v18  ;;  %v2860_v20 = vmax.f32 %v2771_v42, 0.0 }
 0x262   :  { %v2645_v3 = vpop.f32.mrf.mxu0  ;;  %3539 = vmatmul.mubr.bf16.gmra.mxu1 %v2915_v12 }
 0x263   :  { %v2778_v46 = vpop.f32.mrf.mxu1  ;;  %v2863_v27 = vmax.f32 %v2773_v48, 0.0  ;;  %v2775_v23 = vadd.f32 %v2774_v37, %v2642_v33  ;;  %v2646_v19 = vadd.f32 %v2645_v3, %v5731_v26 }
 0x264   :  { %v2647_v58 = vpop.f32.mrf.mxu0 }
 0x265   :  { %v2780_v0 = vpop.f32.mrf.mxu1  ;;  %v2919_v51 = vpack.c.bf16 %v2863_v27, %v2859_v40  ;;  %v2864_v38 = vmax.f32 %v2775_v23, 0.0  ;;  %v2648_v31 = vadd.f32 %v2647_v58, %v5734_v7  ;;  %v2779_v4 = vadd.f32 %v2778_v46, %v2646_v19 }
 0x266   :  { %v2649_v17 = vpop.f32.mrf.mxu0 }
 0x267   :  { %v2782_v41 = vpop.f32.mrf.mxu1  ;;  %v2920_v63 = vpack.c.bf16 %v2864_v38, %v2860_v20  ;;  %v2650_v10 = vadd.f32 %v2649_v17, %v5741_v60  ;;  %v2781_v26 = vadd.f32 %v2780_v0, %v2648_v31  ;;  %v2867_v13 = vmax.f32 %v2779_v4, 0.0  ;;  %v5987_v4 = vld [vmem:[#allocation18_spill] sm:$0xff] }
 0x268   :  { %v2651_v8 = vpop.f32.mrf.mxu0 }
 0x269   :  { %v2784_v1 = vpop.f32.mrf.mxu1  ;;  %v2783_v6 = vadd.f32 %v2782_v41, %v2650_v10  ;;  %v2652_v24 = vadd.f32 %v2651_v8, %v2519_v34  ;;  %3548 = vmatprep.mubr.bf16.mxu1 %v2920_v63  ;;  %v2868_v36 = vmax.f32 %v2781_v26, 0.0 }
 0x26a   :  { %v2655_v59 = vpop.f32.mrf.mxu0  ;;  %3549 = vmatmul.mubr.bf16.gmra.mxu1 %v2919_v51 }
 0x26b   :  { %v2788_v25 = vpop.f32.mrf.mxu1  ;;  %v2871_v14 = vmax.f32 %v2783_v6, 0.0  ;;  %v2785_v7 = vadd.f32 %v2784_v1, %v2652_v24  ;;  %v2656_v54 = vadd.f32 %v2655_v59, %v5744_v28  ;;  %v5988_v6 = vld [vmem:[#allocation19_spill] sm:$0xff] }
 0x26c   :  { %v2657_v35 = vpop.f32.mrf.mxu0 }
 0x26d   :  { %v2790_v16 = vpop.f32.mrf.mxu1  ;;  %v2923_v45 = vpack.c.bf16 %v2871_v14, %v2867_v13  ;;  %v2872_v2 = vmax.f32 %v2785_v7, 0.0  ;;  %v2658_v60 = vadd.f32 %v2657_v35, %v5747_v56  ;;  %v2789_v21 = vadd.f32 %v2788_v25, %v2656_v54  ;;  %v5989_v14 = vld [vmem:[#allocation20_spill] sm:$0xff] }
 0x26e   :  { %v2659_v57 = vpop.f32.mrf.mxu0  ;;  %v5099_v35 = vld [vmem:[#allocation10 + $0x50] sm:$0xff]  }
 0x26f   :  { %v2792_v9 = vpop.f32.mrf.mxu1  ;;  %v2924_v62 = vpack.c.bf16 %v2872_v2, %v2868_v36  ;;  %v2660_v12 = vadd.f32 %v2659_v57, %v5750_v15  ;;  %v2791_v22 = vadd.f32 %v2790_v16, %v2658_v60  ;;  %v2875_v18 = vmax.f32 %v2789_v21, 0.0  ;;  %v5100_v2 = vld [vmem:[#allocation10 + $0x10] sm:$0xff]   ;;  %4502 = vmatprep.subr.bf16.mxu0 %v5099_v35  ;;  %4573 = vmatprep.subr.bf16.mxu1 %v5099_v35 }
 0x270   :  { %v2661_v32 = vpop.f32.mrf.mxu0  ;;  %4503 = vmatpush3.bf16.msra.mxu0 %v5100_v2  ;;  %4581 = vmatpush3.bf16.msra.mxu1 %v5100_v2 }
 0x271   :  { %v2794_v55 = vpop.f32.mrf.mxu1  ;;  %v2793_v11 = vadd.f32 %v2792_v9, %v2660_v12  ;;  %v2662_v52 = vadd.f32 %v2661_v32, %v5753_v47  ;;  %3558 = vmatprep.mubr.bf16.mxu1 %v2924_v62  ;;  %v2876_v39 = vmax.f32 %v2791_v22, 0.0  ;;  %v5101_v62 = vld [vmem:[#allocation10 + $0x48] sm:$0xff]   ;;  %v5103_v32 = vld [vmem:[#allocation10 + $0x40] sm:$0xff]  }
 0x272   :  { %v2665_v28 = vpop.f32.mrf.mxu0  ;;  %3559 = vmatmul.mubr.bf16.gmra.mxu1 %v2923_v45  ;;  %v5102_v12 = vld [vmem:[#allocation10 + $0x8] sm:$0xff]   ;;  %4504 = vmatprep.subr.bf16.mxu0 %v5101_v62 }
 0x273   :  { %v2798_v30 = vpop.f32.mrf.mxu1  ;;  %v2879_v5 = vmax.f32 %v2793_v11, 0.0  ;;  %v2795_v53 = vadd.f32 %v2794_v55, %v2662_v52  ;;  %v2666_v56 = vadd.f32 %v2665_v28, %v5756_v44  ;;  %4574 = vmatprep.subr.bf16.mxu1 %v5101_v62  ;;  %v5104_v55 = vld [vmem:[#allocation10] sm:$0xff]  }
 0x274   :  { %v2667_v43 = vpop.f32.mrf.mxu0  ;;  %4505 = vmatpush3.bf16.msra.mxu0 %v5102_v12  ;;  %4582 = vmatpush3.bf16.msra.mxu1 %v5102_v12 }
 0x275   :  { %v2800_v37 = vpop.f32.mrf.mxu1  ;;  %v2927_v42 = vpack.c.bf16 %v2879_v5, %v2875_v18  ;;  %v2880_v15 = vmax.f32 %v2795_v53, 0.0  ;;  %v2668_v48 = vadd.f32 %v2667_v43, %v5759_v49  ;;  %v2799_v47 = vadd.f32 %v2798_v30, %v2666_v56  ;;  %v5986_v49 = vld [vmem:[#allocation17_spill] sm:$0xff]  ;;  %4506 = vmatprep.subr.bf16.mxu0 %v5103_v32  ;;  %4575 = vmatprep.subr.bf16.mxu1 %v5103_v32 }
 0x276   :  { %v2669_v33 = vpop.f32.mrf.mxu0 }
 0x277   :  { %v2802_v29 = vpop.f32.mrf.mxu1  ;;  %v2928_v3 = vpack.c.bf16 %v2880_v15, %v2876_v39  ;;  %v2670_v46 = vadd.f32 %v2669_v33, %v5762_v50  ;;  %v2801_v23 = vadd.f32 %v2800_v37, %v2668_v48  ;;  %v2883_v20 = vmax.f32 %v2799_v47, 0.0 }
 0x278   :  { %v2671_v40 = vpop.f32.mrf.mxu0  ;;  %4507 = vmatpush3.bf16.msra.mxu0 %v5104_v55  ;;  %4583 = vmatpush3.bf16.msra.mxu1 %v5104_v55 }
 0x279   :  { %v2804_v27 = vpop.f32.mrf.mxu1  ;;  %v2803_v19 = vadd.f32 %v2802_v29, %v2670_v46  ;;  %v2672_v58 = vadd.f32 %v2671_v40, %v5765_v61  ;;  %3568 = vmatprep.mubr.bf16.mxu1 %v2928_v3  ;;  %v2884_v34 = vmax.f32 %v2801_v23, 0.0  ;;  %v3001_v40 = vld [vmem:[%s5973_s4] sm:$0x3]  ;;  %v5990_v23 = vld [vmem:[#allocation16_spill] sm:$0xff] }
 0x27a   :  { %v2675_v44 = vpop.f32.mrf.mxu0  ;;  %3569 = vmatmul.mubr.bf16.gmra.mxu1 %v2927_v42 }
 0x27b   :  { %v2808_v0 = vpop.f32.mrf.mxu1  ;;  %v2887_v51 = vmax.f32 %v2803_v19, 0.0  ;;  %v2805_v38 = vadd.f32 %v2804_v27, %v2672_v58  ;;  %v2676_v31 = vadd.f32 %v2675_v44, %v5986_v49  ;;  %v5991_v19 = vsub.s32 1, %v5990_v23 }
 0x27c   :  { %v2677_v17 = vpop.f32.mrf.mxu0  ;;  %v5992_v44 = vsub.s32 0, %v5990_v23 }
 0x27d   :  { %v2810_v41 = vpop.f32.mrf.mxu1  ;;  %v2931_v63 = vpack.c.bf16 %v2887_v51, %v2883_v20  ;;  %v2888_v50 = vmax.f32 %v2805_v38, 0.0  ;;  %v2678_v10 = vadd.f32 %v2677_v17, %v5987_v4  ;;  %v2809_v61 = vadd.f32 %v2808_v0, %v2676_v31 }
 0x27e   :  { %v2679_v8 = vpop.f32.mrf.mxu0  ;;  %v5856_v58 = vrot.slane %v3001_v40, %v5991_v19  ;;  %v5860_v0 = vrot.slane %v3001_v40, %v5992_v44 }
 0x27f   :  { %v2812_v1 = vpop.f32.mrf.mxu1  ;;  %v2932_v26 = vpack.c.bf16 %v2888_v50, %v2884_v34  ;;  %v2680_v24 = vadd.f32 %v2679_v8, %v5988_v6  ;;  %v2811_v25 = vadd.f32 %v2810_v41, %v2678_v10  ;;  %v2891_v16 = vmax.f32 %v2809_v61, 0.0 }
 0x280   :  { %v2681_v59 = vpop.f32.mrf.mxu0 }
 0x281   :  { %v2813_v13 = vadd.f32 %v2812_v1, %v2680_v24  ;;  %v2682_v7 = vadd.f32 %v2681_v59, %v5989_v14  ;;  %3578 = vmatprep.mubr.bf16.mxu1 %v2932_v26  ;;  %v2814_v54 = vpop.f32.mrf.mxu1  ;;  %v2892_v60 = vmax.f32 %v2811_v25, 0.0 }
 0x282   :  { %3579 = vmatmul.mubr.bf16.gmra.mxu1 %v2931_v63  ;;  %v3367_v22 = vpop.f32.mrf.mxu0 }
 0x283   :  { %v2895_v36 = vmax.f32 %v2813_v13, 0.0  ;;  %v2815_v45 = vadd.f32 %v2814_v54, %v2682_v7  ;;  %v3368_v17 = vadd.f32 %v3367_v22, %v5860_v0 }
 0x284   :  { %v3369_v11 = vpop.f32.mrf.mxu0 }
 0x285   :  { %v2935_v57 = vpack.c.bf16 %v2895_v36, %v2891_v16  ;;  %v2896_v9 = vmax.f32 %v2815_v45, 0.0  ;;  %v3370_v49 = vadd.f32 %v3369_v11, %v5856_v58 }
 0x286   :  { %v3371_v52 = vpop.f32.mrf.mxu0 }
 0x287   :  { %v2936_v21 = vpack.c.bf16 %v2896_v9, %v2892_v60  ;;  %v3372_v31 = vadd.f32 %v3371_v52, %v5860_v0 }
 0x288   :  { %v3373_v28 = vpop.f32.mrf.mxu0 }
 0x289   :  { %3588 = vmatprep.mubr.bf16.mxu1 %v2936_v21  ;;  %v3374_v34 = vadd.f32 %v3373_v28, %v5856_v58 }
 0x28a   :  { %3589 = vmatmul.mubr.bf16.gmra.mxu1 %v2935_v57  ;;  %v3377_v30 = vpop.f32.mrf.mxu0 }
 0x28b   :  { %v3378_v35 = vadd.f32 %v3377_v30, %v5860_v0 }
 0x28c   :  { %v3379_v18 = vpop.f32.mrf.mxu0 }
 0x28d   :  { %v3380_v14 = vadd.f32 %v3379_v18, %v5856_v58 }
 0x28e   :  { %v3381_v5 = vpop.f32.mrf.mxu0 }
 0x28f   :  { %v3382_v7 = vadd.f32 %v3381_v5, %v5860_v0 }
 0x290   :  { %v3383_v53 = vpop.f32.mrf.mxu0 }
 0x291   :  { %v3384_v45 = vadd.f32 %v3383_v53, %v5856_v58 }
 0x292   :  { %v3387_v56 = vpop.f32.mrf.mxu0 }
 0x293   :  { %v3388_v53 = vadd.f32 %v3387_v56, %v5860_v0 }
 0x294   :  { %v3389_v43 = vpop.f32.mrf.mxu0 }
 0x295   :  { %v3390_v30 = vadd.f32 %v3389_v43, %v5856_v58 }
 0x296   :  { %v3391_v37 = vpop.f32.mrf.mxu0 }
 0x297   :  { %v3392_v18 = vadd.f32 %v3391_v37, %v5860_v0 }
 0x298   :  { %v3393_v39 = vpop.f32.mrf.mxu0 }
 0x299   :  { %v3394_v19 = vadd.f32 %v3393_v39, %v5856_v58 }
 0x29a   :  { %v5833_v42 = vpop.f32.mrf.mxu0 }
 0x29c   :  { %v5835_v15 = vpop.f32.mrf.mxu0 }
 0x29d   :  { %v3400_v39 = vadd.f32 %v5835_v15, %v5856_v58 }
 0x29e   :  { %v5837_v48 = vpop.f32.mrf.mxu0 }
 0x2a0   :  { %v5839_v33 = vpop.f32.mrf.mxu0 }
 0x2a2   :  { %v5841_v29 = vpop.f32.mrf.mxu0 }
 0x2a4   :  { %v5843_v3 = vpop.f32.mrf.mxu0 }
 0x2a6   :  { %v5845_v47 = vpop.f32.mrf.mxu0 }
 0x2a8   :  { %v5847_v46 = vpop.f32.mrf.mxu0 }
 0x2aa   :  { %v5852_v27 = vpop.f32.mrf.mxu0 }
 0x2ac   :  { %v5862_v51 = vpop.f32.mrf.mxu0 }
 0x2ae   :  { %v5868_v4 = vpop.f32.mrf.mxu0 }
 0x2b0   :  { %v5870_v59 = vpop.f32.mrf.mxu0 }
 0x2b2   :  { %v5876_v57 = vpop.f32.mrf.mxu0 }
 0x2b4   :  { %v5878_v11 = vpop.f32.mrf.mxu0 }
 0x302   :  { %v3500_v20 = vpop.f32.mrf.mxu1 }
 0x303   :  { %v3501_v10 = vadd.f32 %v3500_v20, %v3368_v17 }
 0x304   :  { %v3502_v38 = vpop.f32.mrf.mxu1 }
 0x305   :  { %v3503_v63 = vadd.f32 %v3502_v38, %v3370_v49  ;;  %v3599_v25 = vmax.f32 %v3501_v10, 0.0  ;;  %v5884_v38 = vpop.f32.mrf.mxu0  ;;  %v3402_v10 = vadd.f32 %v5837_v48, %v5860_v0 }
 0x306   :  { %v3504_v41 = vpop.f32.mrf.mxu1 }
 0x307   :  { %v3505_v50 = vadd.f32 %v3504_v41, %v3372_v31  ;;  %v3600_v6 = vmax.f32 %v3503_v63, 0.0  ;;  %v5886_v63 = vpop.f32.mrf.mxu0 }
 0x308   :  { %v3506_v8 = vpop.f32.mrf.mxu1 }
 0x309   :  { %v3507_v1 = vadd.f32 %v3506_v8, %v3374_v34  ;;  %v3601_v26 = vmax.f32 %v3505_v50, 0.0 }
 0x30a   :  { %v3510_v61 = vpop.f32.mrf.mxu1 }
 0x30b   :  { %v3602_v24 = vmax.f32 %v3507_v1, 0.0  ;;  %v3639_v16 = vpack.c.bf16 %v3601_v26, %v3599_v25  ;;  %v3511_v9 = vadd.f32 %v3510_v61, %v3378_v35  ;;  %v3398_v1 = vadd.f32 %v5833_v42, %v5860_v0 }
 0x30c   :  { %v3512_v13 = vpop.f32.mrf.mxu1 }
 0x30d   :  { %v3640_v54 = vpack.c.bf16 %v3602_v24, %v3600_v6  ;;  %v3513_v2 = vadd.f32 %v3512_v13, %v3380_v14  ;;  %v3603_v52 = vmax.f32 %v3511_v9, 0.0  ;;  %v3404_v6 = vadd.f32 %v5839_v33, %v5856_v58  ;;  %v5896_v13 = vpop.f32.mrf.mxu0 }
 0x30e   :  { %v3514_v36 = vpop.f32.mrf.mxu1  ;;  %v3410_v33 = vadd.f32 %v5843_v3, %v5856_v58  ;;  %v3408_v9 = vadd.f32 %v5841_v29, %v5860_v0 }
 0x30f   :  { %v3515_v60 = vadd.f32 %v3514_v36, %v3382_v7  ;;  %3826 = vmatprep.mubr.bf16.mxu0 %v3640_v54  ;;  %v3604_v55 = vmax.f32 %v3513_v2, 0.0  ;;  %v5898_v36 = vpop.f32.mrf.mxu0  ;;  %v3412_v2 = vadd.f32 %v5845_v47, %v5860_v0 }
 0x310   :  { %v3516_v62 = vpop.f32.mrf.mxu1  ;;  %3827 = vmatmul.mubr.bf16.vlgmr.msra.gmra.mxu0 %v3639_v16 }
 0x311   :  { %v3517_v21 = vadd.f32 %v3516_v62, %v3384_v45  ;;  %v3605_v12 = vmax.f32 %v3515_v60, 0.0 }
 0x312   :  { %v3520_v32 = vpop.f32.mrf.mxu1 }
 0x313   :  { %v3606_v22 = vmax.f32 %v3517_v21, 0.0  ;;  %v3641_v40 = vpack.c.bf16 %v3605_v12, %v3603_v52  ;;  %v3521_v49 = vadd.f32 %v3520_v32, %v3388_v53  ;;  %v3414_v12 = vadd.f32 %v5847_v46, %v5856_v58 }
 0x314   :  { %v3522_v28 = vpop.f32.mrf.mxu1  ;;  %v3422_v46 = vadd.f32 %v5868_v4, %v5860_v0 }
 0x315   :  { %v3642_v5 = vpack.c.bf16 %v3606_v22, %v3604_v55  ;;  %v3523_v44 = vadd.f32 %v3522_v28, %v3390_v30  ;;  %v3607_v56 = vmax.f32 %v3521_v49, 0.0  ;;  %v3441_v22 = vpop.f32.mrf.mxu0 }
 0x316   :  { %v3524_v23 = vpop.f32.mrf.mxu1 }
 0x317   :  { %v3525_v20 = vadd.f32 %v3524_v23, %v3392_v18  ;;  %3834 = vmatprep.mubr.bf16.mxu0 %v3642_v5  ;;  %v3608_v34 = vmax.f32 %v3523_v44, 0.0  ;;  %v3443_v53 = vpop.f32.mrf.mxu0  ;;  %v3420_v23 = vadd.f32 %v5862_v51, %v5856_v58  ;;  %v3418_v44 = vadd.f32 %v5852_v27, %v5860_v0 }
 0x318   :  { %v3526_v31 = vpop.f32.mrf.mxu1  ;;  %3835 = vmatmul.mubr.bf16.gmra.mxu0 %v3641_v40 }
 0x319   :  { %v3527_v17 = vadd.f32 %v3526_v31, %v3394_v19  ;;  %v3609_v41 = vmax.f32 %v3525_v20, 0.0  ;;  %v3424_v31 = vadd.f32 %v5870_v59, %v5856_v58  ;;  %v3432_v59 = vadd.f32 %v5884_v38, %v5860_v0 }
 0x31a   :  { %v3530_v43 = vpop.f32.mrf.mxu1 }
 0x31b   :  { %v3610_v37 = vmax.f32 %v3527_v17, 0.0  ;;  %v3643_v26 = vpack.c.bf16 %v3609_v41, %v3607_v56  ;;  %v3531_v14 = vadd.f32 %v3530_v43, %v3398_v1  ;;  %v3447_v43 = vpop.f32.mrf.mxu0  ;;  %v3430_v1 = vadd.f32 %v5878_v11, %v5856_v58 }
 0x31c   :  { %v3532_v50 = vpop.f32.mrf.mxu1 }
 0x31d   :  { %v3644_v8 = vpack.c.bf16 %v3610_v37, %v3608_v34  ;;  %v3533_v24 = vadd.f32 %v3532_v50, %v3400_v39  ;;  %v3611_v42 = vmax.f32 %v3531_v14, 0.0 }
 0x31e   :  { %v3534_v61 = vpop.f32.mrf.mxu1 }
 0x31f   :  { %v3535_v25 = vadd.f32 %v3534_v61, %v3402_v10  ;;  %3842 = vmatprep.mubr.bf16.mxu0 %v3644_v8  ;;  %v3612_v35 = vmax.f32 %v3533_v24, 0.0  ;;  %v3449_v10 = vpop.f32.mrf.mxu0  ;;  %v3428_v61 = vadd.f32 %v5876_v57, %v5860_v0 }
 0x320   :  { %v3536_v7 = vpop.f32.mrf.mxu1  ;;  %3843 = vmatmul.mubr.bf16.gmra.mxu0 %v3643_v26 }
 0x321   :  { %v3537_v15 = vadd.f32 %v3536_v7, %v3404_v6  ;;  %v3613_v54 = vmax.f32 %v3535_v25, 0.0  ;;  %v3434_v25 = vadd.f32 %v5886_v63, %v5856_v58  ;;  %v3442_v63 = vadd.f32 %v3441_v22, %v5860_v0 }
 0x322   :  { %v3540_v48 = vpop.f32.mrf.mxu1 }
 0x323   :  { %v3614_v16 = vmax.f32 %v3537_v15, 0.0  ;;  %v3645_v62 = vpack.c.bf16 %v3613_v54, %v3611_v42  ;;  %v3541_v52 = vadd.f32 %v3540_v48, %v3408_v9  ;;  %v3451_v15 = vpop.f32.mrf.mxu0  ;;  %v3438_v9 = vadd.f32 %v5896_v13, %v5860_v0 }
 0x324   :  { %v3542_v45 = vpop.f32.mrf.mxu1  ;;  %v3450_v13 = vadd.f32 %v3449_v10, %v5856_v58 }
 0x325   :  { %v3646_v60 = vpack.c.bf16 %v3614_v16, %v3612_v35  ;;  %v3543_v32 = vadd.f32 %v3542_v45, %v3410_v33  ;;  %v3615_v40 = vmax.f32 %v3541_v52, 0.0  ;;  %v3453_v45 = vpop.f32.mrf.mxu0 }
 0x326   :  { %v3544_v21 = vpop.f32.mrf.mxu1 }
 0x327   :  { %v3545_v55 = vadd.f32 %v3544_v21, %v3412_v2  ;;  %3850 = vmatprep.mubr.bf16.mxu0 %v3646_v60  ;;  %v3616_v47 = vmax.f32 %v3543_v32, 0.0  ;;  %v3440_v2 = vadd.f32 %v5898_v36, %v5856_v58  ;;  %v3457_v52 = vpop.f32.mrf.mxu0 }
 0x328   :  { %v3546_v28 = vpop.f32.mrf.mxu1  ;;  %3851 = vmatmul.mubr.bf16.gmra.mxu0 %v3645_v62 }
 0x329   :  { %v3547_v3 = vadd.f32 %v3546_v28, %v3414_v12  ;;  %v3617_v30 = vmax.f32 %v3545_v55, 0.0  ;;  %v3444_v12 = vadd.f32 %v3443_v53, %v5856_v58 }
 0x32a   :  { %v3550_v18 = vpop.f32.mrf.mxu1 }
 0x32b   :  { %v3618_v5 = vmax.f32 %v3547_v3, 0.0  ;;  %v3647_v20 = vpack.c.bf16 %v3617_v30, %v3615_v40  ;;  %v3551_v34 = vadd.f32 %v3550_v18, %v3418_v44 }
 0x32c   :  { %v3552_v29 = vpop.f32.mrf.mxu1 }
 0x32d   :  { %v3648_v19 = vpack.c.bf16 %v3618_v5, %v3616_v47  ;;  %v3553_v17 = vadd.f32 %v3552_v29, %v3420_v23  ;;  %v3619_v8 = vmax.f32 %v3551_v34, 0.0  ;;  %v3459_v5 = vpop.f32.mrf.mxu0  ;;  %v3452_v23 = vadd.f32 %v3451_v15, %v5860_v0 }
 0x32e   :  { %v3554_v49 = vpop.f32.mrf.mxu1 }
 0x32f   :  { %v3555_v41 = vadd.f32 %v3554_v49, %v3422_v46  ;;  %3858 = vmatprep.mubr.bf16.mxu0 %v3648_v19  ;;  %v3620_v4 = vmax.f32 %v3553_v17, 0.0  ;;  %v3448_v46 = vadd.f32 %v3447_v43, %v5860_v0  ;;  %v3461_v17 = vpop.f32.mrf.mxu0  ;;  %v3460_v43 = vadd.f32 %v3459_v5, %v5856_v58 }
 0x330   :  { %v3556_v37 = vpop.f32.mrf.mxu1  ;;  %3859 = vmatmul.mubr.bf16.gmra.mxu0 %v3647_v20  ;;  %v3454_v20 = vadd.f32 %v3453_v45, %v5856_v58 }
 0x331   :  { %v3557_v51 = vadd.f32 %v3556_v37, %v3424_v31  ;;  %v3621_v56 = vmax.f32 %v3555_v41, 0.0 }
 0x332   :  { %v3560_v50 = vpop.f32.mrf.mxu1 }
 0x333   :  { %v3622_v39 = vmax.f32 %v3557_v51, 0.0  ;;  %v3649_v6 = vpack.c.bf16 %v3621_v56, %v3619_v8  ;;  %v3561_v54 = vadd.f32 %v3560_v50, %v3428_v61 }
 0x334   :  { %v3562_v27 = vpop.f32.mrf.mxu1 }
 0x335   :  { %v3650_v26 = vpack.c.bf16 %v3622_v39, %v3620_v4  ;;  %v3563_v14 = vadd.f32 %v3562_v27, %v3430_v1  ;;  %v3623_v33 = vmax.f32 %v3561_v54, 0.0  ;;  %v3463_v39 = vpop.f32.mrf.mxu0  ;;  %v3462_v27 = vadd.f32 %v3461_v17, %v5860_v0 }
 0x336   :  { %v3564_v24 = vpop.f32.mrf.mxu1 }
 0x337   :  { %v3565_v7 = vadd.f32 %v3564_v24, %v3432_v59  ;;  %3866 = vmatprep.mubr.bf16.mxu1 %v3650_v26  ;;  %v3624_v38 = vmax.f32 %v3563_v14, 0.0  ;;  %v3458_v59 = vadd.f32 %v3457_v52, %v5860_v0 }
 0x338   :  { %v3566_v48 = vpop.f32.mrf.mxu1  ;;  %3867 = vmatmul.mubr.bf16.vlgmr.msra.gmra.mxu1 %v3649_v6  ;;  %v3464_v6 = vadd.f32 %v3463_v39, %v5856_v58  ;;  %v5941_v58 = vld [vmem:[%s5975_s6] ss:$0 sm:$0xff]  ;;  %s5318_s6 = smov [#allocation11]  }
 0x339   :  { %v3567_v11 = vadd.f32 %v3566_v48, %v3434_v25  ;;  %v3625_v35 = vmax.f32 %v3565_v7, 0.0  ;;  %s4012_s9 = sshll.u32 %s5318_s6, 4  ;;  %s4013_s9 = int_to_ptr.vmem [resolvable:$true] %s4012_s9 }
 0x33a   :  { %v3570_v16 = vpop.f32.mrf.mxu1  ;;  %s5276_s10 = scalar_lea.vmem %s4013_s9, 1280  ;;  %p5281_p12 = scmp.lt.s32.totalorder %s4013_s9, %s4013_s9 }
 0x33b   :  { %v3626_v42 = vmax.f32 %v3567_v11, 0.0  ;;  %v3651_v62 = vpack.c.bf16 %v3625_v35, %v3623_v33  ;;  %v3571_v28 = vadd.f32 %v3570_v16, %v3438_v9  ;;  %p5277_p11 = scmp.ne.s32.totalorder %s4013_s9, %s5276_s10  ;;  %p5282_p13 = scmp.lt.s32.totalorder %s5276_s10, %s5276_s10 }
 0x33c   :  { %v3572_v57 = vpop.f32.mrf.mxu1 }
 0x33d   :  { %v3652_v60 = vpack.c.bf16 %v3626_v42, %v3624_v38  ;;  %v3573_v32 = vadd.f32 %v3572_v57, %v3440_v2  ;;  %v3627_v40 = vmax.f32 %v3571_v28, 0.0  ;;  %p5283_p0 = por %p5282_p13, %p5281_p12 }
 0x33e   :  { %v3574_v21 = vpop.f32.mrf.mxu1 }
 0x33f   :  { %v3575_v55 = vadd.f32 %v3574_v21, %v3442_v63  ;;  %3874 = vmatprep.mubr.bf16.mxu1 %v3652_v60  ;;  %v3628_v47 = vmax.f32 %v3573_v32, 0.0  ;;  %p5284_p1 = pnand %p5283_p0, %p5277_p11 }
 0x340   :  { %v3576_v3 = vpop.f32.mrf.mxu1  ;;  %3875 = vmatmul.mubr.bf16.gmra.mxu1 %v3651_v62 }
 0x341   :  { %v3577_v30 = vadd.f32 %v3576_v3, %v3444_v12  ;;  %v3629_v18 = vmax.f32 %v3575_v55, 0.0 }
 0x342   :  { %v3580_v36 = vpop.f32.mrf.mxu1 }
 0x343   :  { %v3630_v22 = vmax.f32 %v3577_v30, 0.0  ;;  %v3653_v19 = vpack.c.bf16 %v3629_v18, %v3627_v40  ;;  %v3581_v41 = vadd.f32 %v3580_v36, %v3448_v46 }
 0x344   :  { %v3582_v29 = vpop.f32.mrf.mxu1 }
 0x345   :  { %v3654_v53 = vpack.c.bf16 %v3630_v22, %v3628_v47  ;;  %v3583_v49 = vadd.f32 %v3582_v29, %v3450_v13  ;;  %v3631_v10 = vmax.f32 %v3581_v41, 0.0 }
 0x346   :  { %v3584_v44 = vpop.f32.mrf.mxu1 }
 0x347   :  { %v3585_v31 = vadd.f32 %v3584_v44, %v3452_v23  ;;  %3882 = vmatprep.mubr.bf16.mxu1 %v3654_v53  ;;  %v3632_v50 = vmax.f32 %v3583_v49, 0.0 }
 0x348   :  { %v3586_v34 = vpop.f32.mrf.mxu1  ;;  %3883 = vmatmul.mubr.bf16.gmra.mxu1 %v3653_v19 }
 0x349   :  { %v3587_v37 = vadd.f32 %v3586_v34, %v3454_v20  ;;  %v3633_v51 = vmax.f32 %v3585_v31, 0.0 }
 0x34a   :  { %v3590_v56 = vpop.f32.mrf.mxu1 }
 0x34b   :  { %v3634_v4 = vmax.f32 %v3587_v37, 0.0  ;;  %v3655_v26 = vpack.c.bf16 %v3633_v51, %v3631_v10  ;;  %v3591_v14 = vadd.f32 %v3590_v56, %v3458_v59 }
 0x34c   :  { %v3592_v8 = vpop.f32.mrf.mxu1 }
 0x34d   :  { %v3656_v1 = vpack.c.bf16 %v3634_v4, %v3632_v50  ;;  %v3593_v24 = vadd.f32 %v3592_v8, %v3460_v43  ;;  %v3635_v35 = vmax.f32 %v3591_v14, 0.0 }
 0x34e   :  { %v3594_v61 = vpop.f32.mrf.mxu1 }
 0x34f   :  { %v3595_v25 = vadd.f32 %v3594_v61, %v3462_v27  ;;  %3890 = vmatprep.mubr.bf16.mxu1 %v3656_v1  ;;  %v3636_v48 = vmax.f32 %v3593_v24, 0.0 }
 0x350   :  { %v3596_v7 = vpop.f32.mrf.mxu1  ;;  %3891 = vmatmul.mubr.bf16.gmra.mxu1 %v3655_v26 }
 0x351   :  { %v3597_v15 = vadd.f32 %v3596_v7, %v3464_v6  ;;  %v3637_v54 = vmax.f32 %v3595_v25, 0.0 }
 0x353   :  { %v3638_v11 = vmax.f32 %v3597_v15, 0.0  ;;  %v3657_v38 = vpack.c.bf16 %v3637_v54, %v3635_v35 }
 0x355   :  { %v3658_v16 = vpack.c.bf16 %v3638_v11, %v3636_v48 }
 0x357   :  { %3898 = vmatprep.mubr.bf16.mxu1 %v3658_v16 }
 0x358   :  { %3899 = vmatmul.mubr.bf16.gmra.mxu1 %v3657_v38 }
 0x3d0   :  { %v4508_v0 = vpop.f32.mrf.mxu0 }
 0x3d2   :  { %v4509_v42 = vpop.f32.mrf.mxu0 }
 0x3d3   :  { %v4510_v33 = vadd.f32 %v4509_v42, %v4508_v0 }
 0x3d4   :  { %v4511_v45 = vpop.f32.mrf.mxu0 }
 0x3d5   :  { %v3829_v60 = vadd.f32 %v4510_v33, %v5941_v58 }
 0x3d6   :  { %v4512_v57 = vpop.f32.mrf.mxu0 }
 0x3d7   :  { %v4513_v2 = vadd.f32 %v4512_v57, %v4511_v45 }
 0x3d8   :  { %v4514_v63 = vpop.f32.mrf.mxu0 }
 0x3d9   :  { %v3832_v9 = vadd.f32 %v4513_v2, %v5941_v58 }
 0x3da   :  { %v4515_v62 = vpop.f32.mrf.mxu0 }
 0x3db   :  { %v4436_v21 = vpack.c.bf16 %v3832_v9, %v3829_v60  ;;  %v4516_v32 = vadd.f32 %v4515_v62, %v4514_v63 }
 0x3dc   :  { %v4517_v12 = vpop.f32.mrf.mxu0 }
 0x3dd   :  { %4437 = vst [vmem:[#allocation11] sm:$0xff] %v4436_v21   ;;  %v3837_v3 = vadd.f32 %v4516_v32, %v5941_v58 }
 0x3de   :  { %v4518_v55 = vpop.f32.mrf.mxu0 }
 0x3df   :  { %v4519_v52 = vadd.f32 %v4518_v55, %v4517_v12 }
 0x3e0   :  { %v4520_v28 = vpop.f32.mrf.mxu0 }
 0x3e1   :  { %v3840_v30 = vadd.f32 %v4519_v52, %v5941_v58 }
 0x3e2   :  { %v4521_v18 = vpop.f32.mrf.mxu0 }
 0x3e3   :  { %v4441_v36 = vpack.c.bf16 %v3840_v30, %v3837_v3  ;;  %v4522_v22 = vadd.f32 %v4521_v18, %v4520_v28 }
 0x3e4   :  { %v4523_v47 = vpop.f32.mrf.mxu0 }
 0x3e5   :  { %4483 = vst [vmem:[#allocation11 + $0x8] sm:$0xff] %v4441_v36   ;;  %v3845_v13 = vadd.f32 %v4522_v22, %v5941_v58 }
 0x3e6   :  { %v4524_v5 = vpop.f32.mrf.mxu0 }
 0x3e7   :  { %v4525_v40 = vadd.f32 %v4524_v5, %v4523_v47 }
 0x3e8   :  { %v4526_v29 = vpop.f32.mrf.mxu0 }
 0x3e9   :  { %v3848_v23 = vadd.f32 %v4525_v40, %v5941_v58 }
 0x3ea   :  { %v4527_v53 = vpop.f32.mrf.mxu0 }
 0x3eb   :  { %v4446_v46 = vpack.c.bf16 %v3848_v23, %v3845_v13  ;;  %v4528_v44 = vadd.f32 %v4527_v53, %v4526_v29 }
 0x3ec   :  { %v4529_v19 = vpop.f32.mrf.mxu0 }
 0x3ed   :  { %4484 = vst [vmem:[#allocation11 + $0x10] sm:$0xff] %v4446_v46   ;;  %v3853_v17 = vadd.f32 %v4528_v44, %v5941_v58 }
 0x3ee   :  { %v4530_v20 = vpop.f32.mrf.mxu0 }
 0x3ef   :  { %v4531_v49 = vadd.f32 %v4530_v20, %v4529_v19 }
 0x3f0   :  { %v4532_v31 = vpop.f32.mrf.mxu0 }
 0x3f1   :  { %v3856_v41 = vadd.f32 %v4531_v49, %v5941_v58 }
 0x3f2   :  { %v4533_v34 = vpop.f32.mrf.mxu0 }
 0x3f3   :  { %v4451_v37 = vpack.c.bf16 %v3856_v41, %v3853_v17  ;;  %v4534_v56 = vadd.f32 %v4533_v34, %v4532_v31 }
 0x3f4   :  { %v4535_v51 = vpop.f32.mrf.mxu0 }
 0x3f5   :  { %4485 = vst [vmem:[#allocation11 + $0x18] sm:$0xff] %v4451_v37   ;;  %v3861_v10 = vadd.f32 %v4534_v56, %v5941_v58 }
 0x3f6   :  { %v4536_v50 = vpop.f32.mrf.mxu0 }
 0x3f7   :  { %v4537_v4 = vadd.f32 %v4536_v50, %v4535_v51 }
 0x3f8   :  { %v4538_v39 = vpop.f32.mrf.mxu1 }
 0x3f9   :  { %v3864_v8 = vadd.f32 %v4537_v4, %v5941_v58 }
 0x3fa   :  { %v4539_v43 = vpop.f32.mrf.mxu1 }
 0x3fb   :  { %v4456_v27 = vpack.c.bf16 %v3864_v8, %v3861_v10  ;;  %v4540_v59 = vadd.f32 %v4539_v43, %v4538_v39 }
 0x3fc   :  { %v4541_v1 = vpop.f32.mrf.mxu1 }
 0x3fd   :  { %4486 = vst [vmem:[#allocation11 + $0x20] sm:$0xff] %v4456_v27   ;;  %v3869_v24 = vadd.f32 %v4540_v59, %v5941_v58 }
 0x3fe   :  { %v4542_v26 = vpop.f32.mrf.mxu1 }
 0x3ff   :  { %v4543_v61 = vadd.f32 %v4542_v26, %v4541_v1 }
 0x400   :  { %v4544_v6 = vpop.f32.mrf.mxu1 }
 0x401   :  { %v3872_v25 = vadd.f32 %v4543_v61, %v5941_v58 }
 0x402   :  { %v4545_v14 = vpop.f32.mrf.mxu1 }
 0x403   :  { %v4461_v7 = vpack.c.bf16 %v3872_v25, %v3869_v24  ;;  %v4546_v54 = vadd.f32 %v4545_v14, %v4544_v6 }
 0x404   :  { %v4547_v15 = vpop.f32.mrf.mxu1 }
 0x405   :  { %4487 = vst [vmem:[#allocation11 + $0x28] sm:$0xff] %v4461_v7   ;;  %v3877_v16 = vadd.f32 %v4546_v54, %v5941_v58 }
 0x406   :  { %v4548_v48 = vpop.f32.mrf.mxu1 }
 0x407   :  { %v4549_v11 = vadd.f32 %v4548_v48, %v4547_v15 }
 0x408   :  { %v4550_v35 = vpop.f32.mrf.mxu1 }
 0x409   :  { %v3880_v38 = vadd.f32 %v4549_v11, %v5941_v58 }
 0x40a   :  { %v4551_v0 = vpop.f32.mrf.mxu1 }
 0x40b   :  { %v4466_v42 = vpack.c.bf16 %v3880_v38, %v3877_v16  ;;  %v4552_v33 = vadd.f32 %v4551_v0, %v4550_v35 }
 0x40c   :  { %v4553_v45 = vpop.f32.mrf.mxu1 }
 0x40d   :  { %4488 = vst [vmem:[#allocation11 + $0x30] sm:$0xff] %v4466_v42   ;;  %v3885_v60 = vadd.f32 %v4552_v33, %v5941_v58 }
 0x40e   :  { %v4554_v57 = vpop.f32.mrf.mxu1 }
 0x40f   :  { %v4555_v2 = vadd.f32 %v4554_v57, %v4553_v45 }
 0x410   :  { %v4556_v63 = vpop.f32.mrf.mxu1 }
 0x411   :  { %v3888_v9 = vadd.f32 %v4555_v2, %v5941_v58 }
 0x412   :  { %v4557_v62 = vpop.f32.mrf.mxu1 }
 0x413   :  { %v4471_v21 = vpack.c.bf16 %v3888_v9, %v3885_v60  ;;  %v4558_v32 = vadd.f32 %v4557_v62, %v4556_v63 }
 0x414   :  { %v4559_v12 = vpop.f32.mrf.mxu1 }
 0x415   :  { %4489 = vst [vmem:[#allocation11 + $0x38] sm:$0xff] %v4471_v21   ;;  %v3893_v3 = vadd.f32 %v4558_v32, %v5941_v58 }
 0x416   :  { %v4560_v55 = vpop.f32.mrf.mxu1 }
 0x417   :  { %v4561_v52 = vadd.f32 %v4560_v55, %v4559_v12 }
 0x418   :  { %v4562_v28 = vpop.f32.mrf.mxu1 }
 0x419   :  { %v3896_v30 = vadd.f32 %v4561_v52, %v5941_v58 }
 0x41a   :  { %v4563_v18 = vpop.f32.mrf.mxu1 }
 0x41b   :  { %v4476_v36 = vpack.c.bf16 %v3896_v30, %v3893_v3  ;;  %v4564_v22 = vadd.f32 %v4563_v18, %v4562_v28 }
 0x41c   :  { %v4565_v47 = vpop.f32.mrf.mxu1 }
 0x41d   :  { %4490 = vst [vmem:[#allocation11 + $0x40] sm:$0xff] %v4476_v36   ;;  %v3901_v29 = vadd.f32 %v4564_v22, %v5941_v58 }
 0x41e   :  { %v4566_v5 = vpop.f32.mrf.mxu1 }
 0x41f   :  { %v4567_v40 = vadd.f32 %v4566_v5, %v4565_v47 }
 0x421   :  { %v3904_v13 = vadd.f32 %v4567_v40, %v5941_v58 }
 0x423   :  { %v4481_v23 = vpack.c.bf16 %v3904_v13, %v3901_v29 }
 0x425   :  { %4491 = vst [vmem:[#allocation11 + $0x48] sm:$0xff] %v4481_v23  }
 0x426   :  { %5287 = shalt.err (!%p5284_p1)
}
 0x427   :  { %4018 = dma.vmem_to_hbm [thread:$0]  %s4013_s9, 1280, %s5976_s7, [#allocation4], %s5315_s0, %s5315_s0, %s5316_s28  }
 0x428   :  { %5302 = dma.done.wait [#allocation4], 1280  }
 0x429   :  { %5303 = vsyncadd [#allocation4], 4294966016 }
 0x42a   :  { %4022 = vsyncpa [#allocation3], 1 }
 0x42b   :  { %4023 = vsyncpa [#allocation6], 1 }
 0x42c   :  { %4024 = vsyncpa [#allocation9], 1 }
 0x42d   :  { %4025 = vsyncpa [#allocation4], 1 }

</bundles_post_ra>
